<compile_context>
chip_gen: v7x
topology: tpu7x:2x2x1
jax: 0.10.0
libtpu: 0.0.40
codegen_flags: <defaults>
</compile_context>

<pallas_src>
import jax
import jax.numpy as jnp
from jax.experimental import pallas as pl
from jax.experimental.pallas import tpu as pltpu


# --------------------------------------------------------------------------- #
# kernel
# --------------------------------------------------------------------------- #
def _make_kernel(Bt, H, W, C, K):
    P = K // 2                       # halo of the fused KxK depthwise conv
    Hp, Wp = H + 2 * P, W + 2 * P

    def kernel(x_ref, taps_ref, bias_ref, out_ref, pad_buf):
        f32 = jnp.float32

        # ---- refresh only the halo border that the taps actually read. ------
        # (VMEM scratch persists per core but is NOT zero-initialized, and with
        #  a "parallel" batch axis there is no portable "first step on this
        #  core" predicate, so this cheap refresh runs every grid step.)
        pad_buf[0:P, :, :] = jnp.zeros((P, Wp, C), f32)
        pad_buf[P + H:Hp, :, :] = jnp.zeros((P, Wp, C), f32)
        pad_buf[P:P + H, 0:P, :] = jnp.zeros((H, P, C), f32)
        pad_buf[P:P + H, P + W:Wp, :] = jnp.zeros((H, P, C), f32)

        bias = bias_ref[0:1, :]                     # (1, C) -> broadcasts

        for b in range(Bt):                         # static unroll, batch tile
            # interior is fully overwritten for every image
            pad_buf[P:P + H, P:P + W, :] = x_ref[b]

            # single fused KxK depthwise conv: accumulate in registers, no
            # accumulator scratch, one store per image.
            # NOTE: dx offsets are sublane-misaligned slices of the padded
            # buffer; Mosaic lowers them to load+rotate. Pre-shifted strips via
            # pltpu.roll would move that work to the XLU, at the cost of much
            # higher vreg pressure for whole-map accumulation; kept simple here.
            acc = None
            for dy in range(K):
                for dx in range(K):
                    t = dy * K + dx
                    term = (pad_buf[dy:dy + H, dx:dx + W, :]
                            * taps_ref[t:t + 1, :])
                    acc = term if acc is None else acc + term

            out_ref[b] = (acc + bias).astype(out_ref.dtype)

    return kernel


# --------------------------------------------------------------------------- #
# parameter folding (eval-mode): whole module -> one KxK tap set + bias
# --------------------------------------------------------------------------- #
def _fold_params(params, k, eps=1e-5):
    C = params["w1"].shape[0]
    K = max(k, 3)                    # fused kernel must cover the 3x3 branch
    R = K // 2
    pk = k // 2

    def fold_bn(bn):
        gamma, beta, mean, var = bn
        s = gamma / jnp.sqrt(var + eps)
        return s, beta - mean * s

    s1, b1 = fold_bn(params["bn_conv"])    # BN after k x k depthwise conv
    s3, b3 = fold_bn(params["bn_conv3"])   # BN after 3 x 3 depthwise conv
    sf, bf = fold_bn(params["bn_final"])   # final BN

    taps = jnp.zeros((K, K, C), jnp.float32)
    taps = taps.at[R - pk:R + pk + 1, R - pk:R + pk + 1, :].add(params["wk"] * s1)
    taps = taps.at[R - 1:R + 2, R - 1:R + 2, :].add(params["w3"] * s3)
    taps = taps.at[R, R, :].add(1.0 + params["w1"])      # identity + 1x1 dw conv
    taps = taps * sf

    bias = sf * (b1 + params["b1c"] + b3) + bf

    return taps.reshape(K * K, C), bias.reshape(1, C), K


def _pick_batch_tile(B, H, W, C):
    """Coarsen grid steps to >=~1-2 MiB blocks, but keep >=2 steps when B>=2
    so both TensorCores of a v7x megacore get work."""
    blk = H * W * C * 4
    best = 1
    for bt in range(1, min(B, 8) + 1):
        if bt * blk > (2 << 20):
            break
        if B % bt != 0:
            continue
        if B >= 2 and B // bt < 2:
            continue
        best = bt
    return best


# --------------------------------------------------------------------------- #
# wrappers
# --------------------------------------------------------------------------- #
def spatial_forward_nhwc(x_nhwc, params, k):
    """Preferred entry point: channel-last in/out, no layout transposes."""
    assert k % 2 == 1, "spatial expects an odd kernel size"
    B, H, W, C = x_nhwc.shape
    taps, bias, K = _fold_params(params, k)
    P = K // 2
    Hp, Wp = H + 2 * P, W + 2 * P
    Bt = _pick_batch_tile(B, H, W, C)
    assert B % Bt == 0

    x = x_nhwc.astype(jnp.float32)

    # real VMEM footprint (in/out are double buffered by the pipeline) + 25%
    # headroom + fixed slack for compiler-internal scratch / register spills.
    blk = Bt * H * W * C * 4
    est = (2 * blk                        # input block, double buffered
           + 2 * blk                      # output block, double buffered
           + Hp * Wp * C * 4              # padded-input scratch
           + 2 * (K * K + 1) * C * 4)     # taps + bias, double buffered
    vmem_bytes = int(est * 1.25) + (4 << 20)

    out = pl.pallas_call(
        _make_kernel(Bt, H, W, C, K),
        out_shape=jax.ShapeDtypeStruct((B, H, W, C), jnp.float32),
        grid=(B // Bt,),
        in_specs=[
            pl.BlockSpec((Bt, H, W, C), lambda b: (b, 0, 0, 0)),
            pl.BlockSpec((K * K, C), lambda b: (0, 0)),
            pl.BlockSpec((1, C), lambda b: (0, 0)),
        ],
        out_specs=pl.BlockSpec((Bt, H, W, C), lambda b: (b, 0, 0, 0)),
        scratch_shapes=[pltpu.VMEM((Hp, Wp, C), jnp.float32)],  # padded image
        compiler_params=pltpu.CompilerParams(
            dimension_semantics=("parallel",),
            vmem_limit_bytes=vmem_bytes),
    )(x, taps, bias)
    return out


def spatial_forward(x_nchw, params, k):
    """NCHW wrapper matching the PyTorch module interface.

    The two transposes below are pure layout plumbing (each is a full HBM
    read+write); when the surrounding model keeps NHWC, call
    `spatial_forward_nhwc` directly and they disappear."""
    x = jnp.transpose(x_nchw, (0, 2, 3, 1))
    out = spatial_forward_nhwc(x, params, k)
    return jnp.transpose(out, (0, 3, 1, 2))


# --------------------------------------------------------------------------- #
# parameters & pure-JAX reference (unfused, mirrors the PyTorch forward)
# --------------------------------------------------------------------------- #
def init_params(key, C, k):
    ks = jax.random.split(key, 7)
    wk = jax.random.normal(ks[0], (k, k, C), jnp.float32) * (1.0 / k)
    w3 = jax.random.normal(ks[1], (3, 3, C), jnp.float32) * (1.0 / 3.0)
    w1 = 1.0 + 0.1 * jax.random.normal(ks[2], (C,), jnp.float32)
    b1c = 0.1 * jax.random.normal(ks[3], (C,), jnp.float32)

    def bn_params(kk):
        k1, k2, k3, k4 = jax.random.split(kk, 4)
        gamma = 1.0 + 0.1 * jax.random.normal(k1, (C,), jnp.float32)
        beta = 0.1 * jax.random.normal(k2, (C,), jnp.float32)
        mean = 0.1 * jax.random.normal(k3, (C,), jnp.float32)
        var = 1.0 + 0.1 * jax.random.uniform(k4, (C,), jnp.float32)
        return gamma, beta, mean, var

    return dict(wk=wk, w3=w3, w1=w1, b1c=b1c,
                bn_conv=bn_params(ks[4]), bn_conv3=bn_params(ks[5]),
                bn_final=bn_params(ks[6]))


def spatial_reference(x_nchw, params, k):
    """Unfused XLA reference of the PyTorch forward (eval-mode BN)."""
    eps = 1e-5
    C = x_nchw.shape[1]

    def dwconv(x, w_hwc, pad):
        kk = w_hwc.shape[0]
        w = w_hwc.reshape(kk, kk, 1, C)
        return jax.lax.conv_general_dilated(
            x, w, window_strides=(1, 1),
            padding=[(pad, pad), (pad, pad)],
            dimension_numbers=("NCHW", "HWIO", "NCHW"),
            feature_group_count=C)

    def bn(x, p):
        gamma, beta, mean, var = p
        s = gamma / jnp.sqrt(var + eps)
        return x * s[None, :, None, None] + (beta - mean * s)[None, :, None, None]

    x = x_nchw.astype(jnp.float32)
    y = (bn(dwconv(x, params["wk"], k // 2), params["bn_conv"])
         + x * params["w1"][None, :, None, None]
         + params["b1c"][None, :, None, None]
         + bn(dwconv(x, params["w3"], 1), params["bn_conv3"])
         + x)
    return bn(y, params["bn_final"])


# --------------------------------------------------------------------------- #
if __name__ == "__main__":
    key = jax.random.PRNGKey(0)
    kp, kx = jax.random.split(key)
    C, k = 128, 5                      # ed = 128 (one full lane vreg), k = 5
    params = init_params(kp, C, k)

    x = jax.random.normal(kx, (2, C, 16, 16), jnp.float32)
    out = jax.block_until_ready(spatial_forward(x, params, k))
    ref = spatial_reference(x, params, k)

    assert out.shape == x.shape
    assert bool(jnp.all(jnp.isfinite(out)))
    err = float(jnp.max(jnp.abs(out - ref)))
    assert err < 1e-3, err

    print("KERNEL_OK")
</pallas_src>

<mosaic_0001>
module attributes {stable_mosaic.version = 11 : i64} {
  func.func @kernel(%arg0: i32, %arg1: memref<1x16x16x128xf32, #tpu.memory_space<vmem>>, %arg2: memref<25x128xf32, #tpu.memory_space<vmem>>, %arg3: memref<1x128xf32, #tpu.memory_space<vmem>>, %arg4: memref<1x16x16x128xf32, #tpu.memory_space<vmem>>, %arg5: memref<20x20x128xf32, #tpu.memory_space<vmem>>) attributes {dimension_semantics = [#tpu.dimension_semantics<parallel>], iteration_bounds = array<i64: 2>, scalar_prefetch = 0 : i64, scratch_operands = 1 : i64, tpu.core_type = #tpu.core_type<tc>, window_params = [{transform_indices = @transform_0, window_bounds = array<i64: 1, 16, 16, 128>}, {pipeline_mode = #tpu.pipeline_mode<synchronous>, transform_indices = @transform_1, window_bounds = array<i64: 25, 128>}, {pipeline_mode = #tpu.pipeline_mode<synchronous>, transform_indices = @transform_2, window_bounds = array<i64: 1, 128>}, {transform_indices = @transform_3, window_bounds = array<i64: 1, 16, 16, 128>}]} {
    %cst = arith.constant 0.000000e+00 : f32
    %0 = vector.broadcast %cst : f32 to vector<2x20x128xf32>
    %c0 = arith.constant 0 : index
    %c0_0 = arith.constant 0 : index
    %c0_1 = arith.constant 0 : index
    %1 = vector.load %arg5[%c0, %c0_0, %c0_1] : memref<20x20x128xf32, #tpu.memory_space<vmem>>, vector<2x20x128xf32>
    tpu.vector_store %arg5[%c0, %c0_0, %c0_1], %0 {strides = array<i32>} : memref<20x20x128xf32, #tpu.memory_space<vmem>>, vector<2x20x128xf32>,
    %cst_2 = arith.constant 0.000000e+00 : f32
    %2 = vector.broadcast %cst_2 : f32 to vector<2x20x128xf32>
    %c18 = arith.constant 18 : index
    %c0_3 = arith.constant 0 : index
    %c0_4 = arith.constant 0 : index
    %3 = vector.load %arg5[%c18, %c0_3, %c0_4] : memref<20x20x128xf32, #tpu.memory_space<vmem>>, vector<2x20x128xf32>
    tpu.vector_store %arg5[%c18, %c0_3, %c0_4], %2 {strides = array<i32>} : memref<20x20x128xf32, #tpu.memory_space<vmem>>, vector<2x20x128xf32>,
    %cst_5 = arith.constant 0.000000e+00 : f32
    %4 = vector.broadcast %cst_5 : f32 to vector<16x2x128xf32>
    %c2 = arith.constant 2 : index
    %c0_6 = arith.constant 0 : index
    %c0_7 = arith.constant 0 : index
    %5 = vector.load %arg5[%c2, %c0_6, %c0_7] : memref<20x20x128xf32, #tpu.memory_space<vmem>>, vector<16x2x128xf32>
    tpu.vector_store %arg5[%c2, %c0_6, %c0_7], %4 {strides = array<i32>} : memref<20x20x128xf32, #tpu.memory_space<vmem>>, vector<16x2x128xf32>,
    %cst_8 = arith.constant 0.000000e+00 : f32
    %6 = vector.broadcast %cst_8 : f32 to vector<16x2x128xf32>
    %c2_9 = arith.constant 2 : index
    %c18_10 = arith.constant 18 : index
    %c0_11 = arith.constant 0 : index
    %7 = vector.load %arg5[%c2_9, %c18_10, %c0_11] : memref<20x20x128xf32, #tpu.memory_space<vmem>>, vector<16x2x128xf32>
    tpu.vector_store %arg5[%c2_9, %c18_10, %c0_11], %6 {strides = array<i32>} : memref<20x20x128xf32, #tpu.memory_space<vmem>>, vector<16x2x128xf32>,
    %c0_12 = arith.constant 0 : index
    %c0_13 = arith.constant 0 : index
    %8 = vector.load %arg3[%c0_12, %c0_13] : memref<1x128xf32, #tpu.memory_space<vmem>>, vector<1x128xf32>
    %c0_14 = arith.constant 0 : index
    %c0_15 = arith.constant 0 : index
    %c0_16 = arith.constant 0 : index
    %c0_17 = arith.constant 0 : index
    %9 = vector.load %arg1[%c0_14, %c0_15, %c0_16, %c0_17] : memref<1x16x16x128xf32, #tpu.memory_space<vmem>>, vector<1x16x16x128xf32>
    %10 = vector.shape_cast %9 : vector<1x16x16x128xf32> to vector<16x16x128xf32>
    %c2_18 = arith.constant 2 : index
    %c2_19 = arith.constant 2 : index
    %c0_20 = arith.constant 0 : index
    %11 = vector.load %arg5[%c2_18, %c2_19, %c0_20] : memref<20x20x128xf32, #tpu.memory_space<vmem>>, vector<16x16x128xf32>
    tpu.vector_store %arg5[%c2_18, %c2_19, %c0_20], %10 {strides = array<i32>} : memref<20x20x128xf32, #tpu.memory_space<vmem>>, vector<16x16x128xf32>,
    %c0_21 = arith.constant 0 : index
    %c0_22 = arith.constant 0 : index
    %c0_23 = arith.constant 0 : index
    %12 = vector.load %arg5[%c0_21, %c0_22, %c0_23] : memref<20x20x128xf32, #tpu.memory_space<vmem>>, vector<16x16x128xf32>
    %c0_24 = arith.constant 0 : index
    %c0_25 = arith.constant 0 : index
    %13 = vector.load %arg2[%c0_24, %c0_25] : memref<25x128xf32, #tpu.memory_space<vmem>>, vector<1x128xf32>
    %14 = vector.shape_cast %13 : vector<1x128xf32> to vector<1x1x128xf32>
    %15 = vector.broadcast %14 : vector<1x1x128xf32> to vector<16x16x128xf32>
    %16 = arith.mulf %12, %15 : vector<16x16x128xf32>
    %c0_26 = arith.constant 0 : index
    %c1 = arith.constant 1 : index
    %c0_27 = arith.constant 0 : index
    %17 = vector.load %arg5[%c0_26, %c1, %c0_27] : memref<20x20x128xf32, #tpu.memory_space<vmem>>, vector<16x16x128xf32>
    %c1_28 = arith.constant 1 : index
    %c0_29 = arith.constant 0 : index
    %18 = vector.load %arg2[%c1_28, %c0_29] : memref<25x128xf32, #tpu.memory_space<vmem>>, vector<1x128xf32>
    %19 = vector.shape_cast %18 : vector<1x128xf32> to vector<1x1x128xf32>
    %20 = vector.broadcast %19 : vector<1x1x128xf32> to vector<16x16x128xf32>
    %21 = arith.mulf %17, %20 : vector<16x16x128xf32>
    %22 = arith.addf %16, %21 : vector<16x16x128xf32>
    %c0_30 = arith.constant 0 : index
    %c2_31 = arith.constant 2 : index
    %c0_32 = arith.constant 0 : index
    %23 = vector.load %arg5[%c0_30, %c2_31, %c0_32] : memref<20x20x128xf32, #tpu.memory_space<vmem>>, vector<16x16x128xf32>
    %c2_33 = arith.constant 2 : index
    %c0_34 = arith.constant 0 : index
    %24 = vector.load %arg2[%c2_33, %c0_34] : memref<25x128xf32, #tpu.memory_space<vmem>>, vector<1x128xf32>
    %25 = vector.shape_cast %24 : vector<1x128xf32> to vector<1x1x128xf32>
    %26 = vector.broadcast %25 : vector<1x1x128xf32> to vector<16x16x128xf32>
    %27 = arith.mulf %23, %26 : vector<16x16x128xf32>
    %28 = arith.addf %22, %27 : vector<16x16x128xf32>
    %c0_35 = arith.constant 0 : index
    %c3 = arith.constant 3 : index
    %c0_36 = arith.constant 0 : index
    %29 = vector.load %arg5[%c0_35, %c3, %c0_36] : memref<20x20x128xf32, #tpu.memory_space<vmem>>, vector<16x16x128xf32>
    %c3_37 = arith.constant 3 : index
    %c0_38 = arith.constant 0 : index
    %30 = vector.load %arg2[%c3_37, %c0_38] : memref<25x128xf32, #tpu.memory_space<vmem>>, vector<1x128xf32>
    %31 = vector.shape_cast %30 : vector<1x128xf32> to vector<1x1x128xf32>
    %32 = vector.broadcast %31 : vector<1x1x128xf32> to vector<16x16x128xf32>
    %33 = arith.mulf %29, %32 : vector<16x16x128xf32>
    %34 = arith.addf %28, %33 : vector<16x16x128xf32>
    %c0_39 = arith.constant 0 : index
    %c4 = arith.constant 4 : index
    %c0_40 = arith.constant 0 : index
    %35 = vector.load %arg5[%c0_39, %c4, %c0_40] : memref<20x20x128xf32, #tpu.memory_space<vmem>>, vector<16x16x128xf32>
    %c4_41 = arith.constant 4 : index
    %c0_42 = arith.constant 0 : index
    %36 = vector.load %arg2[%c4_41, %c0_42] : memref<25x128xf32, #tpu.memory_space<vmem>>, vector<1x128xf32>
    %37 = vector.shape_cast %36 : vector<1x128xf32> to vector<1x1x128xf32>
    %38 = vector.broadcast %37 : vector<1x1x128xf32> to vector<16x16x128xf32>
    %39 = arith.mulf %35, %38 : vector<16x16x128xf32>
    %40 = arith.addf %34, %39 : vector<16x16x128xf32>
    %c1_43 = arith.constant 1 : index
    %c0_44 = arith.constant 0 : index
    %c0_45 = arith.constant 0 : index
    %41 = vector.load %arg5[%c1_43, %c0_44, %c0_45] : memref<20x20x128xf32, #tpu.memory_space<vmem>>, vector<16x16x128xf32>
    %c5 = arith.constant 5 : index
    %c0_46 = arith.constant 0 : index
    %42 = vector.load %arg2[%c5, %c0_46] : memref<25x128xf32, #tpu.memory_space<vmem>>, vector<1x128xf32>
    %43 = vector.shape_cast %42 : vector<1x128xf32> to vector<1x1x128xf32>
    %44 = vector.broadcast %43 : vector<1x1x128xf32> to vector<16x16x128xf32>
    %45 = arith.mulf %41, %44 : vector<16x16x128xf32>
    %46 = arith.addf %40, %45 : vector<16x16x128xf32>
    %c1_47 = arith.constant 1 : index
    %c1_48 = arith.constant 1 : index
    %c0_49 = arith.constant 0 : index
    %47 = vector.load %arg5[%c1_47, %c1_48, %c0_49] : memref<20x20x128xf32, #tpu.memory_space<vmem>>, vector<16x16x128xf32>
    %c6 = arith.constant 6 : index
    %c0_50 = arith.constant 0 : index
    %48 = vector.load %arg2[%c6, %c0_50] : memref<25x128xf32, #tpu.memory_space<vmem>>, vector<1x128xf32>
    %49 = vector.shape_cast %48 : vector<1x128xf32> to vector<1x1x128xf32>
    %50 = vector.broadcast %49 : vector<1x1x128xf32> to vector<16x16x128xf32>
    %51 = arith.mulf %47, %50 : vector<16x16x128xf32>
    %52 = arith.addf %46, %51 : vector<16x16x128xf32>
    %c1_51 = arith.constant 1 : index
    %c2_52 = arith.constant 2 : index
    %c0_53 = arith.constant 0 : index
    %53 = vector.load %arg5[%c1_51, %c2_52, %c0_53] : memref<20x20x128xf32, #tpu.memory_space<vmem>>, vector<16x16x128xf32>
    %c7 = arith.constant 7 : index
    %c0_54 = arith.constant 0 : index
    %54 = vector.load %arg2[%c7, %c0_54] : memref<25x128xf32, #tpu.memory_space<vmem>>, vector<1x128xf32>
    %55 = vector.shape_cast %54 : vector<1x128xf32> to vector<1x1x128xf32>
    %56 = vector.broadcast %55 : vector<1x1x128xf32> to vector<16x16x128xf32>
    %57 = arith.mulf %53, %56 : vector<16x16x128xf32>
    %58 = arith.addf %52, %57 : vector<16x16x128xf32>
    %c1_55 = arith.constant 1 : index
    %c3_56 = arith.constant 3 : index
    %c0_57 = arith.constant 0 : index
    %59 = vector.load %arg5[%c1_55, %c3_56, %c0_57] : memref<20x20x128xf32, #tpu.memory_space<vmem>>, vector<16x16x128xf32>
    %c8 = arith.constant 8 : index
    %c0_58 = arith.constant 0 : index
    %60 = vector.load %arg2[%c8, %c0_58] : memref<25x128xf32, #tpu.memory_space<vmem>>, vector<1x128xf32>
    %61 = vector.shape_cast %60 : vector<1x128xf32> to vector<1x1x128xf32>
    %62 = vector.broadcast %61 : vector<1x1x128xf32> to vector<16x16x128xf32>
    %63 = arith.mulf %59, %62 : vector<16x16x128xf32>
    %64 = arith.addf %58, %63 : vector<16x16x128xf32>
    %c1_59 = arith.constant 1 : index
    %c4_60 = arith.constant 4 : index
    %c0_61 = arith.constant 0 : index
    %65 = vector.load %arg5[%c1_59, %c4_60, %c0_61] : memref<20x20x128xf32, #tpu.memory_space<vmem>>, vector<16x16x128xf32>
    %c9 = arith.constant 9 : index
    %c0_62 = arith.constant 0 : index
    %66 = vector.load %arg2[%c9, %c0_62] : memref<25x128xf32, #tpu.memory_space<vmem>>, vector<1x128xf32>
    %67 = vector.shape_cast %66 : vector<1x128xf32> to vector<1x1x128xf32>
    %68 = vector.broadcast %67 : vector<1x1x128xf32> to vector<16x16x128xf32>
    %69 = arith.mulf %65, %68 : vector<16x16x128xf32>
    %70 = arith.addf %64, %69 : vector<16x16x128xf32>
    %c2_63 = arith.constant 2 : index
    %c0_64 = arith.constant 0 : index
    %c0_65 = arith.constant 0 : index
    %71 = vector.load %arg5[%c2_63, %c0_64, %c0_65] : memref<20x20x128xf32, #tpu.memory_space<vmem>>, vector<16x16x128xf32>
    %c10 = arith.constant 10 : index
    %c0_66 = arith.constant 0 : index
    %72 = vector.load %arg2[%c10, %c0_66] : memref<25x128xf32, #tpu.memory_space<vmem>>, vector<1x128xf32>
    %73 = vector.shape_cast %72 : vector<1x128xf32> to vector<1x1x128xf32>
    %74 = vector.broadcast %73 : vector<1x1x128xf32> to vector<16x16x128xf32>
    %75 = arith.mulf %71, %74 : vector<16x16x128xf32>
    %76 = arith.addf %70, %75 : vector<16x16x128xf32>
    %c2_67 = arith.constant 2 : index
    %c1_68 = arith.constant 1 : index
    %c0_69 = arith.constant 0 : index
    %77 = vector.load %arg5[%c2_67, %c1_68, %c0_69] : memref<20x20x128xf32, #tpu.memory_space<vmem>>, vector<16x16x128xf32>
    %c11 = arith.constant 11 : index
    %c0_70 = arith.constant 0 : index
    %78 = vector.load %arg2[%c11, %c0_70] : memref<25x128xf32, #tpu.memory_space<vmem>>, vector<1x128xf32>
    %79 = vector.shape_cast %78 : vector<1x128xf32> to vector<1x1x128xf32>
    %80 = vector.broadcast %79 : vector<1x1x128xf32> to vector<16x16x128xf32>
    %81 = arith.mulf %77, %80 : vector<16x16x128xf32>
    %82 = arith.addf %76, %81 : vector<16x16x128xf32>
    %c2_71 = arith.constant 2 : index
    %c2_72 = arith.constant 2 : index
    %c0_73 = arith.constant 0 : index
    %83 = vector.load %arg5[%c2_71, %c2_72, %c0_73] : memref<20x20x128xf32, #tpu.memory_space<vmem>>, vector<16x16x128xf32>
    %c12 = arith.constant 12 : index
    %c0_74 = arith.constant 0 : index
    %84 = vector.load %arg2[%c12, %c0_74] : memref<25x128xf32, #tpu.memory_space<vmem>>, vector<1x128xf32>
    %85 = vector.shape_cast %84 : vector<1x128xf32> to vector<1x1x128xf32>
    %86 = vector.broadcast %85 : vector<1x1x128xf32> to vector<16x16x128xf32>
    %87 = arith.mulf %83, %86 : vector<16x16x128xf32>
    %88 = arith.addf %82, %87 : vector<16x16x128xf32>
    %c2_75 = arith.constant 2 : index
    %c3_76 = arith.constant 3 : index
    %c0_77 = arith.constant 0 : index
    %89 = vector.load %arg5[%c2_75, %c3_76, %c0_77] : memref<20x20x128xf32, #tpu.memory_space<vmem>>, vector<16x16x128xf32>
    %c13 = arith.constant 13 : index
    %c0_78 = arith.constant 0 : index
    %90 = vector.load %arg2[%c13, %c0_78] : memref<25x128xf32, #tpu.memory_space<vmem>>, vector<1x128xf32>
    %91 = vector.shape_cast %90 : vector<1x128xf32> to vector<1x1x128xf32>
    %92 = vector.broadcast %91 : vector<1x1x128xf32> to vector<16x16x128xf32>
    %93 = arith.mulf %89, %92 : vector<16x16x128xf32>
    %94 = arith.addf %88, %93 : vector<16x16x128xf32>
    %c2_79 = arith.constant 2 : index
    %c4_80 = arith.constant 4 : index
    %c0_81 = arith.constant 0 : index
    %95 = vector.load %arg5[%c2_79, %c4_80, %c0_81] : memref<20x20x128xf32, #tpu.memory_space<vmem>>, vector<16x16x128xf32>
    %c14 = arith.constant 14 : index
    %c0_82 = arith.constant 0 : index
    %96 = vector.load %arg2[%c14, %c0_82] : memref<25x128xf32, #tpu.memory_space<vmem>>, vector<1x128xf32>
    %97 = vector.shape_cast %96 : vector<1x128xf32> to vector<1x1x128xf32>
    %98 = vector.broadcast %97 : vector<1x1x128xf32> to vector<16x16x128xf32>
    %99 = arith.mulf %95, %98 : vector<16x16x128xf32>
    %100 = arith.addf %94, %99 : vector<16x16x128xf32>
    %c3_83 = arith.constant 3 : index
    %c0_84 = arith.constant 0 : index
    %c0_85 = arith.constant 0 : index
    %101 = vector.load %arg5[%c3_83, %c0_84, %c0_85] : memref<20x20x128xf32, #tpu.memory_space<vmem>>, vector<16x16x128xf32>
    %c15 = arith.constant 15 : index
    %c0_86 = arith.constant 0 : index
    %102 = vector.load %arg2[%c15, %c0_86] : memref<25x128xf32, #tpu.memory_space<vmem>>, vector<1x128xf32>
    %103 = vector.shape_cast %102 : vector<1x128xf32> to vector<1x1x128xf32>
    %104 = vector.broadcast %103 : vector<1x1x128xf32> to vector<16x16x128xf32>
    %105 = arith.mulf %101, %104 : vector<16x16x128xf32>
    %106 = arith.addf %100, %105 : vector<16x16x128xf32>
    %c3_87 = arith.constant 3 : index
    %c1_88 = arith.constant 1 : index
    %c0_89 = arith.constant 0 : index
    %107 = vector.load %arg5[%c3_87, %c1_88, %c0_89] : memref<20x20x128xf32, #tpu.memory_space<vmem>>, vector<16x16x128xf32>
    %c16 = arith.constant 16 : index
    %c0_90 = arith.constant 0 : index
    %108 = vector.load %arg2[%c16, %c0_90] : memref<25x128xf32, #tpu.memory_space<vmem>>, vector<1x128xf32>
    %109 = vector.shape_cast %108 : vector<1x128xf32> to vector<1x1x128xf32>
    %110 = vector.broadcast %109 : vector<1x1x128xf32> to vector<16x16x128xf32>
    %111 = arith.mulf %107, %110 : vector<16x16x128xf32>
    %112 = arith.addf %106, %111 : vector<16x16x128xf32>
    %c3_91 = arith.constant 3 : index
    %c2_92 = arith.constant 2 : index
    %c0_93 = arith.constant 0 : index
    %113 = vector.load %arg5[%c3_91, %c2_92, %c0_93] : memref<20x20x128xf32, #tpu.memory_space<vmem>>, vector<16x16x128xf32>
    %c17 = arith.constant 17 : index
    %c0_94 = arith.constant 0 : index
    %114 = vector.load %arg2[%c17, %c0_94] : memref<25x128xf32, #tpu.memory_space<vmem>>, vector<1x128xf32>
    %115 = vector.shape_cast %114 : vector<1x128xf32> to vector<1x1x128xf32>
    %116 = vector.broadcast %115 : vector<1x1x128xf32> to vector<16x16x128xf32>
    %117 = arith.mulf %113, %116 : vector<16x16x128xf32>
    %118 = arith.addf %112, %117 : vector<16x16x128xf32>
    %c3_95 = arith.constant 3 : index
    %c3_96 = arith.constant 3 : index
    %c0_97 = arith.constant 0 : index
    %119 = vector.load %arg5[%c3_95, %c3_96, %c0_97] : memref<20x20x128xf32, #tpu.memory_space<vmem>>, vector<16x16x128xf32>
    %c18_98 = arith.constant 18 : index
    %c0_99 = arith.constant 0 : index
    %120 = vector.load %arg2[%c18_98, %c0_99] : memref<25x128xf32, #tpu.memory_space<vmem>>, vector<1x128xf32>
    %121 = vector.shape_cast %120 : vector<1x128xf32> to vector<1x1x128xf32>
    %122 = vector.broadcast %121 : vector<1x1x128xf32> to vector<16x16x128xf32>
    %123 = arith.mulf %119, %122 : vector<16x16x128xf32>
    %124 = arith.addf %118, %123 : vector<16x16x128xf32>
    %c3_100 = arith.constant 3 : index
    %c4_101 = arith.constant 4 : index
    %c0_102 = arith.constant 0 : index
    %125 = vector.load %arg5[%c3_100, %c4_101, %c0_102] : memref<20x20x128xf32, #tpu.memory_space<vmem>>, vector<16x16x128xf32>
    %c19 = arith.constant 19 : index
    %c0_103 = arith.constant 0 : index
    %126 = vector.load %arg2[%c19, %c0_103] : memref<25x128xf32, #tpu.memory_space<vmem>>, vector<1x128xf32>
    %127 = vector.shape_cast %126 : vector<1x128xf32> to vector<1x1x128xf32>
    %128 = vector.broadcast %127 : vector<1x1x128xf32> to vector<16x16x128xf32>
    %129 = arith.mulf %125, %128 : vector<16x16x128xf32>
    %130 = arith.addf %124, %129 : vector<16x16x128xf32>
    %c4_104 = arith.constant 4 : index
    %c0_105 = arith.constant 0 : index
    %c0_106 = arith.constant 0 : index
    %131 = vector.load %arg5[%c4_104, %c0_105, %c0_106] : memref<20x20x128xf32, #tpu.memory_space<vmem>>, vector<16x16x128xf32>
    %c20 = arith.constant 20 : index
    %c0_107 = arith.constant 0 : index
    %132 = vector.load %arg2[%c20, %c0_107] : memref<25x128xf32, #tpu.memory_space<vmem>>, vector<1x128xf32>
    %133 = vector.shape_cast %132 : vector<1x128xf32> to vector<1x1x128xf32>
    %134 = vector.broadcast %133 : vector<1x1x128xf32> to vector<16x16x128xf32>
    %135 = arith.mulf %131, %134 : vector<16x16x128xf32>
    %136 = arith.addf %130, %135 : vector<16x16x128xf32>
    %c4_108 = arith.constant 4 : index
    %c1_109 = arith.constant 1 : index
    %c0_110 = arith.constant 0 : index
    %137 = vector.load %arg5[%c4_108, %c1_109, %c0_110] : memref<20x20x128xf32, #tpu.memory_space<vmem>>, vector<16x16x128xf32>
    %c21 = arith.constant 21 : index
    %c0_111 = arith.constant 0 : index
    %138 = vector.load %arg2[%c21, %c0_111] : memref<25x128xf32, #tpu.memory_space<vmem>>, vector<1x128xf32>
    %139 = vector.shape_cast %138 : vector<1x128xf32> to vector<1x1x128xf32>
    %140 = vector.broadcast %139 : vector<1x1x128xf32> to vector<16x16x128xf32>
    %141 = arith.mulf %137, %140 : vector<16x16x128xf32>
    %142 = arith.addf %136, %141 : vector<16x16x128xf32>
    %c4_112 = arith.constant 4 : index
    %c2_113 = arith.constant 2 : index
    %c0_114 = arith.constant 0 : index
    %143 = vector.load %arg5[%c4_112, %c2_113, %c0_114] : memref<20x20x128xf32, #tpu.memory_space<vmem>>, vector<16x16x128xf32>
    %c22 = arith.constant 22 : index
    %c0_115 = arith.constant 0 : index
    %144 = vector.load %arg2[%c22, %c0_115] : memref<25x128xf32, #tpu.memory_space<vmem>>, vector<1x128xf32>
    %145 = vector.shape_cast %144 : vector<1x128xf32> to vector<1x1x128xf32>
    %146 = vector.broadcast %145 : vector<1x1x128xf32> to vector<16x16x128xf32>
    %147 = arith.mulf %143, %146 : vector<16x16x128xf32>
    %148 = arith.addf %142, %147 : vector<16x16x128xf32>
    %c4_116 = arith.constant 4 : index
    %c3_117 = arith.constant 3 : index
    %c0_118 = arith.constant 0 : index
    %149 = vector.load %arg5[%c4_116, %c3_117, %c0_118] : memref<20x20x128xf32, #tpu.memory_space<vmem>>, vector<16x16x128xf32>
    %c23 = arith.constant 23 : index
    %c0_119 = arith.constant 0 : index
    %150 = vector.load %arg2[%c23, %c0_119] : memref<25x128xf32, #tpu.memory_space<vmem>>, vector<1x128xf32>
    %151 = vector.shape_cast %150 : vector<1x128xf32> to vector<1x1x128xf32>
    %152 = vector.broadcast %151 : vector<1x1x128xf32> to vector<16x16x128xf32>
    %153 = arith.mulf %149, %152 : vector<16x16x128xf32>
    %154 = arith.addf %148, %153 : vector<16x16x128xf32>
    %c4_120 = arith.constant 4 : index
    %c4_121 = arith.constant 4 : index
    %c0_122 = arith.constant 0 : index
    %155 = vector.load %arg5[%c4_120, %c4_121, %c0_122] : memref<20x20x128xf32, #tpu.memory_space<vmem>>, vector<16x16x128xf32>
    %c24 = arith.constant 24 : index
    %c0_123 = arith.constant 0 : index
    %156 = vector.load %arg2[%c24, %c0_123] : memref<25x128xf32, #tpu.memory_space<vmem>>, vector<1x128xf32>
    %157 = vector.shape_cast %156 : vector<1x128xf32> to vector<1x1x128xf32>
    %158 = vector.broadcast %157 : vector<1x1x128xf32> to vector<16x16x128xf32>
    %159 = arith.mulf %155, %158 : vector<16x16x128xf32>
    %160 = arith.addf %154, %159 : vector<16x16x128xf32>
    %161 = vector.shape_cast %8 : vector<1x128xf32> to vector<1x1x128xf32>
    %162 = vector.broadcast %161 : vector<1x1x128xf32> to vector<16x16x128xf32>
    %163 = arith.addf %160, %162 : vector<16x16x128xf32>
    %c0_124 = arith.constant 0 : index
    %c0_125 = arith.constant 0 : index
    %c0_126 = arith.constant 0 : index
    %c0_127 = arith.constant 0 : index
    %164 = vector.load %arg4[%c0_124, %c0_125, %c0_126, %c0_127] : memref<1x16x16x128xf32, #tpu.memory_space<vmem>>, vector<1x16x16x128xf32>
    %165 = vector.shape_cast %164 : vector<1x16x16x128xf32> to vector<16x16x128xf32>
    %166 = vector.shape_cast %163 : vector<16x16x128xf32> to vector<1x16x16x128xf32>
    tpu.vector_store %arg4[%c0_124, %c0_125, %c0_126, %c0_127], %166 {strides = array<i32>} : memref<1x16x16x128xf32, #tpu.memory_space<vmem>>, vector<1x16x16x128xf32>,
    return
  }
  func.func @transform_0(%arg0: i32) -> (i32, i32, i32, i32) {
    %c0_i32 = arith.constant 0 : i32
    %c0_i32_0 = arith.constant 0 : i32
    %c0_i32_1 = arith.constant 0 : i32
    %c0_i32_2 = arith.constant 0 : i32
    return %arg0, %c0_i32, %c0_i32_0, %c0_i32_1 : i32, i32, i32, i32
  }
  func.func @transform_1(%arg0: i32) -> (i32, i32) {
    %c0_i32 = arith.constant 0 : i32
    %c0_i32_0 = arith.constant 0 : i32
    %c0_i32_1 = arith.constant 0 : i32
    return %c0_i32, %c0_i32_0 : i32, i32
  }
  func.func @transform_2(%arg0: i32) -> (i32, i32) {
    %c0_i32 = arith.constant 0 : i32
    %c0_i32_0 = arith.constant 0 : i32
    %c0_i32_1 = arith.constant 0 : i32
    return %c0_i32, %c0_i32_0 : i32, i32
  }
  func.func @transform_3(%arg0: i32) -> (i32, i32, i32, i32) {
    %c0_i32 = arith.constant 0 : i32
    %c0_i32_0 = arith.constant 0 : i32
    %c0_i32_1 = arith.constant 0 : i32
    %c0_i32_2 = arith.constant 0 : i32
    return %arg0, %c0_i32, %c0_i32_0, %c0_i32_1 : i32, i32, i32, i32
  }
}

</mosaic_0001>

<bundles_post_ra>
// kernel: tpu_custom_call.1
= control target key start
LH: loop header
LB: loop body
LE: loop exit
PB: predicated region body
PF: predicated region fallthrough
CT: control target
= control target key end

     0   :  { %8 = vsyncpa [#allocation4], 0  ;;  %s5632_s0 = inlined_call_operand.hbm [shape: f32[2,16,16,128], index: 0, kind: input, shape index: {}]   ;;  %s5633_s1 = inlined_call_operand.hbm [shape: f32[25,128], index: 1, kind: input, shape index: {}]   ;;  %s5634_s2 = inlined_call_operand.vmem [shape: f32[1,128], index: 2, kind: input, shape index: {}]   ;;  %s5635_s3 = inlined_call_operand.hbm [shape: f32[2,16,16,128], index: 3, kind: output, shape index: {}]  }
   0x1   :  { %10 = vsyncpa [#allocation4 + $0x1], 0 }
   0x2   :  { %11 = vsyncpa [#allocation7], 0 }
   0x3   :  { %12 = vsyncpa [#allocation5], 0 }
   0x4   :  { %14 = vsyncpa [#allocation5 + $0x1], 0  ;;  %s3320_s12 = smov 0   ;;  %s3322_s13 = smov 0  }
   0x5   :  { %s3324_s14 = smov 0   ;;  %s3326_s15 = smov 0  }
   0x6 LB: > { %s3341_s16 = sadd.s32 4294967295, %s3290_s15   ;;  %s2978_s17 = sadd.s32 4294967294, %s3290_s15   ;;  %s3290_s15 = sphi %s3326_s15, %s5857_s15   ;;  %s3286_s14 = sphi %s3324_s14, %s5856_s14   ;;  %s3282_s13 = sphi %s3322_s13, %s5855_s13   ;;  %s3278_s12 = sphi %s3320_s12, %s5854_s12  }
   0x7   : > { %p40_p0 = scmp.ne.s32.totalorder %s3282_s13, %s3278_s12  ;;  %p5636_p1 = scmp.eq.s32.totalorder %s3341_s16, 0 }
   0x8   : > { %p112_p3 = scmp.eq.s32.totalorder %s2978_s17, 1  ;;  %p2979_p5 = scmp.ge.s32.totalorder %s3290_s15, 1 }
   0x9   : > { %p3350_p4 = por %p5636_p1, %p40_p0  ;;  %p119_p7 = scmp.lt.s32.totalorder %s3290_s15, 3 }
   0xa   : > { %p3355_p6 = por %p112_p3, %p40_p0  ;;  %s3292_s21 = smov [#allocation6]  }
   0xb   : > { %s5653_s18 = scalar_select %p3350_p4, 1, 0 }
   0xc   : > { %s5654_s19 = scalar_select %p3355_p6, 1, 0 }
   0xd   : > { %p3360_p8 = pnand %p2979_p5, %p119_p7  ;;  %s131_s22 = sshll.u32 %s3292_s21, 4  ;;  %s3364_s22 = int_to_ptr.vmem [resolvable:$true] %s131_s22 }
   0xe   : > { %s3376_s24 = sadd.s32 1, %s3290_s15   ;;  %s27_s25 = sadd.s32 1, %s3286_s14 }
   0xf   : > { %s5655_s20 = scalar_select %p3360_p8, 1, 0 }
  0x10   : > { %p3030_p9 = pneg %p3360_p8  ;;  %s24_s26 = ssub.s32 %s3290_s15, %s3376_s24 }
  0x11   : > { %s3162_s29 = scalar_lea.hbm %s5633_s1, 512 }
  0x12   : > { %p3371_p11 = pnand %p3030_p9, %p5636_p1  ;;  %p3163_p12 = scmp.ne.s32.totalorder %s5633_s1, %s3162_s29 }
  0x13   : > { %p3169_p5 = scmp.lt.u32.totalorder %s3162_s29, %s5633_s1 }
  0x14   : > { %p3164_p13 = pneg %p3371_p11 }
  0x16   : > { %p3165_p0 = pnand %p3164_p13, %p3163_p12 }
  0x18   : > { %p3166_p3 = pneg %p3165_p0 }
  0x1a   : > { %p3171_p7 = pnand %p3169_p5, %p3166_p3 }
  0x1c   : > { %3174 = shalt.err (!%p3171_p7)
}
  0x1d   : > { %s3175_s7 = scalar_lea.vmem %s3364_s22, 512  ;;  %p3183_p2 = scmp.lt.s32.totalorder %s3364_s22, %s3364_s22 }
  0x1e   : > { %p3176_p9 = scmp.ne.s32.totalorder %s3364_s22, %s3175_s7  ;;  %p3184_p6 = scmp.lt.s32.totalorder %s3175_s7, %s3175_s7 }
  0x20   : > { %p3178_p10 = pnand %p3176_p9, %p3164_p13  ;;  %p3185_p4 = por %p3184_p6, %p3183_p2 }
  0x22   : > { %p3179_p1 = pneg %p3178_p10 }
  0x24   : > { %p3186_p8 = pnand %p3185_p4, %p3179_p1 }
  0x26   : > { %3189 = shalt.err (!%p3186_p8)
}
  0x27   : > { %s3293_s8 = smov 128   ;;  %s3294_s9 = smov 8  }
  0x28   : > { %3033 = dma.hbm_to_vmem [thread:$0]  (!%p3371_p11), %s5633_s1, 512, %s3364_s22, [#allocation7], %s3293_s8, %s3293_s8, %s3294_s9  }
  0x29   : > { %p25_p1 = scmp.eq.s32.totalorder %s24_s26, 0  ;;  %p34_p2 = scmp.ne.s32.totalorder %s3286_s14, %s3282_s13 }
  0x2a   : > { %p35_p4 = scmp.eq.s32.totalorder %s3290_s15, 0  ;;  %p3043_p6 = scmp.lt.s32.totalorder %s3290_s15, 2 }
  0x2b   : > { %s3410_s17 = scalar_select %p25_p1, %s3286_s14, %s27_s25  }
  0x2c   : > { %p36_p8 = por %p35_p4, %p34_p2  ;;  %p5657_p10 = scmp.eq.s32.totalorder %s3341_s16, 1 }
  0x2d   : > { %s148_s23 = sand.u32 1, %s3286_s14   ;;  %s3020_s27 = sshll.u32 %s3290_s15, 12 }
  0x2e   : > { %p3414_p12 = por %p5657_p10, %p34_p2  ;;  %s2982_s28 = sshll.u32 %s148_s23, 8 }
  0x2f   : > { %s3423_s4 = scalar_lea.hbm %s5632_s0, %s3020_s27  ;;  %s152_s22 = scalar_lea.vmem [#allocation3], %s2982_s28 }
  0x30   : > { %s159_s25 = sshll.u32 %s152_s22, 4  ;;  %p3425_p11 = pnand %p3043_p6, %p36_p8  ;;  %s3429_s25 = int_to_ptr.vmem [resolvable:$true] %s159_s25 }
  0x31   : > { %s3431_s5 = scalar_lea.sflag [#allocation4], %s148_s23  ;;  %s3190_s6 = scalar_lea.hbm %s3423_s4, 4096 }
  0x32   : > { %p3191_p13 = scmp.ne.s32.totalorder %s3423_s4, %s3190_s6  ;;  %p3192_p0 = pneg %p3425_p11 }
  0x33   : > { %s3195_s11 = scalar_lea.hbm %s5632_s0, 8192  ;;  %p3196_p7 = scmp.lt.u32.totalorder %s3423_s4, %s5632_s0 }
  0x34   : > { %p3193_p3 = pnand %p3192_p0, %p3191_p13  ;;  %p3197_p9 = scmp.lt.u32.totalorder %s3195_s11, %s3190_s6 }
  0x35   : > { %p3199_p2 = scmp.lt.u32.totalorder %s3190_s6, %s3423_s4 }
  0x36   : > { %p3194_p5 = pneg %p3193_p3  ;;  %p3198_p1 = por %p3197_p9, %p3196_p7 }
  0x38   : > { %p3200_p4 = por %p3199_p2, %p3198_p1 }
  0x3a   : > { %p3201_p6 = pnand %p3200_p4, %p3194_p5 }
  0x3c   : > { %3204 = shalt.err (!%p3201_p6)
}
  0x3d   : > { %s3205_s23 = scalar_lea.vmem %s3429_s25, 4096  ;;  %s3295_s29 = smov [#allocation3]  }
  0x3e   : > { %p3206_p8 = scmp.ne.s32.totalorder %s3429_s25, %s3205_s23  ;;  %s3210_s30 = sshll.u32 %s3295_s29, 4  ;;  %s3211_s30 = int_to_ptr.vmem [resolvable:$false] %s3210_s30 }
  0x3f   : > { %s3212_s22 = scalar_lea.vmem %s3211_s30, 8192  ;;  %p3213_p3 = scmp.lt.s32.totalorder %s3429_s25, %s3211_s30 }
  0x40   : > { %p3208_p10 = pnand %p3206_p8, %p3192_p0  ;;  %p3214_p7 = scmp.lt.s32.totalorder %s3212_s22, %s3205_s23 }
  0x42   : > { %p3209_p13 = pneg %p3208_p10  ;;  %p3215_p9 = por %p3214_p7, %p3213_p3 }
  0x44   : > { %p3216_p1 = pnand %p3215_p9, %p3209_p13 }
  0x46   : > { %3219 = shalt.err (!%p3216_p1)
}
  0x47   : > { %3037 = dma.hbm_to_vmem [thread:$0]  (!%p3425_p11), %s3423_s4, 4096, %s3429_s25, %s3431_s5, %s3293_s8, %s3293_s8, %s3294_s9  }
  0x48   : > { %p5660_p0 = scmp.ne.s32.totalorder %s5655_s20, 0 }
  0x4a   : > { %171 = sbr.rel (%p5660_p0) target bundleno = 544 (0x220), region = 32 }
  0x51   : > { %s3465_s6 = sand.u32 1, %s3282_s13   ;;  %p5661_p5 = scmp.ne.s32.totalorder %s5653_s18, 0 }
  0x52   : > { %s2986_s7 = sshll.u32 %s3465_s6, 8  ;;  %s174_s10 = scalar_lea.sflag [#allocation4], %s3465_s6 }
  0x53   : > { %s3471_s26 = scalar_lea.vmem [#allocation3], %s2986_s7 }
  0x54   : > { %3265 = dma.done.wait (%p5661_p5), %s174_s10, 4096  }
  0x55   : > { %3267 = vsyncadd (%p5661_p5), %s174_s10, 4294963200  ;;  %p5662_p11 = scmp.eq.s32.totalorder %s3341_s16, 0 }
  0x57   : > { %3269 = dma.done.wait (%p5662_p11), [#allocation7], 512   ;;  %p5663_p2 = pmov %p5662_p11 }
  0x58   : > { %v3296_v0 = vmov 0.0   ;;  %v3481_v1 = vld [vmem:[#allocation6] ss:$0 sm:$0xff]  ;;  %v3483_v2 = vld [vmem:[#allocation6 + $0x1] ss:$0 sm:$0xff]  ;;  %v3535_v49 = vld [vmem:[%s3471_s26 + $0x8] sm:$0xff] }
  0x59   : > { %3271 = vsyncadd (%p5663_p2), [#allocation7], 4294966784  ;;  %204 = vst [vmem:[#allocation2] sm:$0xff] %v3296_v0  ;;  %v3485_v3 = vld [vmem:[#allocation6 + $0x2] ss:$0 sm:$0xff]  ;;  %v352_v4 = vmul.f32 0.0, %v3481_v1 }
  0x5a   : > { %205 = vst [vmem:[#allocation2 + $0x8] sm:$0xff] %v3296_v0  ;;  %206 = vst [vmem:[#allocation2 + $0x10] sm:$0xf] %v3296_v0  ;;  %v3512_v29 = vld [vmem:[#allocation6 + $0x3] ss:$0 sm:$0xff]  ;;  %v3542_v53 = vld [vmem:[%s3471_s26 + $0x10] sm:$0xff] }
  0x5b   : > { %207 = vst [vmem:[#allocation2 + $0x18] sm:$0xff] %v3296_v0  ;;  %208 = vst [vmem:[#allocation2 + $0x20] sm:$0xff] %v3296_v0  ;;  %v3515_v35 = vld [vmem:[#allocation6 + $0x4] ss:$0 sm:$0xff]  ;;  %v3520_v40 = vld [vmem:[#allocation6 + $0x5] ss:$0 sm:$0xff] }
  0x5c   : > { %209 = vst [vmem:[#allocation2 + $0x28] sm:$0xf] %v3296_v0  ;;  %211 = vst [vmem:[#allocation2 + $0x1b0] sm:$0xff] %v3296_v0  ;;  %v3529_v46 = vld [vmem:[%s3471_s26] sm:$0xff]  ;;  %v826_v51 = vmul.f32 0.0, %v3520_v40  ;;  %v3545_v54 = vld [vmem:[%s3471_s26 + $0x18] sm:$0xff] }
  0x5d   : > { %212 = vst [vmem:[#allocation2 + $0x1b8] sm:$0xff] %v3296_v0  ;;  %213 = vst [vmem:[#allocation2 + $0x1c0] sm:$0xf] %v3296_v0  ;;  %v3538_v52 = vld [vmem:[#allocation6 + $0x6] ss:$0 sm:$0xff]  ;;  %v3560_v61 = vld [vmem:[%s3471_s26 + $0x28] sm:$0xff] }
  0x5e   : > { %214 = vst [vmem:[#allocation2 + $0x1c8] sm:$0xff] %v3296_v0  ;;  %215 = vst [vmem:[#allocation2 + $0x1d0] sm:$0xff] %v3296_v0  ;;  %v3548_v55 = vld [vmem:[%s3471_s26 + $0x20] sm:$0xff]  ;;  %v3554_v60 = vld [vmem:[#allocation6 + $0x8] ss:$0 sm:$0xff]  ;;  %s4784_s8 = scalar_lea.vmem [#allocation8], %s2986_s7 }
  0x5f   : > { %216 = vst [vmem:[#allocation2 + $0x1d8] sm:$0xf] %v3296_v0  ;;  %218 = vst [vmem:[#allocation2 + $0x30] sm:$0x3] %v3296_v0  ;;  %v3552_v59 = vld [vmem:[#allocation6 + $0x7] ss:$0 sm:$0xff] }
  0x60   : > { %219 = vst [vmem:[#allocation2 + $0x48] sm:$0x3] %v3296_v0  ;;  %220 = vst [vmem:[#allocation2 + $0x60] sm:$0x3] %v3296_v0  ;;  %v3563_v62 = vld [vmem:[%s3471_s26 + $0x30] sm:$0xff]  ;;  %v3566_v63 = vld [vmem:[%s3471_s26 + $0x38] sm:$0xff] }
  0x61   : > { %221 = vst [vmem:[#allocation2 + $0x78] sm:$0x3] %v3296_v0  ;;  %222 = vst [vmem:[#allocation2 + $0x90] sm:$0x3] %v3296_v0  ;;  %v384_v5 = vld [vmem:[#allocation2 + $0x1] sm:$0xff]  ;;  %v385_v6 = vld [vmem:[#allocation2 + $0x9] sm:$0xff] }
  0x62   : > { %223 = vst [vmem:[#allocation2 + $0xa8] sm:$0x3] %v3296_v0  ;;  %224 = vst [vmem:[#allocation2 + $0xc0] sm:$0x3] %v3296_v0  ;;  %v3488_v7 = vld [vmem:[#allocation2 + $0x19] sm:$0xff]  ;;  %v421_v9 = vmul.f32 %v3483_v2, %v384_v5  ;;  %v422_v10 = vmul.f32 %v3483_v2, %v385_v6  ;;  %v485_v12 = vld [vmem:[#allocation2 + $0x2] sm:$0xff] }
  0x63   : > { %225 = vst [vmem:[#allocation2 + $0xd8] sm:$0x3] %v3296_v0  ;;  %226 = vst [vmem:[#allocation2 + $0xf0] sm:$0x3] %v3296_v0  ;;  %v3490_v8 = vld [vmem:[#allocation2 + $0x21] sm:$0xff]  ;;  %v423_v11 = vmul.f32 %v3483_v2, %v3488_v7  ;;  %v486_v13 = vld [vmem:[#allocation2 + $0xa] sm:$0xff]  ;;  %v522_v17 = vmul.f32 %v3485_v3, %v485_v12 }
  0x64   : > { %227 = vst [vmem:[#allocation2 + $0x108] sm:$0x3] %v3296_v0  ;;  %228 = vst [vmem:[#allocation2 + $0x120] sm:$0x3] %v3296_v0  ;;  %v424_v14 = vmul.f32 %v3483_v2, %v3490_v8  ;;  %v3498_v15 = vld [vmem:[#allocation2 + $0x1a] sm:$0xff]  ;;  %v3500_v16 = vld [vmem:[#allocation2 + $0x22] sm:$0xff]  ;;  %v523_v18 = vmul.f32 %v3485_v3, %v486_v13  ;;  %v453_v20 = vadd.f32 %v421_v9, %v352_v4 }
  0x65   : > { %229 = vst [vmem:[#allocation2 + $0x138] sm:$0x3] %v3296_v0  ;;  %230 = vst [vmem:[#allocation2 + $0x150] sm:$0x3] %v3296_v0  ;;  %v586_v19 = vld [vmem:[#allocation2 + $0x3] sm:$0xff]  ;;  %v454_v21 = vadd.f32 %v422_v10, %v352_v4  ;;  %v455_v22 = vadd.f32 %v423_v11, %v352_v4  ;;  %v524_v23 = vmul.f32 %v3485_v3, %v3498_v15  ;;  %v587_v24 = vld [vmem:[#allocation2 + $0xb] sm:$0xff] }
  0x66   : > { %231 = vst [vmem:[#allocation2 + $0x168] sm:$0x3] %v3296_v0  ;;  %232 = vst [vmem:[#allocation2 + $0x180] sm:$0x3] %v3296_v0  ;;  %v3506_v25 = vld [vmem:[#allocation2 + $0x1b] sm:$0xff]  ;;  %v3508_v26 = vld [vmem:[#allocation2 + $0x23] sm:$0xff]  ;;  %v456_v27 = vadd.f32 %v424_v14, %v352_v4  ;;  %v525_v28 = vmul.f32 %v3485_v3, %v3500_v16  ;;  %v554_v32 = vadd.f32 %v522_v17, %v453_v20 }
  0x67   : > { %233 = vst [vmem:[#allocation2 + $0x198] sm:$0x3] %v3296_v0  ;;  %234 = vst [vmem:[#allocation2 + $0x42] sm:$0x3] %v3296_v0  ;;  %v687_v30 = vld [vmem:[#allocation2 + $0x4] sm:$0xff]  ;;  %v688_v31 = vld [vmem:[#allocation2 + $0xc] sm:$0xff]  ;;  %v555_v33 = vadd.f32 %v523_v18, %v454_v21  ;;  %v623_v34 = vmul.f32 %v3512_v29, %v586_v19  ;;  %v556_v36 = vadd.f32 %v524_v23, %v455_v22 }
  0x68   : > { %235 = vst [vmem:[#allocation2 + $0x5a] sm:$0x3] %v3296_v0  ;;  %236 = vst [vmem:[#allocation2 + $0x72] sm:$0x3] %v3296_v0  ;;  %v557_v37 = vadd.f32 %v525_v28, %v456_v27  ;;  %v624_v38 = vmul.f32 %v3512_v29, %v587_v24  ;;  %v625_v39 = vmul.f32 %v3512_v29, %v3506_v25  ;;  %v3524_v43 = vld [vmem:[#allocation2 + $0x1c] sm:$0xff]  ;;  %v3531_v48 = vld [vmem:[#allocation2 + $0x24] sm:$0xff] }
  0x69   : > { %237 = vst [vmem:[#allocation2 + $0x8a] sm:$0x3] %v3296_v0  ;;  %238 = vst [vmem:[#allocation2 + $0xa2] sm:$0x3] %v3296_v0  ;;  %v626_v41 = vmul.f32 %v3512_v29, %v3508_v26  ;;  %v655_v42 = vadd.f32 %v623_v34, %v554_v32  ;;  %v724_v44 = vmul.f32 %v3515_v35, %v687_v30  ;;  %v3574_v5 = vld [vmem:[%s3471_s26 + $0x40] sm:$0xff]  ;;  %v3577_v6 = vld [vmem:[%s3471_s26 + $0x48] sm:$0xff] }
  0x6a   : > { %239 = vst [vmem:[#allocation2 + $0xba] sm:$0x3] %v3296_v0  ;;  %240 = vst [vmem:[#allocation2 + $0xd2] sm:$0x3] %v3296_v0  ;;  %v725_v45 = vmul.f32 %v3515_v35, %v688_v31  ;;  %v656_v47 = vadd.f32 %v624_v38, %v555_v33  ;;  %v657_v56 = vadd.f32 %v625_v39, %v556_v36  ;;  %v3580_v9 = vld [vmem:[%s3471_s26 + $0x50] sm:$0xff]  ;;  %v3588_v11 = vld [vmem:[%s3471_s26 + $0x58] sm:$0xff] }
  0x6b   : > { %241 = vst [vmem:[#allocation2 + $0xea] sm:$0x3] %v3296_v0  ;;  %242 = vst [vmem:[#allocation2 + $0x102] sm:$0x3] %v3296_v0  ;;  %v756_v50 = vadd.f32 %v724_v44, %v655_v42  ;;  %v726_v57 = vmul.f32 %v3515_v35, %v3524_v43  ;;  %v727_v4 = vmul.f32 %v3515_v35, %v3531_v48  ;;  %v3582_v10 = vld [vmem:[#allocation6 + $0x9] ss:$0 sm:$0xff] }
  0x6c   : > { %243 = vst [vmem:[#allocation2 + $0x11a] sm:$0x3] %v3296_v0  ;;  %244 = vst [vmem:[#allocation2 + $0x132] sm:$0x3] %v3296_v0  ;;  %v757_v58 = vadd.f32 %v725_v45, %v656_v47  ;;  %v3591_v12 = vld [vmem:[%s3471_s26 + $0x60] sm:$0xff]  ;;  %v3594_v13 = vld [vmem:[%s3471_s26 + $0x68] sm:$0xff]  ;;  %v927_v22 = vmul.f32 %v3538_v52, %v3488_v7  ;;  %v928_v23 = vmul.f32 %v3538_v52, %v3490_v8 }
  0x6d   : > { %245 = vst [vmem:[#allocation2 + $0x14a] sm:$0x3] %v3296_v0  ;;  %246 = vst [vmem:[#allocation2 + $0x162] sm:$0x3] %v3296_v0  ;;  %v858_v14 = vadd.f32 %v826_v51, %v756_v50  ;;  %v3600_v17 = vld [vmem:[%s3471_s26 + $0x70] sm:$0xff]  ;;  %v3603_v18 = vld [vmem:[%s3471_s26 + $0x78] sm:$0xff]  ;;  %v758_v20 = vadd.f32 %v726_v57, %v657_v56  ;;  %v1028_v7 = vmul.f32 %v3552_v59, %v3498_v15 }
  0x6e   : > { %247 = vst [vmem:[#allocation2 + $0x17a] sm:$0x3] %v3296_v0  ;;  %248 = vst [vmem:[#allocation2 + $0x192] sm:$0x3] %v3296_v0  ;;  %v3606_v19 = vld [vmem:[%s3471_s26 + $0x80] sm:$0xff]  ;;  %v859_v21 = vadd.f32 %v826_v51, %v757_v58  ;;  %v3616_v24 = vld [vmem:[%s3471_s26 + $0x88] sm:$0xff]  ;;  %v1029_v8 = vmul.f32 %v3552_v59, %v3500_v16  ;;  %v1129_v31 = vmul.f32 %v3554_v60, %v3506_v25 }
  0x6f   : > { %249 = vst [vmem:[#allocation2 + $0x1aa] sm:$0x3] %v3296_v0  ;;  %283 = vst [vmem:[#allocation2 + $0x32] sm:$0xff] %v3529_v46  ;;  %v658_v0 = vadd.f32 %v626_v41, %v557_v37  ;;  %v3619_v27 = vld [vmem:[%s3471_s26 + $0x90] sm:$0xff]  ;;  %v3622_v28 = vld [vmem:[%s3471_s26 + $0x98] sm:$0xff]  ;;  %v526_v16 = vmul.f32 %v3485_v3, %v3529_v46  ;;  %v959_v39 = vadd.f32 %v927_v22, %v858_v14  ;;  %s3021_s25 = sshll.u32 %s3341_s16, 12 }
  0x70   : > { %284 = vst [vmem:[#allocation2 + $0x3a] sm:$0xff] %v3535_v49  ;;  %285 = vst [vmem:[#allocation2 + $0x4a] sm:$0xff] %v3542_v53  ;;  %v271_v34 = vld [vmem:[%s3471_s26 + $0xa0] sm:$0xff]  ;;  %v1130_v41 = vmul.f32 %v3554_v60, %v3508_v26  ;;  %v1230_v42 = vmul.f32 %v3582_v10, %v3524_v43  ;;  %v3652_v44 = vmul.f32 %v3582_v10, %v3531_v48  ;;  %s2895_s5 = sshll.u32 %s4784_s8, 4  ;;  %s5584_s28 = scalar_lea.hbm %s5635_s3, %s3021_s25  ;;  %s5586_s5 = int_to_ptr.vmem [resolvable:$true] %s2895_s5 }
  0x71   : > { %286 = vst [vmem:[#allocation2 + $0x52] sm:$0xff] %v3545_v54  ;;  %287 = vst [vmem:[#allocation2 + $0x62] sm:$0xff] %v3548_v55  ;;  %v759_v30 = vadd.f32 %v727_v4, %v658_v0  ;;  %v960_v47 = vadd.f32 %v928_v23, %v859_v21  ;;  %v1030_v51 = vmul.f32 %v3552_v59, %v3529_v46  ;;  %s2882_s23 = scalar_lea.sflag [#allocation5], %s3465_s6  ;;  %s3220_s29 = scalar_lea.vmem %s5586_s5, 4096 }
  0x72   : > { %288 = vst [vmem:[#allocation2 + $0x6a] sm:$0xff] %v3560_v61  ;;  %289 = vst [vmem:[#allocation2 + $0x7a] sm:$0xff] %v3563_v62  ;;  %v527_v43 = vmul.f32 %v3485_v3, %v3535_v49  ;;  %v1031_v48 = vmul.f32 %v3552_v59, %v3535_v49  ;;  %v528_v14 = vmul.f32 %v3485_v3, %v3542_v53  ;;  %p3221_p4 = scmp.ne.s32.totalorder %s5586_s5, %s3220_s29  ;;  %s3297_s16 = smov [#allocation8]  }
  0x73   : > { %290 = vst [vmem:[#allocation2 + $0x82] sm:$0xff] %v3566_v63  ;;  %291 = vst [vmem:[#allocation2 + $0x92] sm:$0xff] %v3574_v5  ;;  %v529_v49 = vmul.f32 %v3485_v3, %v3545_v54  ;;  %s3224_s30 = sshll.u32 %s3297_s16, 4  ;;  %s3225_s30 = int_to_ptr.vmem [resolvable:$false] %s3224_s30 }
  0x74   : > { %292 = vst [vmem:[#allocation2 + $0x9a] sm:$0xff] %v3577_v6  ;;  %293 = vst [vmem:[#allocation2 + $0xaa] sm:$0xff] %v3580_v9  ;;  %p3222_p6 = pnand %p3221_p4, %p3414_p12  ;;  %s3226_s22 = scalar_lea.vmem %s3225_s30, 8192 }
  0x75   : > { %5664 = vst [vmem:[#allocation12_spill] sm:$0xff] %v3591_v12  ;;  %5665 = vst [vmem:[#allocation13_spill] sm:$0xff] %v3594_v13  ;;  %p3227_p10 = scmp.lt.s32.totalorder %s5586_s5, %s3225_s30  ;;  %p3228_p13 = scmp.lt.s32.totalorder %s3226_s22, %s3220_s29 }
  0x76   : > { %294 = vst [vmem:[#allocation2 + $0xb2] sm:$0xff] %v3588_v11  ;;  %295 = vst [vmem:[#allocation2 + $0xc2] sm:$0xff] %v3591_v12  ;;  %v319_v32 = vld [vmem:[#allocation2 + $0x30] sm:$0xff]  ;;  %p3223_p8 = pneg %p3222_p6 }
  0x77   : > { %296 = vst [vmem:[#allocation2 + $0xca] sm:$0xff] %v3594_v13  ;;  %5666 = vst [vmem:[#allocation14_spill] sm:$0xff] %v3600_v17  ;;  %v3630_v33 = vld [vmem:[#allocation2 + $0x31] sm:$0xff]  ;;  %v356_v36 = vmul.f32 %v3481_v1, %v319_v32  ;;  %v828_v25 = vmul.f32 %v3520_v40, %v319_v32  ;;  %v3644_v38 = vld [vmem:[#allocation2 + $0x39] sm:$0xff]  ;;  %p3229_p3 = por %p3228_p13, %p3227_p10 }
  0x78   : > { %5667 = vst [vmem:[#allocation15_spill] sm:$0xff] %v3603_v18  ;;  %5668 = vst [vmem:[#allocation16_spill] sm:$0xff] %v3606_v19  ;;  %v425_v15 = vmul.f32 %v3483_v2, %v3630_v33  ;;  %v3642_v37 = vld [vmem:[#allocation2 + $0x38] sm:$0xff]  ;;  %v426_v26 = vmul.f32 %v3483_v2, %v3644_v38  ;;  %v929_v21 = vmul.f32 %v3538_v52, %v3630_v33 }
  0x79   : > { %297 = vst [vmem:[#allocation2 + $0xda] sm:$0xff] %v3600_v17  ;;  %298 = vst [vmem:[#allocation2 + $0xe2] sm:$0xff] %v3603_v18  ;;  %v590_v45 = vld [vmem:[#allocation2 + $0x33] sm:$0xff]  ;;  %v357_v56 = vmul.f32 %v3481_v1, %v3642_v37  ;;  %v860_v57 = vadd.f32 %v828_v25, %v758_v20  ;;  %v3666_v4 = vld [vmem:[#allocation2 + $0x3b] sm:$0xff]  ;;  %v3673_v20 = vmul.f32 %v3552_v59, %v3542_v53  ;;  %p3230_p7 = pnand %p3229_p3, %p3223_p8 }
  0x7a   : > { %299 = vst [vmem:[#allocation2 + $0xf2] sm:$0xff] %v3606_v19  ;;  %5669 = vst [vmem:[#allocation17_spill] sm:$0xff] %v3616_v24  ;;  %v457_v50 = vadd.f32 %v425_v15, %v356_v36  ;;  %v3662_v58 = vld [vmem:[#allocation2 + $0x34] sm:$0xff]  ;;  %v627_v46 = vmul.f32 %v3512_v29, %v590_v45  ;;  %v829_v23 = vmul.f32 %v3520_v40, %v3642_v37  ;;  %v3683_v25 = vld [vmem:[#allocation2 + $0x48] sm:$0xff] }
  0x7b   : > { %5670 = vst [vmem:[#allocation18_spill] sm:$0xff] %v3619_v27  ;;  %5671 = vst [vmem:[#allocation19_spill] sm:$0xff] %v3622_v28  ;;  %v458_v22 = vadd.f32 %v426_v26, %v357_v56  ;;  %v1061_v36 = vadd.f32 %v1029_v8, %v960_v47  ;;  %v3685_v53 = vld [vmem:[#allocation2 + $0x49] sm:$0xff]  ;;  %v628_v26 = vmul.f32 %v3512_v29, %v3666_v4 }
  0x7c   : > { %300 = vst [vmem:[#allocation2 + $0xfa] sm:$0xff] %v3616_v24  ;;  %301 = vst [vmem:[#allocation2 + $0x10a] sm:$0xff] %v3619_v27  ;;  %v558_v0 = vadd.f32 %v526_v16, %v457_v50  ;;  %v728_v16 = vmul.f32 %v3515_v35, %v3662_v58  ;;  %v961_v50 = vadd.f32 %v929_v21, %v860_v57  ;;  %v692_v27 = vld [vmem:[#allocation2 + $0x3c] sm:$0xff] }
  0x7d   : > { %302 = vst [vmem:[#allocation2 + $0x112] sm:$0xff] %v3622_v28  ;;  %303 = vst [vmem:[#allocation2 + $0x122] sm:$0xff] %v271_v34  ;;  %v1060_v34 = vadd.f32 %v1028_v7, %v959_v39  ;;  %v3687_v28 = vld [vmem:[#allocation6 + $0xa] ss:$0 sm:$0xff]  ;;  %v559_v56 = vadd.f32 %v527_v43, %v458_v22  ;;  %v861_v24 = vadd.f32 %v829_v23, %v759_v30 }
  0x7e   : > { %v659_v15 = vadd.f32 %v627_v46, %v558_v0  ;;  %v3693_v7 = vmul.f32 %v3552_v59, %v3545_v54  ;;  %v3697_v8 = vmul.f32 %v3485_v3, %v3548_v55  ;;  %v3701_v39 = vmul.f32 %v3552_v59, %v3548_v55  ;;  %v3709_v54 = vld [vmem:[#allocation2 + $0x50] sm:$0xff]  ;;  %v3716_v55 = vld [vmem:[#allocation6 + $0xb] ss:$0 sm:$0xff] }
  0x7f   : > { %v660_v47 = vadd.f32 %v628_v26, %v559_v56  ;;  %v930_v57 = vmul.f32 %v3538_v52, %v3644_v38  ;;  %v358_v30 = vmul.f32 %v3481_v1, %v3683_v25  ;;  %v427_v43 = vmul.f32 %v3483_v2, %v3685_v53  ;;  %v3711_v0 = vld [vmem:[#allocation2 + $0x51] sm:$0xff] }
  0x80   : > { %v760_v19 = vadd.f32 %v728_v16, %v659_v15  ;;  %v1161_v46 = vadd.f32 %v1129_v31, %v1060_v34  ;;  %v3714_v21 = vmul.f32 %v3687_v28, %v319_v32  ;;  %v729_v22 = vmul.f32 %v3515_v35, %v692_v27  ;;  %v592_v15 = vld [vmem:[#allocation2 + $0x4b] sm:$0xff] }
  0x81   : > { %v830_v23 = vmul.f32 %v3520_v40, %v3683_v25  ;;  %v1162_v16 = vadd.f32 %v1130_v41, %v1061_v36  ;;  %v1062_v56 = vadd.f32 %v1030_v51, %v961_v50  ;;  %v962_v26 = vadd.f32 %v930_v57, %v861_v24  ;;  %v693_v36 = vld [vmem:[#allocation2 + $0x4c] sm:$0xff] }
  0x82   : > { %5672 = vst [vmem:[#allocation20_spill] sm:$0xff] %v3714_v21  ;;  %v459_v18 = vadd.f32 %v427_v43, %v358_v30  ;;  %v761_v17 = vadd.f32 %v729_v22, %v660_v47  ;;  %v359_v31 = vmul.f32 %v3481_v1, %v3709_v54  ;;  %v428_v32 = vmul.f32 %v3483_v2, %v3711_v0  ;;  %v593_v30 = vld [vmem:[#allocation2 + $0x53] sm:$0xff]  ;;  %v3744_v22 = vld [vmem:[#allocation2 + $0x61] sm:$0xff] }
  0x83   : > { %v862_v13 = vadd.f32 %v830_v23, %v760_v19  ;;  %v3727_v34 = vmul.f32 %v3716_v55, %v3630_v33  ;;  %v1131_v21 = vmul.f32 %v3554_v60, %v590_v45  ;;  %v629_v41 = vmul.f32 %v3512_v29, %v592_v15 }
  0x84   : > { %v560_v12 = vadd.f32 %v528_v14, %v459_v18  ;;  %v3731_v51 = vadd.f32 %v1230_v42, %v1161_v46  ;;  %v931_v19 = vmul.f32 %v3538_v52, %v3685_v53  ;;  %v460_v24 = vadd.f32 %v428_v32, %v359_v31  ;;  %v3742_v46 = vld [vmem:[#allocation2 + $0x60] sm:$0xff] }
  0x85   : > { %v831_v50 = vmul.f32 %v3520_v40, %v3709_v54  ;;  %v3738_v47 = vadd.f32 %v3652_v44, %v1162_v16  ;;  %v1063_v33 = vadd.f32 %v1031_v48, %v962_v26  ;;  %v1163_v57 = vadd.f32 %v1131_v21, %v1062_v56  ;;  %v694_v21 = vld [vmem:[#allocation2 + $0x54] sm:$0xff]  ;;  %v3769_v26 = vld [vmem:[#allocation2 + $0x69] sm:$0xff] }
  0x86   : > { %v661_v45 = vadd.f32 %v629_v41, %v560_v12  ;;  %v963_v18 = vadd.f32 %v931_v19, %v862_v13  ;;  %v561_v14 = vadd.f32 %v529_v49, %v460_v24  ;;  %v932_v42 = vmul.f32 %v3538_v52, %v3711_v0  ;;  %v3776_v19 = vld [vmem:[#allocation2 + $0x63] sm:$0xff] }
  0x87   : > { %v863_v43 = vadd.f32 %v831_v50, %v761_v17  ;;  %v1132_v23 = vmul.f32 %v3554_v60, %v3666_v4  ;;  %v1232_v44 = vmul.f32 %v3582_v10, %v3662_v58  ;;  %v1233_v48 = vmul.f32 %v3582_v10, %v692_v27  ;;  %v3761_v4 = vld [vmem:[#allocation2 + $0x68] sm:$0xff] }
  0x88   : > { %v730_v12 = vmul.f32 %v3515_v35, %v693_v36  ;;  %v3754_v13 = vmul.f32 %v3687_v28, %v3642_v37  ;;  %v3758_v17 = vmul.f32 %v3716_v55, %v3644_v38  ;;  %v630_v49 = vmul.f32 %v3512_v29, %v593_v30 }
  0x89   : > { %v964_v16 = vadd.f32 %v932_v42, %v863_v43  ;;  %v3763_v56 = vadd.f32 %v1232_v44, %v1163_v57  ;;  %v360_v27 = vmul.f32 %v3481_v1, %v3742_v46  ;;  %v429_v37 = vmul.f32 %v3483_v2, %v3744_v22  ;;  %v3796_v44 = vld [vmem:[#allocation2 + $0x64] sm:$0xff] }
  0x8a   : > { %v762_v58 = vadd.f32 %v730_v12, %v661_v45  ;;  %v1164_v31 = vadd.f32 %v1132_v23, %v1063_v33  ;;  %v1064_v38 = vadd.f32 %v3673_v20, %v963_v18  ;;  %v3774_v32 = vmul.f32 %v3687_v28, %v3683_v25 }
  0x8b   : > { %5673 = vst [vmem:[#allocation21_spill] sm:$0xff] %v3763_v56  ;;  %v662_v41 = vadd.f32 %v630_v49, %v561_v14  ;;  %v731_v24 = vmul.f32 %v3515_v35, %v694_v21  ;;  %v461_v50 = vadd.f32 %v429_v37, %v360_v27  ;;  %v832_v57 = vmul.f32 %v3520_v40, %v3742_v46 }
  0x8c   : > { %5674 = vst [vmem:[#allocation22_spill] sm:$0xff] %v3774_v32  ;;  %v361_v45 = vmul.f32 %v3481_v1, %v3761_v4  ;;  %v1065_v33 = vadd.f32 %v3693_v7, %v964_v16  ;;  %v1133_v20 = vmul.f32 %v3554_v60, %v592_v15  ;;  %v430_v25 = vmul.f32 %v3483_v2, %v3769_v26  ;;  %v3799_v16 = vld [vmem:[#allocation2 + $0x6b] sm:$0xff] }
  0x8d   : > { %v531_v18 = vmul.f32 %v3485_v3, %v3560_v61  ;;  %v3791_v14 = vmul.f32 %v3716_v55, %v3685_v53  ;;  %v562_v43 = vadd.f32 %v3697_v8, %v461_v50  ;;  %v864_v42 = vadd.f32 %v832_v57, %v762_v58 }
  0x8e   : > { %v631_v23 = vmul.f32 %v3512_v29, %v3776_v19  ;;  %v763_v7 = vadd.f32 %v731_v24, %v662_v41  ;;  %v1134_v15 = vmul.f32 %v3554_v60, %v593_v30  ;;  %v1165_v12 = vadd.f32 %v1133_v20, %v1064_v38  ;;  %v3806_v41 = vld [vmem:[#allocation2 + $0x6c] sm:$0xff]  ;;  %v3826_v20 = vld [vmem:[#allocation2 + $0x80] sm:$0xff] }
  0x8f   : > { %5675 = vst [vmem:[#allocation23_spill] sm:$0xff] %v3791_v14  ;;  %v462_v49 = vadd.f32 %v430_v25, %v361_v45  ;;  %v3801_v27 = vadd.f32 %v1233_v48, %v1164_v31  ;;  %v1234_v53 = vmul.f32 %v3582_v10, %v693_v36  ;;  %v933_v8 = vmul.f32 %v3538_v52, %v3744_v22  ;;  %v3812_v31 = vld [vmem:[#allocation2 + $0x78] sm:$0xff]  ;;  %v3817_v38 = vld [vmem:[%s3471_s26 + $0xa8] sm:$0xff] }
  0x90   : > { %v663_v58 = vadd.f32 %v631_v23, %v562_v43  ;;  %v1166_v37 = vadd.f32 %v1134_v15, %v1065_v33  ;;  %v732_v30 = vmul.f32 %v3515_v35, %v3796_v44  ;;  %v833_v48 = vmul.f32 %v3520_v40, %v3761_v4  ;;  %v3814_v36 = vld [vmem:[#allocation2 + $0x79] sm:$0xff]  ;;  %v3828_v25 = vld [vmem:[#allocation2 + $0x81] sm:$0xff]  ;;  %304 = vst [vmem:[#allocation2 + $0x12a] sm:$0xff] %v3817_v38 }
  0x91   : > { %5676 = vst [vmem:[#allocation24_spill] sm:$0xff] %v3801_v27  ;;  %v563_v50 = vadd.f32 %v531_v18, %v462_v49  ;;  %v1235_v24 = vmul.f32 %v3582_v10, %v694_v21  ;;  %v3822_v57 = vmul.f32 %v3687_v28, %v3709_v54  ;;  %v965_v45 = vadd.f32 %v933_v8, %v864_v42  ;;  %v3832_v18 = vld [vmem:[%s3471_s26 + $0xb0] sm:$0xff]  ;;  %v3835_v21 = vld [vmem:[%s3471_s26 + $0xb8] sm:$0xff]  ;;  %v3838_v43 = vld [vmem:[%s3471_s26 + $0xc0] sm:$0xff] }
  0x92   : > { %v632_v33 = vmul.f32 %v3512_v29, %v3799_v16  ;;  %v3840_v54 = vadd.f32 %v1234_v53, %v1165_v12  ;;  %v3844_v42 = vmul.f32 %v3716_v55, %v3711_v0  ;;  %v764_v23 = vadd.f32 %v732_v30, %v663_v58  ;;  %305 = vst [vmem:[#allocation2 + $0x13a] sm:$0xff] %v3832_v18  ;;  %v3850_v49 = vld [vmem:[%s3471_s26 + $0xc8] sm:$0xff]  ;;  %v3853_v8 = vld [vmem:[%s3471_s26 + $0xd0] sm:$0xff]  ;;  %v278_v12 = vld [vmem:[%s3471_s26 + $0xd8] sm:$0xff] }
  0x93   : > { %5677 = vst [vmem:[#allocation25_spill] sm:$0xff] %v3822_v57  ;;  %v865_v15 = vadd.f32 %v833_v48, %v763_v7  ;;  %306 = vst [vmem:[#allocation2 + $0x142] sm:$0xff] %v3835_v21  ;;  %v362_v0 = vmul.f32 %v3481_v1, %v3812_v31  ;;  %v431_v7 = vmul.f32 %v3483_v2, %v3814_v36  ;;  %v279_v30 = vld [vmem:[%s3471_s26 + $0xe0] sm:$0xff]  ;;  %v280_v48 = vld [vmem:[%s3471_s26 + $0xe8] sm:$0xff] }
  0x94   : > { %5678 = vst [vmem:[#allocation26_spill] sm:$0xff] %v3840_v54  ;;  %5679 = vst [vmem:[#allocation27_spill] sm:$0xff] %v3844_v42  ;;  %v664_v53 = vadd.f32 %v632_v33, %v563_v50  ;;  %v532_v58 = vmul.f32 %v3485_v3, %v3563_v62  ;;  %v281_v54 = vld [vmem:[%s3471_s26 + $0xf0] sm:$0xff]  ;;  %v3867_v42 = vadd.f32 %v1235_v24, %v1166_v37 }
  0x95   : > { %307 = vst [vmem:[#allocation2 + $0x152] sm:$0xff] %v3838_v43  ;;  %308 = vst [vmem:[#allocation2 + $0x15a] sm:$0xff] %v3850_v49  ;;  %v3871_v50 = vmul.f32 %v3687_v28, %v3742_v46  ;;  %v3875_v33 = vmul.f32 %v3716_v55, %v3744_v22  ;;  %v934_v57 = vmul.f32 %v3538_v52, %v3769_v26 }
  0x96   : > { %309 = vst [vmem:[#allocation2 + $0x16a] sm:$0xff] %v3853_v8  ;;  %310 = vst [vmem:[#allocation2 + $0x172] sm:$0xff] %v278_v12  ;;  %v282_v12 = vld [vmem:[%s3471_s26 + $0xf8] sm:$0xff]  ;;  %v1066_v27 = vadd.f32 %v3701_v39, %v965_v45  ;;  %v733_v37 = vmul.f32 %v3515_v35, %v3806_v41  ;;  %v463_v24 = vadd.f32 %v431_v7, %v362_v0 }
  0x97   : > { %5680 = vst [vmem:[#allocation28_spill] sm:$0xff] %v3867_v42  ;;  %5681 = vst [vmem:[#allocation29_spill] sm:$0xff] %v3871_v50  ;;  %v834_v46 = vmul.f32 %v3520_v40, %v3812_v31  ;;  %v596_v42 = vld [vmem:[#allocation2 + $0x7b] sm:$0xff]  ;;  %v966_v22 = vadd.f32 %v934_v57, %v865_v15  ;;  %v533_v0 = vmul.f32 %v3485_v3, %v3566_v63 }
  0x98   : > { %5682 = vst [vmem:[#allocation30_spill] sm:$0xff] %v3875_v33  ;;  %311 = vst [vmem:[#allocation2 + $0x182] sm:$0xff] %v279_v30  ;;  %v1035_v33 = vmul.f32 %v3552_v59, %v3560_v61  ;;  %v363_v30 = vmul.f32 %v3481_v1, %v3826_v20  ;;  %v765_v39 = vadd.f32 %v733_v37, %v664_v53  ;;  %v697_v37 = vld [vmem:[#allocation2 + $0x7c] sm:$0xff] }
  0x99   : > { %312 = vst [vmem:[#allocation2 + $0x18a] sm:$0xff] %v280_v48  ;;  %313 = vst [vmem:[#allocation2 + $0x19a] sm:$0xff] %v281_v54  ;;  %v432_v54 = vmul.f32 %v3483_v2, %v3828_v25  ;;  %v564_v45 = vadd.f32 %v532_v58, %v463_v24  ;;  %v866_v48 = vadd.f32 %v834_v46, %v764_v23  ;;  %v597_v58 = vld [vmem:[#allocation2 + $0x83] sm:$0xff] }
  0x9a   : > { %314 = vst [vmem:[#allocation2 + $0x1a2] sm:$0xff] %v282_v12  ;;  %v1135_v7 = vmul.f32 %v3554_v60, %v3776_v19  ;;  %v1136_v57 = vmul.f32 %v3554_v60, %v3799_v16  ;;  %v633_v61 = vmul.f32 %v3512_v29, %v596_v42  ;;  %v1236_v12 = vmul.f32 %v3582_v10, %v3796_v44  ;;  %v3910_v44 = vld [vmem:[#allocation2 + $0x91] sm:$0xff] }
  0x9b   : > { %v464_v15 = vadd.f32 %v432_v54, %v363_v30  ;;  %v1237_v53 = vmul.f32 %v3582_v10, %v3806_v41  ;;  %v935_v23 = vmul.f32 %v3538_v52, %v3814_v36  ;;  %v835_v19 = vmul.f32 %v3520_v40, %v3826_v20  ;;  %v3908_v54 = vld [vmem:[#allocation2 + $0x90] sm:$0xff] }
  0x9c   : > { %v1067_v24 = vadd.f32 %v1035_v33, %v966_v22  ;;  %v1167_v46 = vadd.f32 %v1135_v7, %v1066_v27  ;;  %v1036_v16 = vmul.f32 %v3552_v59, %v3563_v62  ;;  %v665_v30 = vadd.f32 %v633_v61, %v564_v45  ;;  %v698_v22 = vld [vmem:[#allocation2 + $0x84] sm:$0xff] }
  0x9d   : > { %v967_v50 = vadd.f32 %v935_v23, %v866_v48  ;;  %v565_v41 = vadd.f32 %v533_v0, %v464_v15  ;;  %v867_v14 = vadd.f32 %v835_v19, %v765_v39  ;;  %v936_v32 = vmul.f32 %v3538_v52, %v3828_v25  ;;  %v3930_v0 = vld [vmem:[#allocation2 + $0x98] sm:$0xff] }
  0x9e   : > { %v3916_v56 = vmul.f32 %v3687_v28, %v3761_v4  ;;  %v3920_v27 = vmul.f32 %v3716_v55, %v3769_v26  ;;  %v634_v62 = vmul.f32 %v3512_v29, %v597_v58  ;;  %v734_v33 = vmul.f32 %v3515_v35, %v697_v37  ;;  %v3936_v23 = vld [vmem:[#allocation2 + $0x99] sm:$0xff] }
  0x9f   : > { %v968_v45 = vadd.f32 %v936_v32, %v867_v14  ;;  %v1037_v39 = vmul.f32 %v3552_v59, %v3566_v63  ;;  %v364_v48 = vmul.f32 %v3481_v1, %v3908_v54  ;;  %v433_v4 = vmul.f32 %v3483_v2, %v3910_v44 }
  0xa0   : > { %5683 = vst [vmem:[#allocation31_spill] sm:$0xff] %v3916_v56  ;;  %5684 = vst [vmem:[#allocation32_spill] sm:$0xff] %v3920_v27  ;;  %v1168_v7 = vadd.f32 %v1136_v57, %v1067_v24  ;;  %v3932_v26 = vadd.f32 %v1236_v12, %v1167_v46  ;;  %v766_v15 = vadd.f32 %v734_v33, %v665_v30  ;;  %v598_v27 = vld [vmem:[#allocation2 + $0x93] sm:$0xff] }
  0xa1   : > { %v534_v61 = vmul.f32 %v3485_v3, %v3574_v5  ;;  %v1068_v32 = vadd.f32 %v1036_v16, %v967_v50  ;;  %v3940_v63 = vmul.f32 %v3687_v28, %v3812_v31  ;;  %v666_v14 = vadd.f32 %v634_v62, %v565_v41  ;;  %v699_v33 = vld [vmem:[#allocation2 + $0x94] sm:$0xff] }
  0xa2   : > { %v465_v19 = vadd.f32 %v433_v4, %v364_v48  ;;  %v735_v56 = vmul.f32 %v3515_v35, %v698_v22  ;;  %v1137_v57 = vmul.f32 %v3554_v60, %v596_v42  ;;  %v836_v12 = vmul.f32 %v3520_v40, %v3908_v54 }
  0xa3   : > { %5685 = vst [vmem:[#allocation33_spill] sm:$0xff] %v3940_v63  ;;  %v365_v24 = vmul.f32 %v3481_v1, %v3930_v0  ;;  %v1069_v46 = vadd.f32 %v1037_v39, %v968_v45  ;;  %v434_v50 = vmul.f32 %v3483_v2, %v3936_v23  ;;  %v535_v31 = vmul.f32 %v3485_v3, %v3577_v6 }
  0xa4   : > { %v566_v30 = vadd.f32 %v534_v61, %v465_v19  ;;  %v3952_v16 = vadd.f32 %v1237_v53, %v1168_v7  ;;  %v3956_v41 = vmul.f32 %v3716_v55, %v3814_v36  ;;  %v868_v42 = vadd.f32 %v836_v12, %v766_v15  ;;  %v599_v61 = vld [vmem:[#allocation2 + $0x9b] sm:$0xff] }
  0xa5   : > { %v635_v62 = vmul.f32 %v3512_v29, %v598_v27  ;;  %v767_v48 = vadd.f32 %v735_v56, %v666_v14  ;;  %v1138_v45 = vmul.f32 %v3554_v60, %v597_v58  ;;  %v1169_v39 = vadd.f32 %v1137_v57, %v1068_v32  ;;  %v3967_v14 = vld [vmem:[#allocation2 + $0xa8] sm:$0xff] }
  0xa6   : > { %5686 = vst [vmem:[#allocation34_spill] sm:$0xff] %v3952_v16  ;;  %v466_v4 = vadd.f32 %v434_v50, %v365_v24  ;;  %v1238_v19 = vmul.f32 %v3582_v10, %v697_v37  ;;  %v1239_v63 = vmul.f32 %v3582_v10, %v698_v22  ;;  %v937_v53 = vmul.f32 %v3538_v52, %v3910_v44  ;;  %v3969_v58 = vld [vmem:[#allocation2 + $0xa9] sm:$0xff] }
  0xa7   : > { %v667_v7 = vadd.f32 %v635_v62, %v566_v30  ;;  %v1170_v36 = vadd.f32 %v1138_v45, %v1069_v46  ;;  %v736_v15 = vmul.f32 %v3515_v35, %v699_v33  ;;  %v837_v56 = vmul.f32 %v3520_v40, %v3930_v0  ;;  %v700_v46 = vld [vmem:[#allocation2 + $0x9c] sm:$0xff]  ;;  %v3990_v62 = vld [vmem:[#allocation2 + $0xb0] sm:$0xff] }
  0xa8   : > { %v567_v16 = vadd.f32 %v535_v31, %v466_v4  ;;  %v3973_v37 = vmul.f32 %v3687_v28, %v3826_v20  ;;  %v969_v22 = vadd.f32 %v937_v53, %v868_v42  ;;  %v1038_v32 = vmul.f32 %v3552_v59, %v3574_v5  ;;  %v3992_v45 = vld [vmem:[#allocation2 + $0xb1] sm:$0xff] }
  0xa9   : > { %v636_v57 = vmul.f32 %v3512_v29, %v599_v61  ;;  %v3978_v12 = vadd.f32 %v1238_v19, %v1169_v39  ;;  %v3982_v24 = vmul.f32 %v3716_v55, %v3828_v25  ;;  %v768_v30 = vadd.f32 %v736_v15, %v667_v7 }
  0xaa   : > { %v869_v50 = vadd.f32 %v837_v56, %v767_v48  ;;  %v366_v20 = vmul.f32 %v3481_v1, %v3967_v14  ;;  %v435_v42 = vmul.f32 %v3483_v2, %v3969_v58  ;;  %v536_v5 = vmul.f32 %v3485_v3, %v3580_v9 }
  0xab   : > { %5687 = vst [vmem:[#allocation35_spill] sm:$0xff] %v3978_v12  ;;  %5688 = vst [vmem:[#allocation36_spill] sm:$0xff] %v3982_v24  ;;  %v668_v31 = vadd.f32 %v636_v57, %v567_v16  ;;  %v3994_v39 = vadd.f32 %v1239_v63, %v1170_v36  ;;  %v3998_v25 = vmul.f32 %v3687_v28, %v3908_v54  ;;  %v600_v63 = vld [vmem:[#allocation2 + $0xab] sm:$0xff] }
  0xac   : > { %v4002_v16 = vmul.f32 %v3716_v55, %v3910_v44  ;;  %v938_v48 = vmul.f32 %v3538_v52, %v3936_v23  ;;  %v1070_v4 = vadd.f32 %v1038_v32, %v969_v22  ;;  %v737_v19 = vmul.f32 %v3515_v35, %v700_v46 }
  0xad   : > { %5689 = vst [vmem:[#allocation37_spill] sm:$0xff] %v3994_v39  ;;  %5690 = vst [vmem:[#allocation38_spill] sm:$0xff] %v3998_v25  ;;  %v467_v53 = vadd.f32 %v435_v42, %v366_v20  ;;  %v838_v7 = vmul.f32 %v3520_v40, %v3967_v14  ;;  %v1039_v54 = vmul.f32 %v3552_v59, %v3577_v6 }
  0xae   : > { %5691 = vst [vmem:[#allocation39_spill] sm:$0xff] %v4002_v16  ;;  %v970_v36 = vadd.f32 %v938_v48, %v869_v50  ;;  %v367_v15 = vmul.f32 %v3481_v1, %v3990_v62  ;;  %v436_v44 = vmul.f32 %v3483_v2, %v3992_v45  ;;  %v769_v56 = vadd.f32 %v737_v19, %v668_v31  ;;  %v601_v31 = vld [vmem:[#allocation2 + $0xb3] sm:$0xff] }
  0xaf   : > { %v568_v57 = vadd.f32 %v536_v5, %v467_v53  ;;  %v870_v22 = vadd.f32 %v838_v7, %v768_v30  ;;  %v537_v32 = vmul.f32 %v3485_v3, %v3588_v11  ;;  %v1139_v20 = vmul.f32 %v3554_v60, %v598_v27  ;;  %v701_v5 = vld [vmem:[#allocation2 + $0xac] sm:$0xff]  ;;  %v4028_v7 = vld [vmem:[#allocation2 + $0xc0] sm:$0xff] }
  0xb0   : > { %v1140_v42 = vmul.f32 %v3554_v60, %v599_v61  ;;  %v468_v50 = vadd.f32 %v436_v44, %v367_v15  ;;  %v637_v48 = vmul.f32 %v3512_v29, %v600_v63  ;;  %v1240_v6 = vmul.f32 %v3582_v10, %v699_v33  ;;  %v4030_v15 = vld [vmem:[#allocation2 + $0xc1] sm:$0xff] }
  0xb1   : > { %v1241_v39 = vmul.f32 %v3582_v10, %v700_v46  ;;  %v939_v16 = vmul.f32 %v3538_v52, %v3969_v58  ;;  %v839_v30 = vmul.f32 %v3520_v40, %v3990_v62  ;;  %v1071_v19 = vadd.f32 %v1039_v54, %v970_v36  ;;  %v702_v54 = vld [vmem:[#allocation2 + $0xb4] sm:$0xff] }
  0xb2   : > { %v1171_v53 = vadd.f32 %v1139_v20, %v1070_v4  ;;  %v1040_v27 = vmul.f32 %v3552_v59, %v3580_v9  ;;  %v669_v61 = vadd.f32 %v637_v48, %v568_v57  ;;  %v569_v46 = vadd.f32 %v537_v32, %v468_v50  ;;  %v5695_v50 = vld [vmem:[#allocation12_spill] sm:$0xff] }
  0xb3   : > { %v971_v33 = vadd.f32 %v939_v16, %v870_v22  ;;  %v871_v44 = vadd.f32 %v839_v30, %v769_v56  ;;  %v940_v25 = vmul.f32 %v3538_v52, %v3992_v45  ;;  %v4036_v12 = vmul.f32 %v3687_v28, %v3930_v0  ;;  %v4050_v22 = vld [vmem:[#allocation2 + $0xc8] sm:$0xff] }
  0xb4   : > { %v4040_v4 = vmul.f32 %v3716_v55, %v3936_v23  ;;  %v638_v9 = vmul.f32 %v3512_v29, %v601_v31  ;;  %v738_v36 = vmul.f32 %v3515_v35, %v701_v5  ;;  %v1041_v16 = vmul.f32 %v3552_v59, %v3588_v11  ;;  %v4056_v30 = vld [vmem:[#allocation2 + $0xc9] sm:$0xff] }
  0xb5   : > { %5692 = vst [vmem:[#allocation40_spill] sm:$0xff] %v4036_v12  ;;  %v972_v57 = vadd.f32 %v940_v25, %v871_v44  ;;  %v368_v56 = vmul.f32 %v3481_v1, %v4028_v7  ;;  %v437_v0 = vmul.f32 %v3483_v2, %v4030_v15  ;;  %v1172_v32 = vadd.f32 %v1140_v42, %v1071_v19  ;;  %v602_v12 = vld [vmem:[#allocation2 + $0xc3] sm:$0xff] }
  0xb6   : > { %5693 = vst [vmem:[#allocation41_spill] sm:$0xff] %v4040_v4  ;;  %v4052_v23 = vadd.f32 %v1240_v6, %v1171_v53  ;;  %v770_v20 = vadd.f32 %v738_v36, %v669_v61  ;;  %v538_v48 = vmul.f32 %v3485_v3, %v5695_v50  ;;  %v1072_v25 = vadd.f32 %v1040_v27, %v971_v33 }
  0xb7   : > { %v4060_v11 = vmul.f32 %v3687_v28, %v3967_v14  ;;  %v670_v44 = vadd.f32 %v638_v9, %v569_v46  ;;  %v469_v4 = vadd.f32 %v437_v0, %v368_v56  ;;  %v739_v24 = vmul.f32 %v3515_v35, %v702_v54  ;;  %v5697_v14 = vld [vmem:[#allocation13_spill] sm:$0xff] }
  0xb8   : > { %5694 = vst [vmem:[#allocation42_spill] sm:$0xff] %v4052_v23  ;;  %v1141_v42 = vmul.f32 %v3554_v60, %v600_v63  ;;  %v840_v6 = vmul.f32 %v3520_v40, %v4028_v7  ;;  %v369_v19 = vmul.f32 %v3481_v1, %v4050_v22  ;;  %v1073_v53 = vadd.f32 %v1041_v16, %v972_v57  ;;  %v703_v56 = vld [vmem:[#allocation2 + $0xc4] sm:$0xff] }
  0xb9   : > { %5696 = vst [vmem:[#allocation12_spill] sm:$0xff] %v4060_v11  ;;  %v570_v61 = vadd.f32 %v538_v48, %v469_v4  ;;  %v438_v27 = vmul.f32 %v3483_v2, %v4056_v30  ;;  %v539_v33 = vmul.f32 %v3485_v3, %v5697_v14  ;;  %v4072_v46 = vadd.f32 %v1241_v39, %v1172_v32  ;;  %v603_v48 = vld [vmem:[#allocation2 + $0xcb] sm:$0xff] }
  0xba   : > { %v4076_v9 = vmul.f32 %v3716_v55, %v3969_v58  ;;  %v872_v63 = vadd.f32 %v840_v6, %v770_v20  ;;  %v639_v36 = vmul.f32 %v3512_v29, %v602_v12  ;;  %v771_v0 = vadd.f32 %v739_v24, %v670_v44  ;;  %v4087_v44 = vld [vmem:[#allocation2 + $0xd8] sm:$0xff] }
  0xbb   : > { %5698 = vst [vmem:[#allocation13_spill] sm:$0xff] %v4072_v46  ;;  %v1142_v57 = vmul.f32 %v3554_v60, %v601_v31  ;;  %v1173_v4 = vadd.f32 %v1141_v42, %v1072_v25  ;;  %v470_v16 = vadd.f32 %v438_v27, %v369_v19  ;;  %v1242_v11 = vmul.f32 %v3582_v10, %v701_v5  ;;  %v4089_v31 = vld [vmem:[#allocation2 + $0xd9] sm:$0xff] }
  0xbc   : > { %5699 = vst [vmem:[#allocation43_spill] sm:$0xff] %v4076_v9  ;;  %v1243_v23 = vmul.f32 %v3582_v10, %v702_v54  ;;  %v941_v39 = vmul.f32 %v3538_v52, %v4030_v15  ;;  %v671_v32 = vadd.f32 %v639_v36, %v570_v61  ;;  %v740_v20 = vmul.f32 %v3515_v35, %v703_v56  ;;  %v5703_v36 = vld [vmem:[#allocation14_spill] sm:$0xff] }
  0xbd   : > { %v1174_v58 = vadd.f32 %v1142_v57, %v1073_v53  ;;  %v571_v46 = vadd.f32 %v539_v33, %v470_v16  ;;  %v841_v24 = vmul.f32 %v3520_v40, %v4050_v22  ;;  %v4093_v5 = vmul.f32 %v3687_v28, %v3990_v62  ;;  %v704_v53 = vld [vmem:[#allocation2 + $0xcc] sm:$0xff]  ;;  %v4110_v57 = vld [vmem:[#allocation2 + $0xe0] sm:$0xff] }
  0xbe   : > { %v973_v54 = vadd.f32 %v941_v39, %v872_v63  ;;  %v1042_v25 = vmul.f32 %v3552_v59, %v5695_v50  ;;  %v640_v42 = vmul.f32 %v3512_v29, %v603_v48  ;;  %v4098_v6 = vadd.f32 %v1242_v11, %v1173_v4  ;;  %v4112_v11 = vld [vmem:[#allocation2 + $0xe1] sm:$0xff] }
  0xbf   : > { %5700 = vst [vmem:[#allocation44_spill] sm:$0xff] %v4093_v5  ;;  %v4102_v19 = vmul.f32 %v3716_v55, %v3992_v45  ;;  %v772_v61 = vadd.f32 %v740_v20, %v671_v32  ;;  %v873_v27 = vadd.f32 %v841_v24, %v771_v0  ;;  %v370_v62 = vmul.f32 %v3481_v1, %v4087_v44 }
  0xc0   : > { %5701 = vst [vmem:[#allocation45_spill] sm:$0xff] %v4098_v6  ;;  %v672_v33 = vadd.f32 %v640_v42, %v571_v46  ;;  %v439_v63 = vmul.f32 %v3483_v2, %v4089_v31  ;;  %v540_v50 = vmul.f32 %v3485_v3, %v5703_v36  ;;  %v4114_v4 = vadd.f32 %v1243_v23, %v1174_v58  ;;  %v604_v23 = vld [vmem:[#allocation2 + $0xdb] sm:$0xff] }
  0xc1   : > { %5702 = vst [vmem:[#allocation46_spill] sm:$0xff] %v4102_v19  ;;  %v4118_v45 = vmul.f32 %v3687_v28, %v4028_v7  ;;  %v4122_v46 = vmul.f32 %v3716_v55, %v4030_v15  ;;  %v942_v0 = vmul.f32 %v3538_v52, %v4056_v30  ;;  %v1074_v16 = vadd.f32 %v1042_v25, %v973_v54  ;;  %v5707_v25 = vld [vmem:[#allocation15_spill] sm:$0xff] }
  0xc2   : > { %5704 = vst [vmem:[#allocation14_spill] sm:$0xff] %v4114_v4  ;;  %v741_v39 = vmul.f32 %v3515_v35, %v704_v53  ;;  %v471_v32 = vadd.f32 %v439_v63, %v370_v62  ;;  %v842_v20 = vmul.f32 %v3520_v40, %v4087_v44  ;;  %v1043_v7 = vmul.f32 %v3552_v59, %v5697_v14 }
  0xc3   : > { %5705 = vst [vmem:[#allocation47_spill] sm:$0xff] %v4118_v45  ;;  %5706 = vst [vmem:[#allocation48_spill] sm:$0xff] %v4122_v46  ;;  %v974_v58 = vadd.f32 %v942_v0, %v873_v27  ;;  %v371_v24 = vmul.f32 %v3481_v1, %v4110_v57  ;;  %v440_v15 = vmul.f32 %v3483_v2, %v4112_v11 }
  0xc4   : > { %v773_v42 = vadd.f32 %v741_v39, %v672_v33  ;;  %v572_v4 = vadd.f32 %v540_v50, %v471_v32  ;;  %v874_v54 = vadd.f32 %v842_v20, %v772_v61  ;;  %v541_v62 = vmul.f32 %v3485_v3, %v5707_v25  ;;  %v605_v33 = vld [vmem:[#allocation2 + $0xe3] sm:$0xff]  ;;  %v4148_v32 = vld [vmem:[#allocation2 + $0xf0] sm:$0xff] }
  0xc5   : > { %v1143_v63 = vmul.f32 %v3554_v60, %v602_v12  ;;  %v1144_v46 = vmul.f32 %v3554_v60, %v603_v48  ;;  %v472_v27 = vadd.f32 %v440_v15, %v371_v24  ;;  %v641_v0 = vmul.f32 %v3512_v29, %v604_v23  ;;  %v705_v50 = vld [vmem:[#allocation2 + $0xdc] sm:$0xff]  ;;  %v4150_v20 = vld [vmem:[#allocation2 + $0xf1] sm:$0xff] }
  0xc6   : > { %v1244_v14 = vmul.f32 %v3582_v10, %v703_v56  ;;  %v1245_v1 = vmul.f32 %v3582_v10, %v704_v53  ;;  %v943_v2 = vmul.f32 %v3538_v52, %v4089_v31  ;;  %v843_v61 = vmul.f32 %v3520_v40, %v4110_v57 }
  0xc7   : > { %v1075_v3 = vadd.f32 %v1043_v7, %v974_v58  ;;  %v1175_v39 = vadd.f32 %v1143_v63, %v1074_v16  ;;  %v1044_v12 = vmul.f32 %v3552_v59, %v5703_v36  ;;  %v673_v48 = vadd.f32 %v641_v0, %v572_v4  ;;  %v706_v58 = vld [vmem:[#allocation2 + $0xe4] sm:$0xff]  ;;  %v4174_v63 = vld [vmem:[#allocation2 + $0xf8] sm:$0xff] }
  0xc8   : > { %v975_v56 = vadd.f32 %v943_v2, %v874_v54  ;;  %v573_v53 = vadd.f32 %v541_v62, %v472_v27  ;;  %v875_v24 = vadd.f32 %v843_v61, %v773_v42  ;;  %v944_v15 = vmul.f32 %v3538_v52, %v4112_v11  ;;  %v4166_v54 = vld [vmem:[#allocation6] ss:$0 sm:$0xff]  ;;  %v4178_v2 = vld [vmem:[#allocation6 + $0x2] ss:$0 sm:$0xff] }
  0xc9   : > { %v4156_v45 = vmul.f32 %v3687_v28, %v4050_v22  ;;  %v4160_v16 = vmul.f32 %v3716_v55, %v4056_v30  ;;  %v642_v36 = vmul.f32 %v3512_v29, %v605_v33  ;;  %v742_v4 = vmul.f32 %v3515_v35, %v705_v50  ;;  %v4170_v22 = vld [vmem:[#allocation6 + $0x1] ss:$0 sm:$0xff] }
  0xca   : > { %v976_v7 = vadd.f32 %v944_v15, %v875_v24  ;;  %v1045_v42 = vmul.f32 %v3552_v59, %v5707_v25  ;;  %v372_v62 = vmul.f32 %v4166_v54, %v4148_v32  ;;  %v441_v30 = vmul.f32 %v4170_v22, %v4150_v20  ;;  %v5711_v61 = vld [vmem:[#allocation16_spill] sm:$0xff] }
  0xcb   : > { %5708 = vst [vmem:[#allocation15_spill] sm:$0xff] %v4156_v45  ;;  %5709 = vst [vmem:[#allocation49_spill] sm:$0xff] %v4160_v16  ;;  %v1176_v29 = vadd.f32 %v1144_v46, %v1075_v3  ;;  %v4176_v27 = vadd.f32 %v1244_v14, %v1175_v39  ;;  %v774_v0 = vadd.f32 %v742_v4, %v673_v48  ;;  %v4182_v24 = vld [vmem:[#allocation2 + $0xf9] sm:$0xff] }
  0xcc   : > { %v542_v25 = vmul.f32 %v4178_v2, %v5711_v61  ;;  %v1076_v15 = vadd.f32 %v1044_v12, %v975_v56  ;;  %v4186_v16 = vmul.f32 %v3687_v28, %v4087_v44  ;;  %v674_v45 = vadd.f32 %v642_v36, %v573_v53  ;;  %v4194_v39 = vld [vmem:[#allocation2 + $0xf3] sm:$0xff]  ;;  %v5713_v56 = vld [vmem:[#allocation17_spill] sm:$0xff] }
  0xcd   : > { %5710 = vst [vmem:[#allocation50_spill] sm:$0xff] %v4176_v27  ;;  %v473_v6 = vadd.f32 %v441_v30, %v372_v62  ;;  %v743_v19 = vmul.f32 %v3515_v35, %v706_v58  ;;  %v1145_v46 = vmul.f32 %v3554_v60, %v604_v23  ;;  %v844_v14 = vmul.f32 %v3520_v40, %v4148_v32  ;;  %v610_v27 = vld [vmem:[#allocation2 + $0x123] sm:$0xff] }
  0xce   : > { %5712 = vst [vmem:[#allocation16_spill] sm:$0xff] %v4186_v16  ;;  %v373_v3 = vmul.f32 %v4166_v54, %v4174_v63  ;;  %v1077_v48 = vadd.f32 %v1045_v42, %v976_v7  ;;  %v442_v44 = vmul.f32 %v4170_v22, %v4182_v24  ;;  %v543_v53 = vmul.f32 %v4178_v2, %v5713_v56  ;;  %v607_v7 = vld [vmem:[#allocation2 + $0xfb] sm:$0xff] }
  0xcf   : > { %v574_v12 = vadd.f32 %v542_v25, %v473_v6  ;;  %v4200_v36 = vadd.f32 %v1245_v1, %v1176_v29  ;;  %v4204_v35 = vmul.f32 %v3716_v55, %v4089_v31  ;;  %v1146_v40 = vmul.f32 %v3554_v60, %v605_v33  ;;  %v4207_v6 = vld [vmem:[#allocation6 + $0x3] ss:$0 sm:$0xff] }
  0xd0   : > { %v876_v23 = vadd.f32 %v844_v14, %v774_v0  ;;  %v775_v4 = vadd.f32 %v743_v19, %v674_v45  ;;  %v1177_v62 = vadd.f32 %v1145_v46, %v1076_v15  ;;  %v474_v30 = vadd.f32 %v442_v44, %v373_v3  ;;  %v707_v19 = vld [vmem:[#allocation2 + $0xf4] sm:$0xff]  ;;  %v4219_v0 = vld [vmem:[#allocation6 + $0x5] ss:$0 sm:$0xff]  ;;  %v4223_v46 = vld [vmem:[#allocation2 + $0x108] sm:$0xff] }
  0xd1   : > { %5714 = vst [vmem:[#allocation17_spill] sm:$0xff] %v4200_v36  ;;  %5715 = vst [vmem:[#allocation51_spill] sm:$0xff] %v4204_v35  ;;  %v643_v42 = vmul.f32 %v4207_v6, %v4194_v39  ;;  %v1246_v25 = vmul.f32 %v3582_v10, %v705_v50  ;;  %v1247_v1 = vmul.f32 %v3582_v10, %v706_v58  ;;  %v4225_v50 = vld [vmem:[#allocation2 + $0x109] sm:$0xff] }
  0xd2   : > { %v4215_v31 = vmul.f32 %v3687_v28, %v4110_v57  ;;  %v945_v60 = vmul.f32 %v3538_v52, %v4150_v20  ;;  %v1178_v45 = vadd.f32 %v1146_v40, %v1077_v48  ;;  %v575_v33 = vadd.f32 %v543_v53, %v474_v30  ;;  %v708_v48 = vld [vmem:[#allocation2 + $0xfc] sm:$0xff]  ;;  %v4285_v36 = vld [vmem:[#allocation6 + $0x9] ss:$0 sm:$0xff] }
  0xd3   : > { %v675_v29 = vadd.f32 %v643_v42, %v574_v12  ;;  %v845_v15 = vmul.f32 %v4219_v0, %v4174_v63  ;;  %v4229_v10 = vmul.f32 %v3716_v55, %v4112_v11  ;;  %v1046_v52 = vmul.f32 %v3552_v59, %v5711_v61  ;;  %v4240_v12 = vld [vmem:[#allocation6 + $0x4] ss:$0 sm:$0xff]  ;;  %v5720_v61 = vld [vmem:[#allocation18_spill] sm:$0xff] }
  0xd4   : > { %5716 = vst [vmem:[#allocation52_spill] sm:$0xff] %v4215_v31  ;;  %v977_v57 = vadd.f32 %v945_v60, %v876_v23  ;;  %v644_v58 = vmul.f32 %v4207_v6, %v607_v7  ;;  %v4234_v14 = vadd.f32 %v1246_v25, %v1177_v62  ;;  %v4238_v3 = vmul.f32 %v3687_v28, %v4148_v32  ;;  %v4249_v62 = vld [vmem:[#allocation2 + $0x110] sm:$0xff]  ;;  %v4259_v25 = vld [vmem:[#allocation6 + $0x6] ss:$0 sm:$0xff] }
  0xd5   : > { %5717 = vst [vmem:[#allocation53_spill] sm:$0xff] %v4229_v10  ;;  %v744_v44 = vmul.f32 %v4240_v12, %v707_v19  ;;  %v877_v53 = vadd.f32 %v845_v15, %v775_v4  ;;  %v374_v40 = vmul.f32 %v4166_v54, %v4223_v46  ;;  %v443_v59 = vmul.f32 %v4170_v22, %v4225_v50  ;;  %v4251_v32 = vld [vmem:[#allocation2 + $0x111] sm:$0xff] }
  0xd6   : > { %5718 = vst [vmem:[#allocation54_spill] sm:$0xff] %v4234_v14  ;;  %5719 = vst [vmem:[#allocation55_spill] sm:$0xff] %v4238_v3  ;;  %v676_v11 = vadd.f32 %v644_v58, %v575_v33  ;;  %v544_v23 = vmul.f32 %v4178_v2, %v5720_v61  ;;  %v4253_v30 = vadd.f32 %v1247_v1, %v1178_v45  ;;  %v4263_v33 = vld [vmem:[#allocation2 + $0x10b] sm:$0xff]  ;;  %v4266_v61 = vld [vmem:[#allocation6 + $0x7] ss:$0 sm:$0xff] }
  0xd7   : > { %v4257_v42 = vmul.f32 %v3716_v55, %v4150_v20  ;;  %v776_v4 = vadd.f32 %v744_v44, %v675_v29  ;;  %v946_v60 = vmul.f32 %v4259_v25, %v4182_v24  ;;  %v1078_v15 = vadd.f32 %v1046_v52, %v977_v57  ;;  %v5723_v52 = vld [vmem:[#allocation19_spill] sm:$0xff]  ;;  %v709_v31 = vld [vmem:[#allocation2 + $0x10c] sm:$0xff] }
  0xd8   : > { %5721 = vst [vmem:[#allocation18_spill] sm:$0xff] %v4253_v30  ;;  %v745_v58 = vmul.f32 %v4240_v12, %v708_v48  ;;  %v1047_v1 = vmul.f32 %v4266_v61, %v5713_v56  ;;  %v475_v45 = vadd.f32 %v443_v59, %v374_v40  ;;  %v846_v20 = vmul.f32 %v4219_v0, %v4223_v46  ;;  %v4280_v56 = vld [vmem:[#allocation6 + $0x8] ss:$0 sm:$0xff]  ;;  %v609_v10 = vld [vmem:[#allocation2 + $0x113] sm:$0xff] }
  0xd9   : > { %5722 = vst [vmem:[#allocation56_spill] sm:$0xff] %v4257_v42  ;;  %v978_v30 = vadd.f32 %v946_v60, %v877_v53  ;;  %v375_v29 = vmul.f32 %v4166_v54, %v4249_v62  ;;  %v444_v44 = vmul.f32 %v4170_v22, %v4251_v32  ;;  %v545_v3 = vmul.f32 %v4178_v2, %v5723_v52 }
  0xda   : > { %v777_v42 = vadd.f32 %v745_v58, %v676_v11  ;;  %v576_v57 = vadd.f32 %v544_v23, %v475_v45  ;;  %v645_v14 = vmul.f32 %v4207_v6, %v4263_v33  ;;  %v1147_v53 = vmul.f32 %v4280_v56, %v4194_v39 }
  0xdb   : > { %v1148_v40 = vmul.f32 %v4280_v56, %v607_v7  ;;  %v878_v59 = vadd.f32 %v846_v20, %v776_v4  ;;  %v476_v60 = vadd.f32 %v444_v44, %v375_v29  ;;  %v1248_v11 = vmul.f32 %v4285_v36, %v707_v19  ;;  %v4293_v4 = vld [vmem:[#allocation2 + $0x120] sm:$0xff] }
  0xdc   : > { %v1249_v23 = vmul.f32 %v4285_v36, %v708_v48  ;;  %v677_v58 = vadd.f32 %v645_v14, %v576_v57  ;;  %v847_v45 = vmul.f32 %v4219_v0, %v4249_v62  ;;  %v1079_v52 = vadd.f32 %v1047_v1, %v978_v30  ;;  %v4295_v20 = vld [vmem:[#allocation2 + $0x121] sm:$0xff]  ;;  %v710_v14 = vld [vmem:[#allocation2 + $0x114] sm:$0xff] }
  0xdd   : > { %v1179_v35 = vadd.f32 %v1147_v53, %v1078_v15  ;;  %v947_v39 = vmul.f32 %v4259_v25, %v4225_v50  ;;  %v577_v7 = vadd.f32 %v545_v3, %v476_v60  ;;  %v4299_v29 = vmul.f32 %v3687_v28, %v4174_v63  ;;  %v3094_v3 = vld [vmem:[#allocation2 + $0x10a] sm:$0xff] }
  0xde   : > { %v646_v19 = vmul.f32 %v4207_v6, %v609_v10  ;;  %v746_v48 = vmul.f32 %v4240_v12, %v709_v31  ;;  %v879_v44 = vadd.f32 %v847_v45, %v777_v42  ;;  %v4305_v30 = vmul.f32 %v3716_v55, %v4182_v24  ;;  %v4314_v42 = vld [vmem:[#allocation2 + $0x128] sm:$0xff] }
  0xdf   : > { %5724 = vst [vmem:[#allocation19_spill] sm:$0xff] %v4299_v29  ;;  %v979_v15 = vadd.f32 %v947_v39, %v878_v59  ;;  %v1048_v1 = vmul.f32 %v3094_v3, %v4266_v61  ;;  %v948_v57 = vmul.f32 %v4259_v25, %v4251_v32  ;;  %v376_v60 = vmul.f32 %v4166_v54, %v4293_v4  ;;  %v3095_v39 = vld [vmem:[#allocation2 + $0x122] sm:$0xff] }
  0xe0   : > { %5725 = vst [vmem:[#allocation57_spill] sm:$0xff] %v4305_v30  ;;  %v678_v53 = vadd.f32 %v646_v19, %v577_v7  ;;  %v778_v63 = vadd.f32 %v746_v48, %v677_v58  ;;  %v445_v29 = vmul.f32 %v4170_v22, %v4295_v20  ;;  %v1180_v45 = vadd.f32 %v1148_v40, %v1079_v52  ;;  %v4320_v30 = vld [vmem:[#allocation2 + $0x129] sm:$0xff]  ;;  %v3096_v58 = vld [vmem:[#allocation2 + $0x112] sm:$0xff] }
  0xe1   : > { %v4316_v24 = vadd.f32 %v1248_v11, %v1179_v35  ;;  %v747_v59 = vmul.f32 %v4240_v12, %v710_v14  ;;  %v546_v3 = vmul.f32 %v3095_v39, %v4178_v2  ;;  %v980_v7 = vadd.f32 %v948_v57, %v879_v44 }
  0xe2   : > { %v1049_v19 = vmul.f32 %v3096_v58, %v4266_v61  ;;  %v477_v48 = vadd.f32 %v445_v29, %v376_v60  ;;  %v848_v16 = vmul.f32 %v4219_v0, %v4293_v4  ;;  %v1080_v5 = vadd.f32 %v1048_v1, %v979_v15 }
  0xe3   : > { %5726 = vst [vmem:[#allocation58_spill] sm:$0xff] %v4316_v24  ;;  %v4327_v35 = vmul.f32 %v3687_v28, %v4223_v46  ;;  %v4331_v40 = vmul.f32 %v3716_v55, %v4225_v50  ;;  %v377_v11 = vmul.f32 %v4166_v54, %v4314_v42  ;;  %v779_v52 = vadd.f32 %v747_v59, %v678_v53  ;;  %v711_v50 = vld [vmem:[#allocation2 + $0x124] sm:$0xff] }
  0xe4   : > { %v578_v44 = vadd.f32 %v546_v3, %v477_v48  ;;  %v880_v57 = vadd.f32 %v848_v16, %v778_v63  ;;  %v446_v29 = vmul.f32 %v4170_v22, %v4320_v30  ;;  %v4337_v60 = vadd.f32 %v1249_v23, %v1180_v45 }
  0xe5   : > { %5727 = vst [vmem:[#allocation59_spill] sm:$0xff] %v4327_v35  ;;  %5728 = vst [vmem:[#allocation60_spill] sm:$0xff] %v4331_v40  ;;  %v1149_v15 = vmul.f32 %v4280_v56, %v4263_v33  ;;  %v547_v28 = vmul.f32 %v4178_v2, %v3817_v38  ;;  %v647_v46 = vmul.f32 %v4207_v6, %v610_v27  ;;  %v611_v33 = vld [vmem:[#allocation2 + $0x12b] sm:$0xff]  ;;  %v410_v40 = vld [vmem:[#allocation2 + $0x139] sm:$0xff] }
  0xe6   : > { %5729 = vst [vmem:[#allocation61_spill] sm:$0xff] %v4337_v60  ;;  %v1081_v1 = vadd.f32 %v1049_v19, %v980_v7  ;;  %v949_v53 = vmul.f32 %v4259_v25, %v4295_v20  ;;  %v478_v59 = vadd.f32 %v446_v29, %v377_v11  ;;  %v849_v16 = vmul.f32 %v4219_v0, %v4314_v42  ;;  %v341_v19 = vld [vmem:[#allocation2 + $0x138] sm:$0xff]  ;;  %v4353_v29 = vld [vmem:[#allocation6 + $0xa] ss:$0 sm:$0xff] }
  0xe7   : > { %v1150_v23 = vmul.f32 %v4280_v56, %v609_v10  ;;  %v1181_v63 = vadd.f32 %v1149_v15, %v1080_v5  ;;  %v1250_v45 = vmul.f32 %v4285_v36, %v709_v31  ;;  %v679_v3 = vadd.f32 %v647_v46, %v578_v44  ;;  %v3107_v35 = vld [vmem:[#allocation2 + $0x52] sm:$0xff] }
  0xe8   : > { %v981_v58 = vadd.f32 %v949_v53, %v880_v57  ;;  %v1050_v48 = vmul.f32 %v3095_v39, %v4266_v61  ;;  %v748_v60 = vmul.f32 %v4240_v12, %v711_v50  ;;  %v881_v7 = vadd.f32 %v849_v16, %v779_v52  ;;  %v4372_v53 = vld [vmem:[#allocation2 + $0x141] sm:$0xff]  ;;  %v4383_v16 = vld [vmem:[#allocation6 + $0xb] ss:$0 sm:$0xff] }
  0xe9   : > { %v1251_v11 = vmul.f32 %v4285_v36, %v710_v14  ;;  %v4357_v10 = vmul.f32 %v4353_v29, %v4249_v62  ;;  %v579_v5 = vadd.f32 %v547_v28, %v478_v59  ;;  %v950_v31 = vmul.f32 %v4259_v25, %v4320_v30  ;;  %v4370_v28 = vld [vmem:[#allocation2 + $0x140] sm:$0xff] }
  0xea   : > { %v1182_v44 = vadd.f32 %v1150_v23, %v1081_v1  ;;  %v4363_v39 = vmul.f32 %v3716_v55, %v4251_v32  ;;  %v648_v52 = vmul.f32 %v4207_v6, %v611_v33  ;;  %v780_v57 = vadd.f32 %v748_v60, %v679_v3  ;;  %v712_v55 = vld [vmem:[#allocation2 + $0x12c] sm:$0xff] }
  0xeb   : > { %5730 = vst [vmem:[#allocation62_spill] sm:$0xff] %v4357_v10  ;;  %v982_v15 = vadd.f32 %v950_v31, %v881_v7  ;;  %v1051_v14 = vmul.f32 %v4266_v61, %v3817_v38  ;;  %v378_v46 = vmul.f32 %v4166_v54, %v341_v19  ;;  %v447_v62 = vmul.f32 %v4170_v22, %v410_v40 }
  0xec   : > { %5731 = vst [vmem:[#allocation63_spill] sm:$0xff] %v4363_v39  ;;  %v4374_v1 = vadd.f32 %v1250_v45, %v1181_v63  ;;  %v1082_v59 = vadd.f32 %v1050_v48, %v981_v58  ;;  %v548_v32 = vmul.f32 %v4178_v2, %v3832_v18  ;;  %v850_v60 = vmul.f32 %v4219_v0, %v341_v19 }
  0xed   : > { %v4381_v38 = vmul.f32 %v4353_v29, %v4293_v4  ;;  %v4387_v23 = vmul.f32 %v4383_v16, %v4295_v20  ;;  %v680_v3 = vadd.f32 %v648_v52, %v579_v5  ;;  %v479_v63 = vadd.f32 %v447_v62, %v378_v46  ;;  %v613_v46 = vld [vmem:[#allocation2 + $0x143] sm:$0xff] }
  0xee   : > { %5732 = vst [vmem:[#allocation64_spill] sm:$0xff] %v4374_v1  ;;  %v1151_v45 = vmul.f32 %v4280_v56, %v610_v27  ;;  %v882_v58 = vadd.f32 %v850_v60, %v780_v57  ;;  %v379_v48 = vmul.f32 %v4166_v54, %v4370_v28  ;;  %v448_v7 = vmul.f32 %v4170_v22, %v4372_v53 }
  0xef   : > { %5733 = vst [vmem:[#allocation65_spill] sm:$0xff] %v4381_v38  ;;  %5734 = vst [vmem:[#allocation66_spill] sm:$0xff] %v4387_v23  ;;  %v4394_v31 = vadd.f32 %v1251_v11, %v1182_v44  ;;  %v749_v4 = vmul.f32 %v4240_v12, %v712_v55  ;;  %v1083_v38 = vadd.f32 %v1051_v14, %v982_v15  ;;  %v612_v23 = vld [vmem:[#allocation2 + $0x13b] sm:$0xff] }
  0xf0   : > { %v549_v20 = vmul.f32 %v4178_v2, %v3835_v21  ;;  %v1183_v5 = vadd.f32 %v1151_v45, %v1082_v59  ;;  %v580_v52 = vadd.f32 %v548_v32, %v479_v63  ;;  %v951_v27 = vmul.f32 %v4259_v25, %v410_v40  ;;  %v4406_v59 = vld [vmem:[#allocation2 + $0x150] sm:$0xff] }
  0xf1   : > { %5735 = vst [vmem:[#allocation67_spill] sm:$0xff] %v4394_v31  ;;  %v480_v57 = vadd.f32 %v448_v7, %v379_v48  ;;  %v781_v62 = vadd.f32 %v749_v4, %v680_v3  ;;  %v1152_v60 = vmul.f32 %v4280_v56, %v611_v33  ;;  %v1252_v1 = vmul.f32 %v4285_v36, %v711_v50  ;;  %v4408_v32 = vld [vmem:[#allocation2 + $0x151] sm:$0xff]  ;;  %v714_v48 = vld [vmem:[#allocation2 + $0x144] sm:$0xff] }
  0xf2   : > { %v1253_v11 = vmul.f32 %v4285_v36, %v712_v55  ;;  %v983_v44 = vadd.f32 %v951_v27, %v882_v58  ;;  %v1052_v15 = vmul.f32 %v4266_v61, %v3832_v18  ;;  %v649_v31 = vmul.f32 %v4207_v6, %v612_v23  ;;  %v713_v55 = vld [vmem:[#allocation2 + $0x13c] sm:$0xff] }
  0xf3   : > { %v581_v14 = vadd.f32 %v549_v20, %v480_v57  ;;  %v1184_v63 = vadd.f32 %v1152_v60, %v1083_v38  ;;  %v4412_v3 = vmul.f32 %v4353_v29, %v4314_v42  ;;  %v4416_v50 = vmul.f32 %v4383_v16, %v4320_v30 }
  0xf4   : > { %v650_v33 = vmul.f32 %v4207_v6, %v613_v46  ;;  %v4419_v18 = vadd.f32 %v1252_v1, %v1183_v5  ;;  %v4422_v45 = vmul.f32 %v4353_v29, %v341_v19  ;;  %v681_v58 = vadd.f32 %v649_v31, %v580_v52  ;;  %v4433_v1 = vld [vmem:[#allocation2 + $0x158] sm:$0xff] }
  0xf5   : > { %5736 = vst [vmem:[#allocation68_spill] sm:$0xff] %v4412_v3  ;;  %5737 = vst [vmem:[#allocation69_spill] sm:$0xff] %v4416_v50  ;;  %v851_v38 = vmul.f32 %v4219_v0, %v4370_v28  ;;  %v4427_v42 = vmul.f32 %v4383_v16, %v410_v40  ;;  %v380_v30 = vmul.f32 %v4166_v54, %v4406_v59  ;;  %v4438_v52 = vld [vmem:[#allocation2 + $0x159] sm:$0xff] }
  0xf6   : > { %5738 = vst [vmem:[#allocation70_spill] sm:$0xff] %v4419_v18  ;;  %5739 = vst [vmem:[#allocation71_spill] sm:$0xff] %v4422_v45  ;;  %v682_v7 = vadd.f32 %v650_v33, %v581_v14  ;;  %v449_v4 = vmul.f32 %v4170_v22, %v4408_v32  ;;  %v1084_v20 = vadd.f32 %v1052_v15, %v983_v44  ;;  %v4445_v14 = vld [vmem:[#allocation2 + $0x153] sm:$0xff] }
  0xf7   : > { %5740 = vst [vmem:[#allocation72_spill] sm:$0xff] %v4427_v42  ;;  %v750_v19 = vmul.f32 %v4240_v12, %v713_v55  ;;  %v883_v31 = vadd.f32 %v851_v38, %v781_v62  ;;  %v550_v5 = vmul.f32 %v4178_v2, %v3838_v43  ;;  %v4440_v40 = vadd.f32 %v1253_v11, %v1184_v63 }
  0xf8   : > { %v751_v27 = vmul.f32 %v4240_v12, %v714_v48  ;;  %v952_v57 = vmul.f32 %v4259_v25, %v4372_v53  ;;  %v481_v60 = vadd.f32 %v449_v4, %v380_v30  ;;  %v1053_v44 = vmul.f32 %v4266_v61, %v3835_v21  ;;  %v4456_v30 = vld [vmem:[#allocation2 + $0x154] sm:$0xff] }
  0xf9   : > { %5741 = vst [vmem:[#allocation73_spill] sm:$0xff] %v4440_v40  ;;  %v782_v33 = vadd.f32 %v750_v19, %v681_v58  ;;  %v1153_v62 = vmul.f32 %v4280_v56, %v612_v23  ;;  %v381_v15 = vmul.f32 %v4166_v54, %v4433_v1  ;;  %v450_v63 = vmul.f32 %v4170_v22, %v4438_v52  ;;  %v4459_v21 = vld [vmem:[#allocation2 + $0x15b] sm:$0xff] }
  0xfa   : > { %v783_v38 = vadd.f32 %v751_v27, %v682_v7  ;;  %v582_v11 = vadd.f32 %v550_v5, %v481_v60  ;;  %v551_v40 = vmul.f32 %v4178_v2, %v3850_v49  ;;  %v984_v4 = vadd.f32 %v952_v57, %v883_v31 }
  0xfb   : > { %v1154_v58 = vmul.f32 %v4280_v56, %v613_v46  ;;  %v1185_v19 = vadd.f32 %v1153_v62, %v1084_v20  ;;  %v651_v23 = vmul.f32 %v4207_v6, %v4445_v14  ;;  %v1254_v7 = vmul.f32 %v4285_v36, %v713_v55 }
  0xfc   : > { %v852_v5 = vmul.f32 %v4219_v0, %v4406_v59  ;;  %v482_v27 = vadd.f32 %v450_v63, %v381_v15  ;;  %v853_v49 = vmul.f32 %v4219_v0, %v4433_v1  ;;  %v1255_v60 = vmul.f32 %v4285_v36, %v714_v48  ;;  %v4477_v15 = vld [vmem:[#allocation2 + $0x168] sm:$0xff] }
  0xfd   : > { %v4471_v46 = vmul.f32 %v4353_v29, %v4370_v28  ;;  %v683_v20 = vadd.f32 %v651_v23, %v582_v11  ;;  %v752_v31 = vmul.f32 %v4240_v12, %v4456_v30  ;;  %v652_v55 = vmul.f32 %v4207_v6, %v4459_v21  ;;  %v4479_v63 = vld [vmem:[#allocation2 + $0x169] sm:$0xff]  ;;  %v716_v11 = vld [vmem:[#allocation2 + $0x15c] sm:$0xff] }
  0xfe   : > { %v884_v57 = vadd.f32 %v852_v5, %v782_v33  ;;  %v583_v62 = vadd.f32 %v551_v40, %v482_v27  ;;  %v885_v42 = vadd.f32 %v853_v49, %v783_v38  ;;  %v1085_v45 = vadd.f32 %v1053_v44, %v984_v4  ;;  %v4503_v27 = vld [vmem:[#allocation2 + $0x171] sm:$0xff] }
  0xff   : > { %5742 = vst [vmem:[#allocation74_spill] sm:$0xff] %v4471_v46  ;;  %v4481_v48 = vadd.f32 %v1254_v7, %v1185_v19  ;;  %v4485_v28 = vmul.f32 %v4383_v16, %v4372_v53  ;;  %v784_v23 = vadd.f32 %v752_v31, %v683_v20  ;;  %v953_v40 = vmul.f32 %v4259_v25, %v4408_v32  ;;  %v4501_v7 = vld [vmem:[#allocation2 + $0x170] sm:$0xff]  ;;  %v3099_v31 = vld [vmem:[#allocation2 + $0x15a] sm:$0xff] }
 0x100   : > { %v1054_v33 = vmul.f32 %v4266_v61, %v3838_v43  ;;  %v684_v38 = vadd.f32 %v652_v55, %v583_v62  ;;  %v954_v5 = vmul.f32 %v4259_v25, %v4438_v52  ;;  %v382_v44 = vmul.f32 %v4166_v54, %v4477_v15  ;;  %v616_v55 = vld [vmem:[#allocation2 + $0x16b] sm:$0xff] }
 0x101   : > { %5743 = vst [vmem:[#allocation75_spill] sm:$0xff] %v4481_v48  ;;  %5744 = vst [vmem:[#allocation76_spill] sm:$0xff] %v4485_v28  ;;  %v451_v4 = vmul.f32 %v4170_v22, %v4479_v63  ;;  %v552_v53 = vmul.f32 %v4178_v2, %v3853_v8  ;;  %v854_v19 = vmul.f32 %v4219_v0, %v4477_v15 }
 0x102   : > { %v985_v43 = vadd.f32 %v953_v40, %v884_v57  ;;  %v753_v49 = vmul.f32 %v4240_v12, %v716_v11  ;;  %v986_v20 = vadd.f32 %v954_v5, %v885_v42  ;;  %v1055_v62 = vmul.f32 %v3099_v31, %v4266_v61  ;;  %v717_v40 = vld [vmem:[#allocation2 + $0x16c] sm:$0xff] }
 0x103   : > { %v4509_v48 = vmul.f32 %v4353_v29, %v4406_v59  ;;  %v4513_v8 = vmul.f32 %v4383_v16, %v4408_v32  ;;  %v483_v28 = vadd.f32 %v451_v4, %v382_v44  ;;  %v886_v46 = vadd.f32 %v854_v19, %v784_v23  ;;  %v3100_v31 = vld [vmem:[#allocation2 + $0x172] sm:$0xff] }
 0x104   : > { %v1186_v18 = vadd.f32 %v1154_v58, %v1085_v45  ;;  %v785_v50 = vadd.f32 %v753_v49, %v684_v38  ;;  %v383_v57 = vmul.f32 %v4166_v54, %v4501_v7  ;;  %v452_v42 = vmul.f32 %v4170_v22, %v4503_v27  ;;  %v617_v32 = vld [vmem:[#allocation2 + $0x173] sm:$0xff]  ;;  %v3101_v58 = vld [vmem:[#allocation2 + $0x16a] sm:$0xff] }
 0x105   : > { %5745 = vst [vmem:[#allocation77_spill] sm:$0xff] %v4509_v48  ;;  %5746 = vst [vmem:[#allocation78_spill] sm:$0xff] %v4513_v8  ;;  %v584_v5 = vadd.f32 %v552_v53, %v483_v28  ;;  %v955_v59 = vmul.f32 %v4259_v25, %v4479_v63  ;;  %v553_v48 = vmul.f32 %v3100_v31, %v4178_v2  ;;  %v718_v22 = vld [vmem:[#allocation2 + $0x174] sm:$0xff] }
 0x106   : > { %v653_v44 = vmul.f32 %v4207_v6, %v616_v55  ;;  %v1086_v23 = vadd.f32 %v1054_v33, %v985_v43  ;;  %v1087_v45 = vadd.f32 %v1055_v62, %v986_v20  ;;  %v1056_v38 = vmul.f32 %v3101_v58, %v4266_v61  ;;  %v819_v20 = vld [vmem:[#allocation2 + $0x180] sm:$0xff] }
 0x107   : > { %v484_v54 = vadd.f32 %v452_v42, %v383_v57  ;;  %v987_v4 = vadd.f32 %v955_v59, %v886_v46  ;;  %v754_v28 = vmul.f32 %v4240_v12, %v717_v40  ;;  %v855_v53 = vmul.f32 %v4219_v0, %v4501_v7 }
 0x108   : > { %v685_v19 = vadd.f32 %v653_v44, %v584_v5  ;;  %v1155_v2 = vmul.f32 %v4280_v56, %v4445_v14  ;;  %v1156_v49 = vmul.f32 %v4280_v56, %v4459_v21  ;;  %v654_v43 = vmul.f32 %v4207_v6, %v617_v32  ;;  %v4537_v14 = vld [vmem:[#allocation2 + $0x188] sm:$0xff] }
 0x109   : > { %v585_v33 = vadd.f32 %v553_v48, %v484_v54  ;;  %v4532_v62 = vadd.f32 %v1255_v60, %v1186_v18  ;;  %v887_v57 = vadd.f32 %v855_v53, %v785_v50  ;;  %v956_v42 = vmul.f32 %v4259_v25, %v4503_v27 }
 0x10a   : > { %v786_v46 = vadd.f32 %v754_v28, %v685_v19  ;;  %v1187_v5 = vadd.f32 %v1155_v2, %v1086_v23  ;;  %v1188_v59 = vadd.f32 %v1156_v49, %v1087_v45  ;;  %v755_v58 = vmul.f32 %v4240_v12, %v718_v22  ;;  %v920_v45 = vld [vmem:[#allocation2 + $0x181] sm:$0xff]  ;;  %v4568_v2 = vld [vmem:[#allocation6 + $0xc] ss:$0 sm:$0xff] }
 0x10b   : > { %5747 = vst [vmem:[#allocation79_spill] sm:$0xff] %v4532_v62  ;;  %v686_v44 = vadd.f32 %v654_v43, %v585_v33  ;;  %v1088_v8 = vadd.f32 %v1056_v38, %v987_v4  ;;  %v988_v21 = vadd.f32 %v956_v42, %v887_v57  ;;  %v1057_v48 = vmul.f32 %v3100_v31, %v4266_v61  ;;  %v921_v4 = vld [vmem:[#allocation2 + $0x189] sm:$0xff] }
 0x10c   : > { %v856_v6 = vmul.f32 %v4219_v0, %v819_v20  ;;  %v1256_v18 = vmul.f32 %v4285_v36, %v4456_v30  ;;  %v1257_v50 = vmul.f32 %v4285_v36, %v716_v11  ;;  %v4546_v60 = vmul.f32 %v4353_v29, %v4433_v1  ;;  %v1122_v42 = vld [vmem:[#allocation2 + $0x183] sm:$0xff] }
 0x10d   : > { %v787_v23 = vadd.f32 %v755_v58, %v686_v44  ;;  %v4550_v12 = vmul.f32 %v4383_v16, %v4438_v52  ;;  %v1157_v38 = vmul.f32 %v4280_v56, %v616_v55  ;;  %v857_v54 = vmul.f32 %v4219_v0, %v4537_v14  ;;  %v5756_v44 = vld [vmem:[#allocation20_spill] sm:$0xff]  ;;  %v3104_v58 = vld [vmem:[#allocation2 + $0x32] sm:$0xff] }
 0x10e   : > { %5748 = vst [vmem:[#allocation80_spill] sm:$0xff] %v4546_v60  ;;  %v888_v31 = vadd.f32 %v856_v6, %v786_v46  ;;  %v4555_v30 = vadd.f32 %v1256_v18, %v1187_v5  ;;  %v4557_v11 = vadd.f32 %v1257_v50, %v1188_v59  ;;  %v4561_v1 = vmul.f32 %v4353_v29, %v4477_v15  ;;  %v3102_v46 = vld [vmem:[#allocation2 + $0x182] sm:$0xff]  ;;  %v3103_v59 = vld [vmem:[#allocation2 + $0x18a] sm:$0xff] }
 0x10f   : > { %5749 = vst [vmem:[#allocation81_spill] sm:$0xff] %v4550_v12  ;;  %v4565_v19 = vmul.f32 %v4383_v16, %v4479_v63  ;;  %v1089_v52 = vadd.f32 %v1057_v48, %v988_v21  ;;  %v1189_v28 = vadd.f32 %v1157_v38, %v1088_v8  ;;  %v957_v55 = vmul.f32 %v4259_v25, %v920_v45  ;;  %v1223_v5 = vld [vmem:[#allocation2 + $0x184] sm:$0xff]  ;;  %v4587_v48 = vld [vmem:[#allocation6 + $0xd] ss:$0 sm:$0xff]  ;;  %v1698_v38 = vld [vmem:[#allocation2 + $0x34] sm:$0xff] }
 0x110   : > { %5750 = vst [vmem:[#allocation82_spill] sm:$0xff] %v4555_v30  ;;  %5751 = vst [vmem:[#allocation83_spill] sm:$0xff] %v4557_v11  ;;  %v889_v53 = vadd.f32 %v857_v54, %v787_v23  ;;  %v1158_v0 = vmul.f32 %v4280_v56, %v617_v32  ;;  %v1258_v49 = vmul.f32 %v4285_v36, %v717_v40  ;;  %v1123_v32 = vld [vmem:[#allocation2 + $0x18b] sm:$0xff] }
 0x111   : > { %5752 = vst [vmem:[#allocation84_spill] sm:$0xff] %v4561_v1  ;;  %5753 = vst [vmem:[#allocation85_spill] sm:$0xff] %v4565_v19  ;;  %v1259_v33 = vmul.f32 %v4285_v36, %v718_v22  ;;  %v958_v15 = vmul.f32 %v4259_v25, %v921_v4  ;;  %v4576_v43 = vmul.f32 %v4353_v29, %v4501_v7  ;;  %v1224_v25 = vld [vmem:[#allocation2 + $0x18c] sm:$0xff]  ;;  %v5769_v1 = vld [vmem:[#allocation23_spill] sm:$0xff] }
 0x112   : > { %v4580_v63 = vmul.f32 %v4383_v16, %v4503_v27  ;;  %v989_v8 = vadd.f32 %v957_v55, %v888_v31  ;;  %v1058_v57 = vmul.f32 %v3102_v46, %v4266_v61  ;;  %v1059_v22 = vmul.f32 %v3103_v59, %v4266_v61  ;;  %v1597_v27 = vld [vmem:[#allocation2 + $0x33] sm:$0xff]  ;;  %v4597_v31 = vld [vmem:[#allocation6 + $0xe] ss:$0 sm:$0xff] }
 0x113   : > { %5754 = vst [vmem:[#allocation86_spill] sm:$0xff] %v4576_v43  ;;  %v990_v40 = vadd.f32 %v958_v15, %v889_v53  ;;  %v1363_v7 = vadd.f32 %v5756_v44, %v3731_v51  ;;  %v1533_v21 = vmul.f32 %v3104_v58, %v4568_v2  ;;  %v1190_v6 = vadd.f32 %v1158_v0, %v1089_v52  ;;  %v1324_v61 = vld [vmem:[#allocation2 + $0x198] sm:$0xff]  ;;  %v4605_v0 = vld [vmem:[#allocation6 + $0xf] ss:$0 sm:$0xff]  ;;  %v4641_v58 = vld [vmem:[#allocation2 + $0x60] sm:$0xff] }
 0x114   : > { %5755 = vst [vmem:[#allocation87_spill] sm:$0xff] %v4580_v63  ;;  %v4589_v18 = vadd.f32 %v1258_v49, %v1189_v28  ;;  %v4592_v50 = vmul.f32 %v4353_v29, %v819_v20  ;;  %v4595_v23 = vmul.f32 %v4383_v16, %v920_v45  ;;  %v1159_v51 = vmul.f32 %v4280_v56, %v1122_v42  ;;  %v1425_v52 = vld [vmem:[#allocation2 + $0x199] sm:$0xff]  ;;  %v1800_v20 = vld [vmem:[#allocation2 + $0x48] sm:$0xff] }
 0x115   : > { %v1160_v54 = vmul.f32 %v4280_v56, %v1123_v32  ;;  %v4602_v55 = vmul.f32 %v4285_v36, %v1223_v5  ;;  %v1325_v28 = vld [vmem:[#allocation2 + $0x1a0] sm:$0xff]  ;;  %v1464_v53 = vadd.f32 %v3727_v34, %v1363_v7  ;;  %v1901_v45 = vld [vmem:[#allocation2 + $0x49] sm:$0xff]  ;;  %v1090_v49 = vadd.f32 %v1058_v57, %v989_v8 }
 0x116   : > { %5757 = vst [vmem:[#allocation20_spill] sm:$0xff] %v4589_v18  ;;  %5758 = vst [vmem:[#allocation88_spill] sm:$0xff] %v4592_v50  ;;  %v4608_v15 = vmul.f32 %v4285_v36, %v1224_v25  ;;  %v4612_v46 = vmul.f32 %v4353_v29, %v4537_v14  ;;  %v4615_v56 = vmul.f32 %v4383_v16, %v921_v4  ;;  %v1426_v42 = vld [vmem:[#allocation2 + $0x1a1] sm:$0xff]  ;;  %v4617_v32 = vld [vmem:[#allocation6 + $0x10] ss:$0 sm:$0xff] }
 0x117   : > { %5759 = vst [vmem:[#allocation89_spill] sm:$0xff] %v4595_v23  ;;  %v2002_v5 = vld [vmem:[#allocation2 + $0x4a] sm:$0xff]  ;;  %v1091_v34 = vadd.f32 %v1059_v22, %v990_v40  ;;  %v4620_v59 = vmul.f32 %v4353_v29, %v1324_v61  ;;  %v1565_v44 = vadd.f32 %v1533_v21, %v1464_v53  ;;  %v1634_v8 = vmul.f32 %v4587_v48, %v1597_v27  ;;  %v4627_v14 = vld [vmem:[#allocation6 + $0x12] ss:$0 sm:$0xff]  ;;  %v4639_v22 = vld [vmem:[#allocation6 + $0x13] ss:$0 sm:$0xff] }
 0x118   : > { %5760 = vst [vmem:[#allocation90_spill] sm:$0xff] %v4612_v46  ;;  %5761 = vst [vmem:[#allocation91_spill] sm:$0xff] %v4615_v56  ;;  %v4623_v36 = vld [vmem:[#allocation6 + $0x11] ss:$0 sm:$0xff]  ;;  %v4629_v25 = vadd.f32 %v1259_v33, %v1190_v6  ;;  %v4632_v4 = vmul.f32 %v4383_v16, %v1425_v52  ;;  %v4635_v7 = vmul.f32 %v4353_v29, %v1325_v28  ;;  %v4649_v61 = vld [vmem:[#allocation6 + $0x14] ss:$0 sm:$0xff] }
 0x119   : > { %5762 = vst [vmem:[#allocation92_spill] sm:$0xff] %v4620_v59  ;;  %v4625_v57 = vld [vmem:[#allocation2 + $0x4b] sm:$0xff]  ;;  %v1364_v21 = vadd.f32 %v3754_v13, %v3738_v47  ;;  %v4646_v27 = vmul.f32 %v4383_v16, %v1426_v42  ;;  %v1666_v33 = vadd.f32 %v1634_v8, %v1565_v44  ;;  %v1735_v6 = vmul.f32 %v4597_v31, %v1698_v38  ;;  %v4651_v52 = vld [vmem:[#allocation2 + $0x61] sm:$0xff]  ;;  %v4658_v13 = vld [vmem:[#allocation6 + $0x15] ss:$0 sm:$0xff] }
 0x11a   : > { %5763 = vst [vmem:[#allocation93_spill] sm:$0xff] %v4629_v25  ;;  %5764 = vst [vmem:[#allocation94_spill] sm:$0xff] %v4632_v4  ;;  %v4637_v40 = vld [vmem:[#allocation2 + $0x4c] sm:$0xff]  ;;  %v3105_v29 = vld [vmem:[#allocation2 + $0x3a] sm:$0xff]  ;;  %v1837_v4 = vmul.f32 %v4605_v0, %v1800_v20  ;;  %v1938_v47 = vmul.f32 %v4617_v32, %v1901_v45  ;;  %v4665_v44 = vadd.f32 %v1160_v54, %v1091_v34 }
 0x11b   : > { %5765 = vst [vmem:[#allocation95_spill] sm:$0xff] %v4635_v7  ;;  %5766 = vst [vmem:[#allocation96_spill] sm:$0xff] %v4646_v27  ;;  %v1534_v28 = vmul.f32 %v3105_v29, %v4568_v2  ;;  %v1598_v53 = vld [vmem:[#allocation2 + $0x3b] sm:$0xff]  ;;  %v4654_v7 = vadd.f32 %v1159_v51, %v1090_v49  ;;  %v4662_v42 = vld [vmem:[#allocation6 + $0x16] ss:$0 sm:$0xff]  ;;  %v1465_v38 = vadd.f32 %v3758_v17, %v1364_v21 }
 0x11c   : > { %v4660_v16 = vld [vmem:[#allocation2 + $0x62] sm:$0xff]  ;;  %v1767_v8 = vadd.f32 %v1735_v6, %v1666_v33  ;;  %v2039_v29 = vmul.f32 %v4623_v36, %v2002_v5  ;;  %v2140_v51 = vmul.f32 %v4627_v14, %v4625_v57  ;;  %v4672_v20 = vld [vmem:[#allocation6 + $0x17] ss:$0 sm:$0xff]  ;;  %v2241_v27 = vmul.f32 %v4639_v22, %v4637_v40  ;;  %v4680_v54 = vld [vmem:[#allocation6 + $0x18] ss:$0 sm:$0xff] }
 0x11d   : > { %v4670_v49 = vld [vmem:[#allocation2 + $0x63] sm:$0xff]  ;;  %v2343_v59 = vmul.f32 %v4649_v61, %v4641_v58  ;;  %v1566_v34 = vadd.f32 %v1534_v28, %v1465_v38  ;;  %v1635_v5 = vmul.f32 %v4587_v48, %v1598_v53  ;;  %v1801_v21 = vld [vmem:[#allocation2 + $0x50] sm:$0xff]  ;;  %v2444_v6 = vmul.f32 %v4658_v13, %v4651_v52 }
 0x11e   : > { %v1699_v45 = vld [vmem:[#allocation2 + $0x3c] sm:$0xff]  ;;  %v4678_v17 = vld [vmem:[#allocation2 + $0x64] sm:$0xff]  ;;  %v1869_v33 = vadd.f32 %v1837_v4, %v1767_v8  ;;  %v1902_v56 = vld [vmem:[#allocation2 + $0x51] sm:$0xff]  ;;  %v4690_v11 = vmul.f32 %v4662_v42, %v4660_v16  ;;  %v4694_v28 = vmul.f32 %v4672_v20, %v4670_v49  ;;  %v1737_v10 = vmul.f32 %v4597_v31, %v4637_v40 }
 0x11f   : > { %v2003_v46 = vld [vmem:[#allocation2 + $0x52] sm:$0xff]  ;;  %v5767_v23 = vld [vmem:[#allocation21_spill] sm:$0xff]  ;;  %v1667_v4 = vadd.f32 %v1635_v5, %v1566_v34  ;;  %v1736_v53 = vmul.f32 %v4597_v31, %v1699_v45  ;;  %v4699_v19 = vmul.f32 %v4680_v54, %v4678_v17  ;;  %v1939_v60 = vmul.f32 %v4617_v32, %v1902_v56 }
 0x120   : > { %v2104_v25 = vld [vmem:[#allocation2 + $0x53] sm:$0xff]  ;;  %v3106_v63 = vld [vmem:[#allocation2 + $0x4a] sm:$0xff]  ;;  %v1970_v8 = vadd.f32 %v1938_v47, %v1869_v33  ;;  %v2040_v62 = vmul.f32 %v4623_v36, %v2003_v46  ;;  %v5770_v46 = vld [vmem:[#allocation24_spill] sm:$0xff]  ;;  %v1839_v40 = vmul.f32 %v4605_v0, %v4641_v58  ;;  %v2243_v58 = vmul.f32 %v4639_v22, %v4678_v17 }
 0x121   : > { %v5768_v50 = vld [vmem:[#allocation22_spill] sm:$0xff]  ;;  %v1535_v43 = vmul.f32 %v3106_v63, %v4568_v2  ;;  %v2307_v63 = vld [vmem:[#allocation2 + $0x68] sm:$0xff]  ;;  %v1768_v12 = vadd.f32 %v1736_v53, %v1667_v4  ;;  %v2141_v34 = vmul.f32 %v4627_v14, %v2104_v25 }
 0x122   : > { %v1365_v18 = vadd.f32 %v5768_v50, %v5767_v23  ;;  %v2205_v38 = vld [vmem:[#allocation2 + $0x54] sm:$0xff]  ;;  %v1838_v50 = vmul.f32 %v4605_v0, %v1801_v21  ;;  %v2408_v23 = vld [vmem:[#allocation2 + $0x69] sm:$0xff]  ;;  %v2071_v45 = vadd.f32 %v2039_v29, %v1970_v8  ;;  %v1636_v21 = vmul.f32 %v4587_v48, %v4625_v57 }
 0x123   : > { %v2242_v47 = vmul.f32 %v4639_v22, %v2205_v38  ;;  %v4707_v5 = vld [vmem:[#allocation2 + $0x6a] sm:$0xff] }
 0x124   : > { %v1466_v30 = vadd.f32 %v5769_v1, %v1365_v18  ;;  %v4709_v33 = vld [vmem:[#allocation2 + $0x6b] sm:$0xff]  ;;  %v1870_v39 = vadd.f32 %v1838_v50, %v1768_v12  ;;  %v2344_v1 = vmul.f32 %v4649_v61, %v2307_v63  ;;  %v2445_v18 = vmul.f32 %v4658_v13, %v2408_v23  ;;  %v5772_v50 = vld [vmem:[#allocation27_spill] sm:$0xff] }
 0x125   : > { %v4715_v56 = vld [vmem:[#allocation2 + $0x6c] sm:$0xff]  ;;  %v2172_v53 = vadd.f32 %v2140_v51, %v2071_v45  ;;  %v2546_v12 = vmul.f32 %v4662_v42, %v4707_v5  ;;  %v2647_v57 = vmul.f32 %v4672_v20, %v4709_v33 }
 0x126   : > { %v1567_v3 = vadd.f32 %v1535_v43, %v1466_v30  ;;  %v5771_v4 = vld [vmem:[#allocation25_spill] sm:$0xff]  ;;  %v1536_v30 = vmul.f32 %v3107_v35, %v4568_v2  ;;  %v1971_v43 = vadd.f32 %v1939_v60, %v1870_v39  ;;  %v4729_v51 = vmul.f32 %v4680_v54, %v4715_v56  ;;  %v2308_v39 = vld [vmem:[#allocation2 + $0x78] sm:$0xff] }
 0x127   : > { %v1366_v29 = vadd.f32 %v5771_v4, %v5770_v46  ;;  %v2273_v9 = vadd.f32 %v2241_v27, %v2172_v53  ;;  %v1940_v35 = vmul.f32 %v4617_v32, %v4651_v52  ;;  %v2041_v27 = vmul.f32 %v4623_v36, %v4660_v16 }
 0x128   : > { %v1668_v8 = vadd.f32 %v1636_v21, %v1567_v3  ;;  %v2072_v45 = vadd.f32 %v2040_v62, %v1971_v43  ;;  %v1637_v21 = vmul.f32 %v4587_v48, %v2104_v25  ;;  %v2409_v62 = vld [vmem:[#allocation2 + $0x79] sm:$0xff]  ;;  %v1738_v52 = vmul.f32 %v4597_v31, %v2205_v38 }
 0x129   : > { %v1467_v24 = vadd.f32 %v5772_v50, %v1366_v29  ;;  %v2375_v46 = vadd.f32 %v2343_v59, %v2273_v9  ;;  %v2142_v29 = vmul.f32 %v4627_v14, %v4670_v49  ;;  %v2345_v25 = vmul.f32 %v4649_v61, %v2308_v39  ;;  %v2510_v9 = vld [vmem:[#allocation2 + $0x7a] sm:$0xff]  ;;  %v5773_v59 = vld [vmem:[#allocation26_spill] sm:$0xff] }
 0x12a   : > { %v1769_v3 = vadd.f32 %v1737_v10, %v1668_v8  ;;  %v2173_v10 = vadd.f32 %v2141_v34, %v2072_v45  ;;  %v3108_v34 = vld [vmem:[#allocation2 + $0x62] sm:$0xff]  ;;  %v2446_v38 = vmul.f32 %v4658_v13, %v2409_v62 }
 0x12b   : > { %v1568_v60 = vadd.f32 %v1536_v30, %v1467_v24  ;;  %v2476_v8 = vadd.f32 %v2444_v6, %v2375_v46  ;;  %v5774_v30 = vld [vmem:[#allocation29_spill] sm:$0xff]  ;;  %v4750_v6 = vld [vmem:[#allocation2 + $0x7b] sm:$0xff] }
 0x12c   : > { %v1871_v4 = vadd.f32 %v1839_v40, %v1769_v3  ;;  %v1367_v43 = vadd.f32 %v5774_v30, %v5773_v59  ;;  %v2274_v16 = vadd.f32 %v2242_v47, %v2173_v10  ;;  %v1840_v3 = vmul.f32 %v4605_v0, %v2307_v63 }
 0x12d   : > { %v1669_v53 = vadd.f32 %v1637_v21, %v1568_v60  ;;  %v1537_v40 = vmul.f32 %v3108_v34, %v4568_v2  ;;  %v2577_v45 = vadd.f32 %v4690_v11, %v2476_v8  ;;  %v1941_v47 = vmul.f32 %v4617_v32, %v2408_v23 }
 0x12e   : > { %v1972_v24 = vadd.f32 %v1940_v35, %v1871_v4  ;;  %v5775_v35 = vld [vmem:[#allocation30_spill] sm:$0xff]  ;;  %v2376_v46 = vadd.f32 %v2344_v1, %v2274_v16  ;;  %v2547_v4 = vmul.f32 %v4662_v42, %v2510_v9  ;;  %v1638_v11 = vmul.f32 %v4587_v48, %v4670_v49 }
 0x12f   : > { %v1770_v50 = vadd.f32 %v1738_v52, %v1669_v53  ;;  %v1468_v21 = vadd.f32 %v5775_v35, %v1367_v43  ;;  %v2678_v63 = vadd.f32 %v4694_v28, %v2577_v45  ;;  %v4756_v53 = vld [vmem:[#allocation2 + $0x7c] sm:$0xff]  ;;  %v2648_v8 = vmul.f32 %v4672_v20, %v4750_v6 }
 0x130   : > { %v2073_v60 = vadd.f32 %v2041_v27, %v1972_v24  ;;  %v4763_v27 = vld [vmem:[%s5634_s2] ss:$0 sm:$0xff]  ;;  %v2477_v1 = vadd.f32 %v2445_v18, %v2376_v46  ;;  %v2042_v28 = vmul.f32 %v4623_v36, %v4707_v5  ;;  %v1739_v49 = vmul.f32 %v4597_v31, %v4678_v17  ;;  %v5777_v35 = vld [vmem:[#allocation31_spill] sm:$0xff] }
 0x131   : > { %v1872_v59 = vadd.f32 %v1840_v3, %v1770_v50  ;;  %v1569_v52 = vadd.f32 %v1537_v40, %v1468_v21  ;;  %v2779_v23 = vadd.f32 %v4699_v19, %v2678_v63  ;;  %v2749_v16 = vmul.f32 %v4680_v54, %v4756_v53  ;;  %v2309_v5 = vld [vmem:[#allocation2 + $0x80] sm:$0xff] }
 0x132   : > { %v2174_v10 = vadd.f32 %v2142_v29, %v2073_v60  ;;  %v2578_v43 = vadd.f32 %v2546_v12, %v2477_v1  ;;  %v2143_v50 = vmul.f32 %v4627_v14, %v4709_v33  ;;  %v1841_v19 = vmul.f32 %v4605_v0, %v2308_v39  ;;  %v2410_v12 = vld [vmem:[#allocation2 + $0x81] sm:$0xff] }
 0x133   : > { %v1973_v24 = vadd.f32 %v1941_v47, %v1872_v59  ;;  %v1670_v30 = vadd.f32 %v1638_v11, %v1569_v52  ;;  %v2817_v3 = vadd.f32 %v4763_v27, %v2779_v23  ;;  %v2244_v17 = vmul.f32 %v4639_v22, %v4715_v56  ;;  %v5776_v60 = vld [vmem:[#allocation28_spill] sm:$0xff]  ;;  %v3109_v47 = vld [vmem:[#allocation2 + $0x6a] sm:$0xff] }
 0x134   : > { %v2275_v29 = vadd.f32 %v2243_v58, %v2174_v10  ;;  %v2679_v58 = vadd.f32 %v2647_v57, %v2578_v43  ;;  %v1368_v21 = vadd.f32 %v5777_v35, %v5776_v60  ;;  %v1942_v59 = vmul.f32 %v4617_v32, %v2409_v62  ;;  %v2511_v52 = vld [vmem:[#allocation2 + $0x82] sm:$0xff]  ;;  %v2411_v35 = vld [vmem:[#allocation2 + $0x91] sm:$0xff] }
 0x135   : > { %v2074_v18 = vadd.f32 %v2042_v28, %v1973_v24  ;;  %v1771_v40 = vadd.f32 %v1739_v49, %v1670_v30  ;;  %2849 = vst [vmem:[%s4784_s8] sm:$0xff] %v2817_v3  ;;  %v1538_v57 = vmul.f32 %v3109_v47, %v4568_v2  ;;  %v2346_v10 = vmul.f32 %v4649_v61, %v2309_v5  ;;  %v5778_v11 = vld [vmem:[#allocation32_spill] sm:$0xff] }
 0x136   : > { %v2377_v34 = vadd.f32 %v2345_v25, %v2275_v29  ;;  %v2780_v39 = vadd.f32 %v4729_v51, %v2679_v58  ;;  %v1469_v1 = vadd.f32 %v5778_v11, %v1368_v21  ;;  %v2447_v28 = vmul.f32 %v4658_v13, %v2410_v12  ;;  %v4793_v23 = vld [vmem:[#allocation2 + $0x83] sm:$0xff] }
 0x137   : > { %v2175_v45 = vadd.f32 %v2143_v50, %v2074_v18  ;;  %v1873_v25 = vadd.f32 %v1841_v19, %v1771_v40  ;;  %v2043_v62 = vmul.f32 %v4623_v36, %v2510_v9  ;;  %v4797_v49 = vld [vmem:[#allocation2 + $0x84] sm:$0xff]  ;;  %v1639_v43 = vmul.f32 %v4587_v48, %v4709_v33  ;;  %v2310_v40 = vld [vmem:[#allocation2 + $0x90] sm:$0xff] }
 0x138   : > { %v2478_v46 = vadd.f32 %v2446_v38, %v2377_v34  ;;  %v2818_v29 = vadd.f32 %v4763_v27, %v2780_v39  ;;  %v1570_v51 = vadd.f32 %v1538_v57, %v1469_v1  ;;  %v2548_v50 = vmul.f32 %v4662_v42, %v2511_v52  ;;  %v3110_v57 = vld [vmem:[#allocation2 + $0x7a] sm:$0xff] }
 0x139   : > { %v2276_v63 = vadd.f32 %v2244_v17, %v2175_v45  ;;  %v1974_v38 = vadd.f32 %v1942_v59, %v1873_v25  ;;  %v2144_v3 = vmul.f32 %v4627_v14, %v4750_v6  ;;  %v2649_v9 = vmul.f32 %v4672_v20, %v4793_v23  ;;  %v5779_v25 = vld [vmem:[#allocation33_spill] sm:$0xff] }
 0x13a   : > { %v2579_v24 = vadd.f32 %v2547_v4, %v2478_v46  ;;  %2850 = vst [vmem:[%s4784_s8 + $0x8] sm:$0xff] %v2818_v29  ;;  %v1671_v19 = vadd.f32 %v1639_v43, %v1570_v51  ;;  %v1740_v58 = vmul.f32 %v4597_v31, %v4715_v56  ;;  %v2750_v33 = vmul.f32 %v4680_v54, %v4797_v49  ;;  %v4828_v29 = vld [vmem:[#allocation2 + $0x93] sm:$0xff] }
 0x13b   : > { %v2378_v30 = vadd.f32 %v2346_v10, %v2276_v63  ;;  %v2075_v4 = vadd.f32 %v2043_v62, %v1974_v38  ;;  %v2245_v17 = vmul.f32 %v4639_v22, %v4756_v53  ;;  %v1842_v46 = vmul.f32 %v4605_v0, %v2309_v5  ;;  %v2512_v10 = vld [vmem:[#allocation2 + $0x92] sm:$0xff] }
 0x13c   : > { %v2680_v18 = vadd.f32 %v2648_v8, %v2579_v24  ;;  %v1772_v21 = vadd.f32 %v1740_v58, %v1671_v19  ;;  %v1369_v59 = vadd.f32 %v5779_v25, %v3932_v26  ;;  %v1539_v39 = vmul.f32 %v3110_v57, %v4568_v2  ;;  %v5780_v19 = vld [vmem:[#allocation34_spill] sm:$0xff]  ;;  %v4860_v57 = vld [vmem:[#allocation2 + $0x9c] sm:$0xff] }
 0x13d   : > { %v2479_v34 = vadd.f32 %v2447_v28, %v2378_v30  ;;  %v2176_v8 = vadd.f32 %v2144_v3, %v2075_v4  ;;  %v1943_v1 = vmul.f32 %v4617_v32, %v2410_v12  ;;  %v4823_v5 = vadd.f32 %v4602_v55, %v4654_v7  ;;  %v2311_v4 = vld [vmem:[#allocation2 + $0x98] sm:$0xff] }
 0x13e   : > { %v2781_v45 = vadd.f32 %v2749_v16, %v2680_v18  ;;  %v2347_v16 = vmul.f32 %v4649_v61, %v2310_v40  ;;  %v1874_v11 = vadd.f32 %v1842_v46, %v1772_v21  ;;  %v1470_v24 = vadd.f32 %v3956_v41, %v1369_v59  ;;  %v4840_v18 = vld [vmem:[#allocation2 + $0x94] sm:$0xff] }
 0x13f   : > { %v2580_v60 = vadd.f32 %v2548_v50, %v2479_v34  ;;  %v2277_v56 = vadd.f32 %v2245_v17, %v2176_v8  ;;  %v2448_v28 = vmul.f32 %v4658_v13, %v2411_v35  ;;  %v2044_v38 = vmul.f32 %v4623_v36, %v2511_v52  ;;  %v4856_v59 = vld [vmem:[#allocation2 + $0x9b] sm:$0xff] }
 0x140   : > { %v2819_v47 = vadd.f32 %v4763_v27, %v2781_v45  ;;  %v1975_v30 = vadd.f32 %v1943_v1, %v1874_v11  ;;  %v1571_v51 = vadd.f32 %v1539_v39, %v1470_v24  ;;  %v1640_v12 = vmul.f32 %v4587_v48, %v4750_v6 }
 0x141   : > { %v2681_v63 = vadd.f32 %v2649_v9, %v2580_v60  ;;  %v2379_v26 = vadd.f32 %v2347_v16, %v2277_v56  ;;  %v4834_v41 = vadd.f32 %v4608_v15, %v4665_v44  ;;  %v2549_v7 = vmul.f32 %v4662_v42, %v2512_v10  ;;  %v2412_v9 = vld [vmem:[#allocation2 + $0x99] sm:$0xff]  ;;  %v3111_v60 = vld [vmem:[#allocation2 + $0x82] sm:$0xff] }
 0x142   : > { %2851 = vst [vmem:[%s4784_s8 + $0x10] sm:$0xff] %v2819_v47  ;;  %v2145_v43 = vmul.f32 %v4627_v14, %v4793_v23  ;;  %v2076_v50 = vadd.f32 %v2044_v38, %v1975_v30  ;;  %v1672_v3 = vadd.f32 %v1640_v12, %v1571_v51  ;;  %v1741_v6 = vmul.f32 %v4597_v31, %v4756_v53  ;;  %v5781_v47 = vld [vmem:[#allocation36_spill] sm:$0xff]  ;;  %v2312_v51 = vld [vmem:[#allocation2 + $0xa8] sm:$0xff] }
 0x143   : > { %v2782_v62 = vadd.f32 %v2750_v33, %v2681_v63  ;;  %v2480_v55 = vadd.f32 %v2448_v28, %v2379_v26  ;;  %v2650_v15 = vmul.f32 %v4672_v20, %v4828_v29  ;;  %v2246_v44 = vmul.f32 %v4639_v22, %v4797_v49  ;;  %v2513_v33 = vld [vmem:[#allocation2 + $0x9a] sm:$0xff] }
 0x144   : > { %v1370_v58 = vadd.f32 %v3973_v37, %v5780_v19  ;;  %v2177_v45 = vadd.f32 %v2145_v43, %v2076_v50  ;;  %v1773_v8 = vadd.f32 %v1741_v6, %v1672_v3  ;;  %v1843_v17 = vmul.f32 %v4605_v0, %v2310_v40  ;;  %v2514_v50 = vld [vmem:[#allocation2 + $0xaa] sm:$0xff]  ;;  %v5782_v3 = vld [vmem:[#allocation35_spill] sm:$0xff] }
 0x145   : > { %v2820_v52 = vadd.f32 %v4763_v27, %v2782_v62  ;;  %v2581_v34 = vadd.f32 %v2549_v7, %v2480_v55  ;;  %v1540_v53 = vmul.f32 %v3111_v60, %v4568_v2  ;;  %v2751_v46 = vmul.f32 %v4680_v54, %v4840_v18  ;;  %v5783_v6 = vld [vmem:[#allocation38_spill] sm:$0xff] }
 0x146   : > { %v2348_v25 = vmul.f32 %v4649_v61, %v2311_v4  ;;  %v1471_v56 = vadd.f32 %v5781_v47, %v1370_v58  ;;  %v2278_v37 = vadd.f32 %v2246_v44, %v2177_v45  ;;  %v2449_v16 = vmul.f32 %v4658_v13, %v2412_v9  ;;  %v3112_v19 = vld [vmem:[#allocation2 + $0x92] sm:$0xff] }
 0x147   : > { %2852 = vst [vmem:[%s4784_s8 + $0x18] sm:$0xff] %v2820_v52  ;;  %v2682_v21 = vadd.f32 %v2650_v15, %v2581_v34  ;;  %v1875_v39 = vadd.f32 %v1843_v17, %v1773_v8  ;;  %v1944_v40 = vmul.f32 %v4617_v32, %v2411_v35  ;;  %v2550_v11 = vmul.f32 %v4662_v42, %v2513_v33  ;;  %v2413_v52 = vld [vmem:[#allocation2 + $0xa9] sm:$0xff] }
 0x148   : > { %v1572_v1 = vadd.f32 %v1540_v53, %v1471_v56  ;;  %v1641_v24 = vmul.f32 %v4587_v48, %v4793_v23  ;;  %v2380_v26 = vadd.f32 %v2348_v25, %v2278_v37  ;;  %v2651_v28 = vmul.f32 %v4672_v20, %v4856_v59  ;;  %v4884_v17 = vld [vmem:[#allocation2 + $0xab] sm:$0xff]  ;;  %v5784_v53 = vld [vmem:[#allocation39_spill] sm:$0xff] }
 0x149   : > { %v2783_v63 = vadd.f32 %v2751_v46, %v2682_v21  ;;  %v1976_v38 = vadd.f32 %v1944_v40, %v1875_v39  ;;  %v2045_v62 = vmul.f32 %v4623_v36, %v2512_v10  ;;  %v2752_v35 = vmul.f32 %v4680_v54, %v4860_v57  ;;  %v4886_v60 = vld [vmem:[#allocation2 + $0xac] sm:$0xff] }
 0x14a   : > { %v1673_v12 = vadd.f32 %v1641_v24, %v1572_v1  ;;  %v1742_v55 = vmul.f32 %v4597_v31, %v4797_v49  ;;  %v2481_v7 = vadd.f32 %v2449_v16, %v2380_v26  ;;  %v2146_v43 = vmul.f32 %v4627_v14, %v4828_v29 }
 0x14b   : > { %v2821_v30 = vadd.f32 %v4763_v27, %v2783_v63  ;;  %v2077_v23 = vadd.f32 %v2045_v62, %v1976_v38  ;;  %v1371_v10 = vadd.f32 %v5783_v6, %v5782_v3  ;;  %v2247_v34 = vmul.f32 %v4639_v22, %v4840_v18  ;;  %v2313_v38 = vld [vmem:[#allocation2 + $0xb0] sm:$0xff] }
 0x14c   : > { %v1774_v15 = vadd.f32 %v1742_v55, %v1673_v12  ;;  %v1844_v44 = vmul.f32 %v4605_v0, %v2311_v4  ;;  %v1541_v49 = vmul.f32 %v3112_v19, %v4568_v2  ;;  %v2582_v58 = vadd.f32 %v2550_v11, %v2481_v7  ;;  %v5785_v12 = vld [vmem:[#allocation37_spill] sm:$0xff]  ;;  %v5786_v55 = vld [vmem:[#allocation40_spill] sm:$0xff]  ;;  %v2515_v3 = vld [vmem:[#allocation2 + $0xb2] sm:$0xff] }
 0x14d   : > { %2853 = vst [vmem:[%s4784_s8 + $0x20] sm:$0xff] %v2821_v30  ;;  %v2178_v45 = vadd.f32 %v2146_v43, %v2077_v23  ;;  %v2349_v8 = vmul.f32 %v4649_v61, %v2312_v51  ;;  %v1472_v21 = vadd.f32 %v5784_v53, %v1371_v10  ;;  %v2450_v46 = vmul.f32 %v4658_v13, %v2413_v52  ;;  %v2414_v30 = vld [vmem:[#allocation2 + $0xb1] sm:$0xff]  ;;  %v3113_v23 = vld [vmem:[#allocation2 + $0x9a] sm:$0xff]  ;;  %v5787_v19 = vld [vmem:[#allocation41_spill] sm:$0xff] }
 0x14e   : > { %v2551_v25 = vmul.f32 %v4662_v42, %v2514_v50  ;;  %v1876_v47 = vadd.f32 %v1844_v44, %v1774_v15  ;;  %v1945_v4 = vmul.f32 %v4617_v32, %v2412_v9  ;;  %v2683_v56 = vadd.f32 %v2651_v28, %v2582_v58  ;;  %v4911_v44 = vld [vmem:[#allocation2 + $0xb3] sm:$0xff] }
 0x14f   : > { %v2279_v37 = vadd.f32 %v2247_v34, %v2178_v45  ;;  %v1573_v16 = vadd.f32 %v1541_v49, %v1472_v21  ;;  %v1642_v39 = vmul.f32 %v4587_v48, %v4828_v29  ;;  %v2652_v40 = vmul.f32 %v4672_v20, %v4884_v17 }
 0x150   : > { %v2753_v63 = vmul.f32 %v4680_v54, %v4886_v60  ;;  %v1977_v11 = vadd.f32 %v1945_v4, %v1876_v47  ;;  %v2046_v1 = vmul.f32 %v4623_v36, %v2513_v33  ;;  %v2784_v24 = vadd.f32 %v2752_v35, %v2683_v56 }
 0x151   : > { %v2381_v26 = vadd.f32 %v2349_v8, %v2279_v37  ;;  %v1674_v62 = vadd.f32 %v1642_v39, %v1573_v16  ;;  %v1743_v9 = vmul.f32 %v4597_v31, %v4840_v18  ;;  %v2147_v29 = vmul.f32 %v4627_v14, %v4856_v59  ;;  %v4916_v8 = vld [vmem:[#allocation2 + $0xb4] sm:$0xff] }
 0x152   : > { %v2078_v28 = vadd.f32 %v2046_v1, %v1977_v11  ;;  %v1372_v7 = vadd.f32 %v5786_v55, %v5785_v12  ;;  %v1542_v43 = vmul.f32 %v3113_v23, %v4568_v2  ;;  %v2822_v33 = vadd.f32 %v4763_v27, %v2784_v24 }
 0x153   : > { %v2482_v35 = vadd.f32 %v2450_v46, %v2381_v26  ;;  %v1775_v6 = vadd.f32 %v1743_v9, %v1674_v62  ;;  %v1845_v10 = vmul.f32 %v4605_v0, %v2312_v51  ;;  %v2248_v34 = vmul.f32 %v4639_v22, %v4860_v57  ;;  %v5788_v62 = vld [vmem:[#allocation42_spill] sm:$0xff]  ;;  %v5789_v9 = vld [vmem:[#allocation12_spill] sm:$0xff] }
 0x154   : > { %v2179_v18 = vadd.f32 %v2147_v29, %v2078_v28  ;;  %v2350_v15 = vmul.f32 %v4649_v61, %v2313_v38  ;;  %v1473_v49 = vadd.f32 %v5787_v19, %v1372_v7  ;;  %2854 = vst [vmem:[%s4784_s8 + $0x28] sm:$0xff] %v2822_v33  ;;  %v2451_v45 = vmul.f32 %v4658_v13, %v2414_v30  ;;  %v3114_v7 = vld [vmem:[#allocation2 + $0xaa] sm:$0xff]  ;;  %v2516_v33 = vld [vmem:[#allocation2 + $0xc2] sm:$0xff] }
 0x155   : > { %v2583_v58 = vadd.f32 %v2551_v25, %v2482_v35  ;;  %v1877_v53 = vadd.f32 %v1845_v10, %v1775_v6  ;;  %v1946_v21 = vmul.f32 %v4617_v32, %v2413_v52  ;;  %v2552_v46 = vmul.f32 %v4662_v42, %v2515_v3  ;;  %v5790_v35 = vld [vmem:[#allocation43_spill] sm:$0xff] }
 0x156   : > { %v2280_v51 = vadd.f32 %v2248_v34, %v2179_v18  ;;  %v1574_v47 = vadd.f32 %v1542_v43, %v1473_v49  ;;  %v1643_v4 = vmul.f32 %v4587_v48, %v4856_v59  ;;  %v2653_v37 = vmul.f32 %v4672_v20, %v4911_v44  ;;  %v4940_v34 = vld [vmem:[#allocation2 + $0xc3] sm:$0xff] }
 0x157   : > { %v2684_v56 = vadd.f32 %v2652_v40, %v2583_v58  ;;  %v1978_v16 = vadd.f32 %v1946_v21, %v1877_v53  ;;  %v2047_v25 = vmul.f32 %v4623_v36, %v2514_v50  ;;  %v2754_v11 = vmul.f32 %v4680_v54, %v4916_v8  ;;  %v2314_v40 = vld [vmem:[#allocation2 + $0xc0] sm:$0xff] }
 0x158   : > { %v2382_v39 = vadd.f32 %v2350_v15, %v2280_v51  ;;  %v1675_v1 = vadd.f32 %v1643_v4, %v1574_v47  ;;  %v1744_v52 = vmul.f32 %v4597_v31, %v4860_v57  ;;  %v2148_v59 = vmul.f32 %v4627_v14, %v4884_v17  ;;  %v2415_v50 = vld [vmem:[#allocation2 + $0xc1] sm:$0xff] }
 0x159   : > { %v2785_v24 = vadd.f32 %v2753_v63, %v2684_v56  ;;  %v2079_v26 = vadd.f32 %v2047_v25, %v1978_v16  ;;  %v1373_v28 = vadd.f32 %v5789_v9, %v5788_v62  ;;  %v1846_v55 = vmul.f32 %v4605_v0, %v2313_v38  ;;  %v4951_v56 = vld [vmem:[#allocation2 + $0xc4] sm:$0xff]  ;;  %v3115_v9 = vld [vmem:[#allocation2 + $0xb2] sm:$0xff] }
 0x15a   : > { %v2483_v29 = vadd.f32 %v2451_v45, %v2382_v39  ;;  %v1776_v12 = vadd.f32 %v1744_v52, %v1675_v1  ;;  %v1543_v23 = vmul.f32 %v3114_v7, %v4568_v2  ;;  %v2249_v43 = vmul.f32 %v4639_v22, %v4886_v60  ;;  %v2315_v52 = vld [vmem:[#allocation2 + $0xc8] sm:$0xff] }
 0x15b   : > { %v2823_v57 = vadd.f32 %v4763_v27, %v2785_v24  ;;  %v2180_v63 = vadd.f32 %v2148_v59, %v2079_v26  ;;  %v1474_v6 = vadd.f32 %v5790_v35, %v1373_v28  ;;  %v2351_v18 = vmul.f32 %v4649_v61, %v2314_v40  ;;  %v5791_v26 = vld [vmem:[#allocation13_spill] sm:$0xff]  ;;  %v5792_v59 = vld [vmem:[#allocation44_spill] sm:$0xff] }
 0x15c   : > { %v2584_v10 = vadd.f32 %v2552_v46, %v2483_v29  ;;  %v1878_v15 = vadd.f32 %v1846_v55, %v1776_v12  ;;  %v1947_v38 = vmul.f32 %v4617_v32, %v2414_v30  ;;  %v2452_v49 = vmul.f32 %v4658_v13, %v2415_v50  ;;  %v2517_v55 = vld [vmem:[#allocation2 + $0xca] sm:$0xff] }
 0x15d   : > { %2855 = vst [vmem:[%s4784_s8 + $0x30] sm:$0xff] %v2823_v57  ;;  %v2281_v19 = vadd.f32 %v2249_v43, %v2180_v63  ;;  %v1575_v58 = vadd.f32 %v1543_v23, %v1474_v6  ;;  %v1644_v45 = vmul.f32 %v4587_v48, %v4884_v17  ;;  %v2553_v21 = vmul.f32 %v4662_v42, %v2516_v33  ;;  %v4966_v7 = vld [vmem:[#allocation2 + $0xcb] sm:$0xff] }
 0x15e   : > { %v2685_v53 = vadd.f32 %v2653_v37, %v2584_v10  ;;  %v1979_v51 = vadd.f32 %v1947_v38, %v1878_v15  ;;  %v2048_v46 = vmul.f32 %v4623_v36, %v2515_v3  ;;  %v2654_v4 = vmul.f32 %v4672_v20, %v4940_v34  ;;  %v2416_v3 = vld [vmem:[#allocation2 + $0xc9] sm:$0xff] }
 0x15f   : > { %v2383_v47 = vadd.f32 %v2351_v18, %v2281_v19  ;;  %v1676_v30 = vadd.f32 %v1644_v45, %v1575_v58  ;;  %v1745_v16 = vmul.f32 %v4597_v31, %v4886_v60  ;;  %v2149_v17 = vmul.f32 %v4627_v14, %v4911_v44  ;;  %v5793_v63 = vld [vmem:[#allocation46_spill] sm:$0xff] }
 0x160   : > { %v2786_v25 = vadd.f32 %v2754_v11, %v2685_v53  ;;  %v2080_v39 = vadd.f32 %v2048_v46, %v1979_v51  ;;  %v1847_v37 = vmul.f32 %v4605_v0, %v2314_v40  ;;  %v1374_v62 = vadd.f32 %v5792_v59, %v5791_v26  ;;  %v4981_v51 = vld [vmem:[#allocation2 + $0xcc] sm:$0xff]  ;;  %v2518_v59 = vld [vmem:[#allocation2 + $0xda] sm:$0xff] }
 0x161   : > { %v2484_v1 = vadd.f32 %v2452_v49, %v2383_v47  ;;  %v1777_v24 = vadd.f32 %v1745_v16, %v1676_v30  ;;  %v1544_v28 = vmul.f32 %v3115_v9, %v4568_v2  ;;  %v2755_v11 = vmul.f32 %v4680_v54, %v4951_v56  ;;  %v2417_v16 = vld [vmem:[#allocation2 + $0xd9] sm:$0xff] }
 0x162   : > { %v2824_v60 = vadd.f32 %v4763_v27, %v2786_v25  ;;  %v2181_v29 = vadd.f32 %v2149_v17, %v2080_v39  ;;  %v2250_v40 = vmul.f32 %v4639_v22, %v4916_v8  ;;  %v1948_v57 = vmul.f32 %v4617_v32, %v2415_v50  ;;  %v5794_v25 = vld [vmem:[#allocation45_spill] sm:$0xff]  ;;  %v5795_v39 = vld [vmem:[#allocation47_spill] sm:$0xff] }
 0x163   : > { %v2585_v12 = vadd.f32 %v2553_v21, %v2484_v1  ;;  %v1879_v23 = vadd.f32 %v1847_v37, %v1777_v24  ;;  %v1475_v43 = vadd.f32 %v5793_v63, %v1374_v62  ;;  %v2352_v6 = vmul.f32 %v4649_v61, %v2315_v52  ;;  %v3116_v37 = vld [vmem:[#allocation2 + $0xc2] sm:$0xff] }
 0x164   : > { %2856 = vst [vmem:[%s4784_s8 + $0x38] sm:$0xff] %v2824_v60  ;;  %v2282_v35 = vadd.f32 %v2250_v40, %v2181_v29  ;;  %v2453_v10 = vmul.f32 %v4658_v13, %v2416_v3  ;;  %v2049_v18 = vmul.f32 %v4623_v36, %v2516_v33  ;;  %v1645_v49 = vmul.f32 %v4587_v48, %v4911_v44  ;;  %v2316_v33 = vld [vmem:[#allocation2 + $0xd8] sm:$0xff]  ;;  %v5796_v29 = vld [vmem:[#allocation48_spill] sm:$0xff] }
 0x165   : > { %v2686_v15 = vadd.f32 %v2654_v4, %v2585_v12  ;;  %v1980_v38 = vadd.f32 %v1948_v57, %v1879_v23  ;;  %v1576_v19 = vadd.f32 %v1544_v28, %v1475_v43  ;;  %v2554_v45 = vmul.f32 %v4662_v42, %v2517_v55  ;;  %v5000_v57 = vld [vmem:[#allocation2 + $0xdc] sm:$0xff] }
 0x166   : > { %v2384_v58 = vadd.f32 %v2352_v6, %v2282_v35  ;;  %v2655_v50 = vmul.f32 %v4672_v20, %v4966_v7  ;;  %v2150_v53 = vmul.f32 %v4627_v14, %v4940_v34  ;;  %v1746_v4 = vmul.f32 %v4597_v31, %v4916_v8 }
 0x167   : > { %v2787_v21 = vadd.f32 %v2755_v11, %v2686_v15  ;;  %v2081_v46 = vadd.f32 %v2049_v18, %v1980_v38  ;;  %v1677_v47 = vadd.f32 %v1645_v49, %v1576_v19  ;;  %v2251_v44 = vmul.f32 %v4639_v22, %v4951_v56  ;;  %v4995_v11 = vld [vmem:[#allocation2 + $0xdb] sm:$0xff] }
 0x168   : > { %v2485_v30 = vadd.f32 %v2453_v10, %v2384_v58  ;;  %v1375_v17 = vadd.f32 %v5795_v39, %v5794_v25  ;;  %v1545_v1 = vmul.f32 %v3116_v37, %v4568_v2  ;;  %v1848_v9 = vmul.f32 %v4605_v0, %v2315_v52  ;;  %v3117_v39 = vld [vmem:[#allocation2 + $0xca] sm:$0xff] }
 0x169   : > { %v2825_v24 = vadd.f32 %v4763_v27, %v2787_v21  ;;  %v2182_v26 = vadd.f32 %v2150_v53, %v2081_v46  ;;  %v1778_v62 = vadd.f32 %v1746_v4, %v1677_v47  ;;  %v2756_v28 = vmul.f32 %v4680_v54, %v4981_v51  ;;  %v2317_v21 = vld [vmem:[#allocation2 + $0xe0] sm:$0xff]  ;;  %v5797_v47 = vld [vmem:[#allocation14_spill] sm:$0xff]  ;;  %v5798_v4 = vld [vmem:[#allocation15_spill] sm:$0xff] }
 0x16a   : > { %v2586_v8 = vadd.f32 %v2554_v45, %v2485_v30  ;;  %v2353_v60 = vmul.f32 %v4649_v61, %v2316_v33  ;;  %v1476_v40 = vadd.f32 %v5796_v29, %v1375_v17  ;;  %v2454_v23 = vmul.f32 %v4658_v13, %v2417_v16  ;;  %v2418_v46 = vld [vmem:[#allocation2 + $0xe1] sm:$0xff] }
 0x16b   : > { %2857 = vst [vmem:[%s4784_s8 + $0x40] sm:$0xff] %v2825_v24  ;;  %v2283_v12 = vadd.f32 %v2251_v44, %v2182_v26  ;;  %v1880_v63 = vadd.f32 %v1848_v9, %v1778_v62  ;;  %v1949_v43 = vmul.f32 %v4617_v32, %v2416_v3  ;;  %v2555_v35 = vmul.f32 %v4662_v42, %v2518_v59  ;;  %v2519_v24 = vld [vmem:[#allocation2 + $0xe2] sm:$0xff] }
 0x16c   : > { %v2687_v52 = vadd.f32 %v2655_v50, %v2586_v8  ;;  %v1577_v6 = vadd.f32 %v1545_v1, %v1476_v40  ;;  %v1646_v10 = vmul.f32 %v4587_v48, %v4940_v34  ;;  %v2656_v15 = vmul.f32 %v4672_v20, %v4995_v11  ;;  %v5022_v26 = vld [vmem:[#allocation2 + $0xe3] sm:$0xff] }
 0x16d   : > { %v2385_v18 = vadd.f32 %v2353_v60, %v2283_v12  ;;  %v1981_v38 = vadd.f32 %v1949_v43, %v1880_v63  ;;  %v2050_v19 = vmul.f32 %v4623_v36, %v2517_v55  ;;  %v2757_v58 = vmul.f32 %v4680_v54, %v5000_v57  ;;  %v5799_v62 = vld [vmem:[#allocation49_spill] sm:$0xff] }
 0x16e   : > { %v2788_v49 = vadd.f32 %v2756_v28, %v2687_v52  ;;  %v1678_v45 = vadd.f32 %v1646_v10, %v1577_v6  ;;  %v1747_v3 = vmul.f32 %v4597_v31, %v4951_v56  ;;  %v2151_v34 = vmul.f32 %v4627_v14, %v4966_v7 }
 0x16f   : > { %v2486_v50 = vadd.f32 %v2454_v23, %v2385_v18  ;;  %v2082_v53 = vadd.f32 %v2050_v19, %v1981_v38  ;;  %v1376_v30 = vadd.f32 %v5798_v4, %v5797_v47  ;;  %v1849_v25 = vmul.f32 %v4605_v0, %v2316_v33  ;;  %v5035_v18 = vld [vmem:[#allocation2 + $0xe4] sm:$0xff]  ;;  %v2318_v19 = vld [vmem:[#allocation2 + $0xf0] sm:$0xff]  ;;  %v3118_v47 = vld [vmem:[#allocation2 + $0xda] sm:$0xff] }
 0x170   : > { %v2826_v55 = vadd.f32 %v4763_v27, %v2788_v49  ;;  %v1779_v44 = vadd.f32 %v1747_v3, %v1678_v45  ;;  %v1546_v17 = vmul.f32 %v3117_v39, %v4568_v2  ;;  %v2252_v1 = vmul.f32 %v4639_v22, %v4981_v51  ;;  %v5800_v45 = vld [vmem:[#allocation50_spill] sm:$0xff]  ;;  %v5801_v3 = vld [vmem:[#allocation16_spill] sm:$0xff] }
 0x171   : > { %v2587_v56 = vadd.f32 %v2555_v35, %v2486_v50  ;;  %v2183_v37 = vadd.f32 %v2151_v34, %v2082_v53  ;;  %v1477_v9 = vadd.f32 %v5799_v62, %v1376_v30  ;;  %v2354_v8 = vmul.f32 %v4649_v61, %v2317_v21  ;;  %v2419_v53 = vld [vmem:[#allocation2 + $0xf1] sm:$0xff] }
 0x172   : > { %2858 = vst [vmem:[%s4784_s8 + $0x48] sm:$0xff] %v2826_v55  ;;  %v2455_v28 = vmul.f32 %v4658_v13, %v2418_v46  ;;  %v1881_v60 = vadd.f32 %v1849_v25, %v1779_v44  ;;  %v1950_v33 = vmul.f32 %v4617_v32, %v2417_v16  ;;  %v1647_v23 = vmul.f32 %v4587_v48, %v4966_v7  ;;  %v2520_v44 = vld [vmem:[#allocation2 + $0xf2] sm:$0xff] }
 0x173   : > { %v2688_v29 = vadd.f32 %v2656_v15, %v2587_v56  ;;  %v2284_v40 = vadd.f32 %v2252_v1, %v2183_v37  ;;  %v1578_v12 = vadd.f32 %v1546_v17, %v1477_v9  ;;  %v2556_v63 = vmul.f32 %v4662_v42, %v2519_v24  ;;  %v5053_v56 = vld [vmem:[#allocation2 + $0xf3] sm:$0xff] }
 0x174   : > { %v2657_v43 = vmul.f32 %v4672_v20, %v5022_v26  ;;  %v1982_v52 = vadd.f32 %v1950_v33, %v1881_v60  ;;  %v2051_v35 = vmul.f32 %v4623_v36, %v2518_v59  ;;  %v1748_v16 = vmul.f32 %v4597_v31, %v4981_v51 }
 0x175   : > { %v2789_v6 = vadd.f32 %v2757_v58, %v2688_v29  ;;  %v2386_v10 = vadd.f32 %v2354_v8, %v2284_v40  ;;  %v1679_v38 = vadd.f32 %v1647_v23, %v1578_v12  ;;  %v2152_v7 = vmul.f32 %v4627_v14, %v4995_v11  ;;  %v5063_v23 = vld [vmem:[#allocation2 + $0xf4] sm:$0xff] }
 0x176   : > { %v2083_v15 = vadd.f32 %v2051_v35, %v1982_v52  ;;  %v1850_v49 = vmul.f32 %v4605_v0, %v2317_v21  ;;  %v1377_v50 = vadd.f32 %v5801_v3, %v5800_v45  ;;  %v1547_v4 = vmul.f32 %v3118_v47, %v4568_v2  ;;  %v5802_v21 = vld [vmem:[#allocation51_spill] sm:$0xff] }
 0x177   : > { %v2827_v59 = vadd.f32 %v4763_v27, %v2789_v6  ;;  %v2487_v58 = vadd.f32 %v2455_v28, %v2386_v10  ;;  %v1780_v34 = vadd.f32 %v1748_v16, %v1679_v38  ;;  %v2758_v51 = vmul.f32 %v4680_v54, %v5035_v18  ;;  %v2319_v6 = vld [vmem:[#allocation2 + $0xf8] sm:$0xff]  ;;  %v5803_v38 = vld [vmem:[#allocation17_spill] sm:$0xff]  ;;  %v5804_v16 = vld [vmem:[#allocation52_spill] sm:$0xff] }
 0x178   : > { %v2184_v30 = vadd.f32 %v2152_v7, %v2083_v15  ;;  %v2253_v55 = vmul.f32 %v4639_v22, %v5000_v57  ;;  %v1478_v25 = vadd.f32 %v5802_v21, %v1377_v50  ;;  %v2355_v17 = vmul.f32 %v4649_v61, %v2318_v19  ;;  %v3119_v7 = vld [vmem:[#allocation2 + $0xe2] sm:$0xff]  ;;  %v5082_v3 = vld [vmem:[#allocation2 + $0xfa] sm:$0xff] }
 0x179   : > { %2859 = vst [vmem:[%s4784_s8 + $0x50] sm:$0xff] %v2827_v59  ;;  %v2588_v39 = vadd.f32 %v2556_v63, %v2487_v58  ;;  %v1882_v37 = vadd.f32 %v1850_v49, %v1780_v34  ;;  %v1951_v1 = vmul.f32 %v4617_v32, %v2418_v46  ;;  %v2456_v62 = vmul.f32 %v4658_v13, %v2419_v53  ;;  %v5074_v49 = vld [vmem:[#allocation6 + $0xc] ss:$0 sm:$0xff]  ;;  %v5084_v50 = vld [vmem:[#allocation2 + $0xfb] sm:$0xff] }
 0x17a   : > { %v2285_v2 = vadd.f32 %v2253_v55, %v2184_v30  ;;  %v1579_v9 = vadd.f32 %v1547_v4, %v1478_v25  ;;  %v1648_v8 = vmul.f32 %v4587_v48, %v4995_v11  ;;  %v2557_v60 = vmul.f32 %v4662_v42, %v2520_v44  ;;  %v5805_v34 = vld [vmem:[#allocation53_spill] sm:$0xff] }
 0x17b   : > { %v2689_v28 = vadd.f32 %v2657_v43, %v2588_v39  ;;  %v1983_v33 = vadd.f32 %v1951_v1, %v1882_v37  ;;  %v2052_v29 = vmul.f32 %v4623_v36, %v2519_v24  ;;  %v2658_v12 = vmul.f32 %v4672_v20, %v5053_v56  ;;  %v5070_v24 = vld [vmem:[#allocation2 + $0xf9] sm:$0xff]  ;;  %v5093_v39 = vld [vmem:[#allocation6 + $0xd] ss:$0 sm:$0xff]  ;;  %v5101_v37 = vld [vmem:[#allocation6 + $0x12] ss:$0 sm:$0xff] }
 0x17c   : > { %v2387_v40 = vadd.f32 %v2355_v17, %v2285_v2  ;;  %v1680_v46 = vadd.f32 %v1648_v8, %v1579_v9  ;;  %v1749_v63 = vmul.f32 %v4597_v31, %v5000_v57  ;;  %v2153_v48 = vmul.f32 %v4627_v14, %v5022_v26  ;;  %v2320_v2 = vld [vmem:[#allocation2 + $0x108] sm:$0xff]  ;;  %v5111_v8 = vld [vmem:[#allocation6 + $0x13] ss:$0 sm:$0xff] }
 0x17d   : > { %v2790_v52 = vadd.f32 %v2758_v51, %v2689_v28  ;;  %v2084_v35 = vadd.f32 %v2052_v29, %v1983_v33  ;;  %v1851_v11 = vmul.f32 %v4605_v0, %v2318_v19  ;;  %v1378_v15 = vadd.f32 %v5804_v16, %v5803_v38  ;;  %v5107_v9 = vld [vmem:[#allocation6 + $0xe] ss:$0 sm:$0xff]  ;;  %v5807_v33 = vld [vmem:[#allocation55_spill] sm:$0xff] }
 0x17e   : > { %v2488_v43 = vadd.f32 %v2456_v62, %v2387_v40  ;;  %v1781_v10 = vadd.f32 %v1749_v63, %v1680_v46  ;;  %v1548_v31 = vmul.f32 %v5074_v49, %v3119_v7  ;;  %v2759_v14 = vmul.f32 %v4680_v54, %v5063_v23  ;;  %v2421_v28 = vld [vmem:[#allocation2 + $0x109] sm:$0xff]  ;;  %v3125_v40 = vld [vmem:[#allocation2 + $0xf2] sm:$0xff] }
 0x17f   : > { %v2828_v57 = vadd.f32 %v4763_v27, %v2790_v52  ;;  %v2185_v0 = vadd.f32 %v2153_v48, %v2084_v35  ;;  %v2254_v19 = vmul.f32 %v4639_v22, %v5035_v18  ;;  %v1952_v58 = vmul.f32 %v4617_v32, %v2419_v53  ;;  %v5119_v52 = vld [vmem:[#allocation2 + $0x10a] sm:$0xff] }
 0x180   : > { %v2589_v45 = vadd.f32 %v2557_v60, %v2488_v43  ;;  %v1883_v59 = vadd.f32 %v1851_v11, %v1781_v10  ;;  %v1479_v47 = vadd.f32 %v5805_v34, %v1378_v15  ;;  %v2356_v51 = vmul.f32 %v4649_v61, %v2319_v6  ;;  %v5806_v60 = vld [vmem:[#allocation54_spill] sm:$0xff]  ;;  %v5121_v35 = vld [vmem:[#allocation6 + $0xf] ss:$0 sm:$0xff]  ;;  %v5808_v15 = vld [vmem:[#allocation56_spill] sm:$0xff] }
 0x181   : > { %2860 = vst [vmem:[%s4784_s8 + $0x58] sm:$0xff] %v2828_v57  ;;  %v2286_v4 = vadd.f32 %v2254_v19, %v2185_v0  ;;  %v2457_v30 = vmul.f32 %v4658_v13, %v5070_v24  ;;  %v2053_v55 = vmul.f32 %v4623_v36, %v2520_v44  ;;  %v1649_v17 = vmul.f32 %v5093_v39, %v5022_v26  ;;  %v5105_v44 = vld [vmem:[#allocation2 + $0xfc] sm:$0xff]  ;;  %v5126_v10 = vld [vmem:[#allocation6 + $0x14] ss:$0 sm:$0xff]  ;;  %v5129_v16 = vld [vmem:[#allocation2 + $0x10b] sm:$0xff] }
 0x182   : > { %v2690_v22 = vadd.f32 %v2658_v12, %v2589_v45  ;;  %v1984_v21 = vadd.f32 %v1952_v58, %v1883_v59  ;;  %v1580_v25 = vadd.f32 %v1548_v31, %v1479_v47  ;;  %v2558_v53 = vmul.f32 %v4662_v42, %v5082_v3  ;;  %v5133_v57 = vld [vmem:[#allocation6 + $0x15] ss:$0 sm:$0xff]  ;;  %v5136_v0 = vld [vmem:[#allocation2 + $0x10c] sm:$0xff]  ;;  %v5142_v59 = vld [vmem:[#allocation6 + $0x16] ss:$0 sm:$0xff] }
 0x183   : > { %v2388_v32 = vadd.f32 %v2356_v51, %v2286_v4  ;;  %v2659_v61 = vmul.f32 %v4672_v20, %v5084_v50  ;;  %v2154_v36 = vmul.f32 %v5101_v37, %v5053_v56  ;;  %v1750_v26 = vmul.f32 %v5107_v9, %v5035_v18  ;;  %v5138_v19 = vld [vmem:[#allocation6 + $0x10] ss:$0 sm:$0xff]  ;;  %v5148_v51 = vld [vmem:[#allocation6 + $0x17] ss:$0 sm:$0xff] }
 0x184   : > { %v2791_v13 = vadd.f32 %v2759_v14, %v2690_v22  ;;  %v2085_v1 = vadd.f32 %v2053_v55, %v1984_v21  ;;  %v1681_v62 = vadd.f32 %v1649_v17, %v1580_v25  ;;  %v2255_v20 = vmul.f32 %v5111_v8, %v5063_v23  ;;  %v5152_v22 = vld [vmem:[#allocation6 + $0x11] ss:$0 sm:$0xff]  ;;  %v5156_v25 = vld [vmem:[#allocation6 + $0x18] ss:$0 sm:$0xff] }
 0x185   : > { %v2489_v42 = vadd.f32 %v2457_v30, %v2388_v32  ;;  %v1379_v29 = vadd.f32 %v5807_v33, %v5806_v60  ;;  %v1549_v12 = vmul.f32 %v3125_v40, %v5074_v49  ;;  %v1852_v48 = vmul.f32 %v5121_v35, %v2319_v6  ;;  %v3134_v33 = vld [vmem:[#allocation2 + $0xfa] sm:$0xff] }
 0x186   : > { %v2829_v46 = vadd.f32 %v4763_v27, %v2791_v13  ;;  %v2186_v63 = vadd.f32 %v2154_v36, %v2085_v1  ;;  %v1782_v18 = vadd.f32 %v1750_v26, %v1681_v62  ;;  %v2760_v43 = vmul.f32 %v4680_v54, %v5105_v44  ;;  %v2321_v13 = vld [vmem:[#allocation2 + $0x110] sm:$0xff] }
 0x187   : > { %v2590_v11 = vadd.f32 %v2558_v53, %v2489_v42  ;;  %v2357_v38 = vmul.f32 %v5126_v10, %v2320_v2  ;;  %v1480_v7 = vadd.f32 %v5808_v15, %v1379_v29  ;;  %v2458_v14 = vmul.f32 %v5133_v57, %v2421_v28  ;;  %v2422_v1 = vld [vmem:[#allocation2 + $0x111] sm:$0xff] }
 0x188   : > { %2861 = vst [vmem:[%s4784_s8 + $0x60] sm:$0xff] %v2829_v46  ;;  %v2287_v31 = vadd.f32 %v2255_v20, %v2186_v63  ;;  %v1884_v6 = vadd.f32 %v1852_v48, %v1782_v18  ;;  %v1953_v54 = vmul.f32 %v5138_v19, %v5070_v24  ;;  %v2559_v58 = vmul.f32 %v5142_v59, %v5119_v52  ;;  %v5809_v62 = vld [vmem:[#allocation18_spill] sm:$0xff]  ;;  %v5811_v18 = vld [vmem:[#allocation57_spill] sm:$0xff] }
 0x189   : > { %v2691_v45 = vadd.f32 %v2659_v61, %v2590_v11  ;;  %v1581_v34 = vadd.f32 %v1549_v12, %v1480_v7  ;;  %v1650_v47 = vmul.f32 %v5093_v39, %v5053_v56  ;;  %v2660_v30 = vmul.f32 %v5148_v51, %v5129_v16  ;;  %v2523_v46 = vld [vmem:[#allocation2 + $0x112] sm:$0xff] }
 0x18a   : > { %v2389_v4 = vadd.f32 %v2357_v38, %v2287_v31  ;;  %v1985_v55 = vadd.f32 %v1953_v54, %v1884_v6  ;;  %v2054_v24 = vmul.f32 %v5152_v22, %v5082_v3  ;;  %v2761_v17 = vmul.f32 %v5156_v25, %v5136_v0  ;;  %v5810_v3 = vld [vmem:[#allocation19_spill] sm:$0xff] }
 0x18b   : > { %v2792_v21 = vadd.f32 %v2760_v43, %v2691_v45  ;;  %v1682_v32 = vadd.f32 %v1650_v47, %v1581_v34  ;;  %v1751_v56 = vmul.f32 %v5107_v9, %v5063_v23  ;;  %v2155_v36 = vmul.f32 %v5101_v37, %v5084_v50  ;;  %v5171_v63 = vld [vmem:[#allocation2 + $0x113] sm:$0xff] }
 0x18c   : > { %v2490_v53 = vadd.f32 %v2458_v14, %v2389_v4  ;;  %v2086_v61 = vadd.f32 %v2054_v24, %v1985_v55  ;;  %v1380_v26 = vadd.f32 %v5810_v3, %v5809_v62  ;;  %v1853_v60 = vmul.f32 %v5121_v35, %v2320_v2  ;;  %v5185_v4 = vld [vmem:[#allocation2 + $0x114] sm:$0xff]  ;;  %v2322_v24 = vld [vmem:[#allocation2 + $0x120] sm:$0xff]  ;;  %v3135_v62 = vld [vmem:[#allocation2 + $0x10a] sm:$0xff] }
 0x18d   : > { %v2830_v42 = vadd.f32 %v4763_v27, %v2792_v21  ;;  %v1783_v20 = vadd.f32 %v1751_v56, %v1682_v32  ;;  %v1550_v29 = vmul.f32 %v3134_v33, %v5074_v49  ;;  %v2256_v12 = vmul.f32 %v5111_v8, %v5105_v44  ;;  %v5812_v32 = vld [vmem:[#allocation58_spill] sm:$0xff]  ;;  %v5813_v56 = vld [vmem:[#allocation59_spill] sm:$0xff] }
 0x18e   : > { %v2591_v23 = vadd.f32 %v2559_v58, %v2490_v53  ;;  %v2187_v40 = vadd.f32 %v2155_v36, %v2086_v61  ;;  %v1481_v48 = vadd.f32 %v5811_v18, %v1380_v26  ;;  %v2358_v11 = vmul.f32 %v5126_v10, %v2321_v13  ;;  %v2423_v61 = vld [vmem:[#allocation2 + $0x121] sm:$0xff] }
 0x18f   : > { %2862 = vst [vmem:[%s4784_s8 + $0x68] sm:$0xff] %v2830_v42  ;;  %v2459_v43 = vmul.f32 %v5133_v57, %v2422_v1  ;;  %v1885_v38 = vadd.f32 %v1853_v60, %v1783_v20  ;;  %v1954_v2 = vmul.f32 %v5138_v19, %v2421_v28  ;;  %v1651_v14 = vmul.f32 %v5093_v39, %v5084_v50  ;;  %v2524_v20 = vld [vmem:[#allocation2 + $0x122] sm:$0xff] }
 0x190   : > { %v2692_v15 = vadd.f32 %v2660_v30, %v2591_v23  ;;  %v2288_v7 = vadd.f32 %v2256_v12, %v2187_v40  ;;  %v1582_v31 = vadd.f32 %v1550_v29, %v1481_v48  ;;  %v2560_v6 = vmul.f32 %v5142_v59, %v2523_v46  ;;  %v5203_v29 = vld [vmem:[#allocation2 + $0x123] sm:$0xff] }
 0x191   : > { %v2661_v54 = vmul.f32 %v5148_v51, %v5171_v63  ;;  %v1986_v45 = vadd.f32 %v1954_v2, %v1885_v38  ;;  %v2055_v58 = vmul.f32 %v5152_v22, %v5119_v52  ;;  %v1752_v30 = vmul.f32 %v5107_v9, %v5105_v44 }
 0x192   : > { %v2793_v34 = vadd.f32 %v2761_v17, %v2692_v15  ;;  %v2390_v47 = vadd.f32 %v2358_v11, %v2288_v7  ;;  %v1683_v28 = vadd.f32 %v1651_v14, %v1582_v31  ;;  %v2156_v50 = vmul.f32 %v5101_v37, %v5129_v16  ;;  %v5213_v14 = vld [vmem:[#allocation2 + $0x124] sm:$0xff] }
 0x193   : > { %v2087_v55 = vadd.f32 %v2055_v58, %v1986_v45  ;;  %v1854_v21 = vmul.f32 %v5121_v35, %v2321_v13  ;;  %v1381_v53 = vadd.f32 %v5813_v56, %v5812_v32  ;;  %v1551_v3 = vmul.f32 %v3135_v62, %v5074_v49  ;;  %v5814_v13 = vld [vmem:[#allocation60_spill] sm:$0xff]  ;;  %v5233_v62 = vld [vmem:[#allocation2 + $0x12b] sm:$0xff] }
 0x194   : > { %v2831_v52 = vadd.f32 %v4763_v27, %v2793_v34  ;;  %v2491_v17 = vadd.f32 %v2459_v43, %v2390_v47  ;;  %v1784_v36 = vadd.f32 %v1752_v30, %v1683_v28  ;;  %v2762_v44 = vmul.f32 %v5156_v25, %v5185_v4  ;;  %v2323_v47 = vld [vmem:[#allocation2 + $0x128] sm:$0xff] }
 0x195   : > { %v2188_v26 = vadd.f32 %v2156_v50, %v2087_v55  ;;  %v2257_v42 = vmul.f32 %v5111_v8, %v5136_v0  ;;  %v1482_v60 = vadd.f32 %v5814_v13, %v1381_v53  ;;  %v2359_v27 = vmul.f32 %v5126_v10, %v2322_v24  ;;  %v5815_v30 = vld [vmem:[#allocation61_spill] sm:$0xff]  ;;  %v5816_v55 = vld [vmem:[#allocation62_spill] sm:$0xff] }
 0x196   : > { %2863 = vst [vmem:[%s4784_s8 + $0x70] sm:$0xff] %v2831_v52  ;;  %v2592_v33 = vadd.f32 %v2560_v6, %v2491_v17  ;;  %v1886_v23 = vadd.f32 %v1854_v21, %v1784_v36  ;;  %v1955_v40 = vmul.f32 %v5138_v19, %v2422_v1  ;;  %v2460_v18 = vmul.f32 %v5133_v57, %v2423_v61  ;;  %v3136_v21 = vld [vmem:[#allocation2 + $0x112] sm:$0xff]  ;;  %v2525_v36 = vld [vmem:[#allocation2 + $0x12a] sm:$0xff] }
 0x197   : > { %v2289_v12 = vadd.f32 %v2257_v42, %v2188_v26  ;;  %v1583_v48 = vadd.f32 %v1551_v3, %v1482_v60  ;;  %v1652_v11 = vmul.f32 %v5093_v39, %v5129_v16  ;;  %v2561_v38 = vmul.f32 %v5142_v59, %v2524_v20  ;;  %v5817_v26 = vld [vmem:[#allocation63_spill] sm:$0xff] }
 0x198   : > { %v2693_v43 = vadd.f32 %v2661_v54, %v2592_v33  ;;  %v1987_v2 = vadd.f32 %v1955_v40, %v1886_v23  ;;  %v2056_v15 = vmul.f32 %v5152_v22, %v2523_v46  ;;  %v2662_v31 = vmul.f32 %v5148_v51, %v5203_v29  ;;  %v2424_v46 = vld [vmem:[#allocation2 + $0x129] sm:$0xff] }
 0x199   : > { %v2391_v7 = vadd.f32 %v2359_v27, %v2289_v12  ;;  %v1684_v1 = vadd.f32 %v1652_v11, %v1583_v48  ;;  %v1753_v6 = vmul.f32 %v5107_v9, %v5136_v0  ;;  %v2157_v16 = vmul.f32 %v5101_v37, %v5171_v63  ;;  %v5226_v0 = vld [vmem:[%s5634_s2] ss:$0 sm:$0xff] }
 0x19a   : > { %v2794_v45 = vadd.f32 %v2762_v44, %v2693_v43  ;;  %v2088_v58 = vadd.f32 %v2056_v15, %v1987_v2  ;;  %v1855_v54 = vmul.f32 %v5121_v35, %v2322_v24  ;;  %v1382_v50 = vadd.f32 %v5816_v55, %v5815_v30  ;;  %v5248_v2 = vld [vmem:[#allocation2 + $0x12c] sm:$0xff]  ;;  %v2526_v55 = vld [vmem:[#allocation2 + $0x13a] sm:$0xff] }
 0x19b   : > { %v2492_v34 = vadd.f32 %v2460_v18, %v2391_v7  ;;  %v1785_v28 = vadd.f32 %v1753_v6, %v1684_v1  ;;  %v1552_v32 = vmul.f32 %v3136_v21, %v5074_v49  ;;  %v2763_v24 = vmul.f32 %v5156_v25, %v5213_v14  ;;  %v2425_v6 = vld [vmem:[#allocation2 + $0x139] sm:$0xff] }
 0x19c   : > { %v2832_v56 = vadd.f32 %v5226_v0, %v2794_v45  ;;  %v2189_v53 = vadd.f32 %v2157_v16, %v2088_v58  ;;  %v2258_v52 = vmul.f32 %v5111_v8, %v5185_v4  ;;  %v1956_v44 = vmul.f32 %v5138_v19, %v2423_v61  ;;  %v5818_v45 = vld [vmem:[#allocation64_spill] sm:$0xff]  ;;  %v5819_v58 = vld [vmem:[#allocation65_spill] sm:$0xff] }
 0x19d   : > { %v2593_v17 = vadd.f32 %v2561_v38, %v2492_v34  ;;  %v1887_v3 = vadd.f32 %v1855_v54, %v1785_v28  ;;  %v1483_v42 = vadd.f32 %v5817_v26, %v1382_v50  ;;  %v2360_v60 = vmul.f32 %v5126_v10, %v2323_v47  ;;  %v3138_v54 = vld [vmem:[#allocation2 + $0x122] sm:$0xff] }
 0x19e   : > { %2864 = vst [vmem:[%s4784_s8 + $0x78] sm:$0xff] %v2832_v56  ;;  %v2290_v13 = vadd.f32 %v2258_v52, %v2189_v53  ;;  %v2461_v33 = vmul.f32 %v5133_v57, %v2424_v46  ;;  %v2057_v27 = vmul.f32 %v5152_v22, %v2524_v20  ;;  %v1653_v18 = vmul.f32 %v5093_v39, %v5171_v63  ;;  %v2324_v20 = vld [vmem:[#allocation2 + $0x138] sm:$0xff]  ;;  %v5820_v53 = vld [vmem:[#allocation66_spill] sm:$0xff] }
 0x19f   : > { %v2694_v23 = vadd.f32 %v2662_v31, %v2593_v17  ;;  %v1988_v40 = vadd.f32 %v1956_v44, %v1887_v3  ;;  %v1584_v12 = vadd.f32 %v1552_v32, %v1483_v42  ;;  %v2562_v11 = vmul.f32 %v5142_v59, %v2525_v36  ;;  %v5267_v44 = vld [vmem:[#allocation2 + $0x13c] sm:$0xff] }
 0x1a0   : > { %v2392_v48 = vadd.f32 %v2360_v60, %v2290_v13  ;;  %v2663_v61 = vmul.f32 %v5148_v51, %v5233_v62  ;;  %v2158_v43 = vmul.f32 %v5101_v37, %v5203_v29  ;;  %v1754_v31 = vmul.f32 %v5107_v9, %v5185_v4 }
 0x1a1   : > { %v2795_v38 = vadd.f32 %v2763_v24, %v2694_v23  ;;  %v2089_v15 = vadd.f32 %v2057_v27, %v1988_v40  ;;  %v1685_v7 = vadd.f32 %v1653_v18, %v1584_v12  ;;  %v2259_v63 = vmul.f32 %v5111_v8, %v5213_v14  ;;  %v5262_v24 = vld [vmem:[#allocation2 + $0x13b] sm:$0xff] }
 0x1a2   : > { %v2493_v1 = vadd.f32 %v2461_v33, %v2392_v48  ;;  %v1383_v16 = vadd.f32 %v5819_v58, %v5818_v45  ;;  %v1553_v34 = vmul.f32 %v3138_v54, %v5074_v49  ;;  %v1856_v21 = vmul.f32 %v5121_v35, %v2323_v47  ;;  %v3139_v58 = vld [vmem:[#allocation2 + $0x12a] sm:$0xff] }
 0x1a3   : > { %v2833_v28 = vadd.f32 %v5226_v0, %v2795_v38  ;;  %v2190_v30 = vadd.f32 %v2158_v43, %v2089_v15  ;;  %v1786_v50 = vadd.f32 %v1754_v31, %v1685_v7  ;;  %v2764_v32 = vmul.f32 %v5156_v25, %v5248_v2  ;;  %v2325_v38 = vld [vmem:[#allocation2 + $0x140] sm:$0xff]  ;;  %v5821_v7 = vld [vmem:[#allocation67_spill] sm:$0xff] }
 0x1a4   : > { %v2594_v4 = vadd.f32 %v2562_v11, %v2493_v1  ;;  %v2361_v56 = vmul.f32 %v5126_v10, %v2324_v20  ;;  %v1484_v52 = vadd.f32 %v5820_v53, %v1383_v16  ;;  %v2462_v3 = vmul.f32 %v5133_v57, %v2425_v6  ;;  %v2426_v15 = vld [vmem:[#allocation2 + $0x141] sm:$0xff] }
 0x1a5   : > { %2865 = vst [vmem:[%s4784_s8 + $0x80] sm:$0xff] %v2833_v28  ;;  %v2291_v17 = vadd.f32 %v2259_v63, %v2190_v30  ;;  %v1888_v26 = vadd.f32 %v1856_v21, %v1786_v50  ;;  %v1957_v42 = vmul.f32 %v5138_v19, %v2424_v46  ;;  %v2563_v13 = vmul.f32 %v5142_v59, %v2526_v55  ;;  %v5822_v31 = vld [vmem:[#allocation68_spill] sm:$0xff]  ;;  %v5823_v50 = vld [vmem:[#allocation69_spill] sm:$0xff] }
 0x1a6   : > { %v2695_v47 = vadd.f32 %v2663_v61, %v2594_v4  ;;  %v1585_v60 = vadd.f32 %v1553_v34, %v1484_v52  ;;  %v1654_v33 = vmul.f32 %v5093_v39, %v5203_v29  ;;  %v2664_v23 = vmul.f32 %v5148_v51, %v5262_v24  ;;  %v2527_v28 = vld [vmem:[#allocation2 + $0x142] sm:$0xff] }
 0x1a7   : > { %v2393_v27 = vadd.f32 %v2361_v56, %v2291_v17  ;;  %v1989_v40 = vadd.f32 %v1957_v42, %v1888_v26  ;;  %v2058_v12 = vmul.f32 %v5152_v22, %v2525_v36  ;;  %v2765_v48 = vmul.f32 %v5156_v25, %v5267_v44  ;;  %v5289_v30 = vld [vmem:[#allocation2 + $0x143] sm:$0xff] }
 0x1a8   : > { %v2796_v18 = vadd.f32 %v2764_v32, %v2695_v47  ;;  %v1686_v11 = vadd.f32 %v1654_v33, %v1585_v60  ;;  %v1755_v46 = vmul.f32 %v5107_v9, %v5213_v14  ;;  %v2159_v29 = vmul.f32 %v5101_v37, %v5233_v62 }
 0x1a9   : > { %v2494_v61 = vadd.f32 %v2462_v3, %v2393_v27  ;;  %v2090_v43 = vadd.f32 %v2058_v12, %v1989_v40  ;;  %v1384_v1 = vadd.f32 %v5822_v31, %v5821_v7  ;;  %v1857_v45 = vmul.f32 %v5121_v35, %v2324_v20  ;;  %v5302_v27 = vld [vmem:[#allocation2 + $0x144] sm:$0xff]  ;;  %v2326_v12 = vld [vmem:[#allocation2 + $0x150] sm:$0xff]  ;;  %v3140_v7 = vld [vmem:[#allocation2 + $0x13a] sm:$0xff] }
 0x1aa   : > { %v2834_v36 = vadd.f32 %v5226_v0, %v2796_v18  ;;  %v1787_v63 = vadd.f32 %v1755_v46, %v1686_v11  ;;  %v1554_v16 = vmul.f32 %v3139_v58, %v5074_v49  ;;  %v2260_v34 = vmul.f32 %v5111_v8, %v5248_v2  ;;  %v5824_v11 = vld [vmem:[#allocation70_spill] sm:$0xff]  ;;  %v5825_v46 = vld [vmem:[#allocation71_spill] sm:$0xff] }
 0x1ab   : > { %v2595_v14 = vadd.f32 %v2563_v13, %v2494_v61  ;;  %v2191_v54 = vadd.f32 %v2159_v29, %v2090_v43  ;;  %v1485_v21 = vadd.f32 %v5823_v50, %v1384_v1  ;;  %v2362_v4 = vmul.f32 %v5126_v10, %v2325_v38  ;;  %v2427_v43 = vld [vmem:[#allocation2 + $0x151] sm:$0xff] }
 0x1ac   : > { %2866 = vst [vmem:[%s4784_s8 + $0x88] sm:$0xff] %v2834_v36  ;;  %v2463_v32 = vmul.f32 %v5133_v57, %v2426_v15  ;;  %v1889_v56 = vadd.f32 %v1857_v45, %v1787_v63  ;;  %v1958_v20 = vmul.f32 %v5138_v19, %v2425_v6  ;;  %v1655_v3 = vmul.f32 %v5093_v39, %v5233_v62  ;;  %v2528_v63 = vld [vmem:[#allocation2 + $0x152] sm:$0xff] }
 0x1ad   : > { %v2696_v53 = vadd.f32 %v2664_v23, %v2595_v14  ;;  %v2292_v52 = vadd.f32 %v2260_v34, %v2191_v54  ;;  %v1586_v17 = vadd.f32 %v1554_v16, %v1485_v21  ;;  %v2564_v26 = vmul.f32 %v5142_v59, %v2527_v28  ;;  %v5320_v14 = vld [vmem:[#allocation2 + $0x153] sm:$0xff] }
 0x1ae   : > { %v2665_v42 = vmul.f32 %v5148_v51, %v5289_v30  ;;  %v1990_v47 = vadd.f32 %v1958_v20, %v1889_v56  ;;  %v2059_v13 = vmul.f32 %v5152_v22, %v2526_v55  ;;  %v1756_v6 = vmul.f32 %v5107_v9, %v5248_v2 }
 0x1af   : > { %v2797_v60 = vadd.f32 %v2765_v48, %v2696_v53  ;;  %v2394_v33 = vadd.f32 %v2362_v4, %v2292_v52  ;;  %v1687_v40 = vadd.f32 %v1655_v3, %v1586_v17  ;;  %v2160_v62 = vmul.f32 %v5101_v37, %v5262_v24 }
 0x1b0   : > { %v2091_v23 = vadd.f32 %v2059_v13, %v1990_v47  ;;  %v1858_v18 = vmul.f32 %v5121_v35, %v2325_v38  ;;  %v1385_v61 = vadd.f32 %v5825_v46, %v5824_v11  ;;  %v1555_v31 = vmul.f32 %v3140_v7, %v5074_v49  ;;  %v5826_v38 = vld [vmem:[#allocation72_spill] sm:$0xff] }
 0x1b1   : > { %v2835_v55 = vadd.f32 %v5226_v0, %v2797_v60  ;;  %v2495_v48 = vadd.f32 %v2463_v32, %v2394_v33  ;;  %v1788_v29 = vadd.f32 %v1756_v6, %v1687_v40  ;;  %v2766_v2 = vmul.f32 %v5156_v25, %v5302_v27  ;;  %v2327_v40 = vld [vmem:[#allocation2 + $0x158] sm:$0xff]  ;;  %v3141_v11 = vld [vmem:[#allocation2 + $0x142] sm:$0xff] }
 0x1b2   : > { %v2192_v1 = vadd.f32 %v2160_v62, %v2091_v23  ;;  %v2261_v36 = vmul.f32 %v5111_v8, %v5267_v44  ;;  %v1486_v45 = vadd.f32 %v5826_v38, %v1385_v61  ;;  %v2363_v16 = vmul.f32 %v5126_v10, %v2326_v12  ;;  %v5827_v23 = vld [vmem:[#allocation73_spill] sm:$0xff]  ;;  %v5828_v62 = vld [vmem:[#allocation74_spill] sm:$0xff]  ;;  %v5345_v7 = vld [vmem:[#allocation2 + $0x15b] sm:$0xff] }
 0x1b3   : > { %2867 = vst [vmem:[%s4784_s8 + $0x90] sm:$0xff] %v2835_v55  ;;  %v2596_v58 = vadd.f32 %v2564_v26, %v2495_v48  ;;  %v1890_v54 = vadd.f32 %v1858_v18, %v1788_v29  ;;  %v1959_v34 = vmul.f32 %v5138_v19, %v2426_v15  ;;  %v2464_v21 = vmul.f32 %v5133_v57, %v2427_v43  ;;  %v5330_v26 = vld [vmem:[#allocation2 + $0x154] sm:$0xff] }
 0x1b4   : > { %v2293_v50 = vadd.f32 %v2261_v36, %v2192_v1  ;;  %v1587_v4 = vadd.f32 %v1555_v31, %v1486_v45  ;;  %v1656_v32 = vmul.f32 %v5093_v39, %v5262_v24  ;;  %v2565_v20 = vmul.f32 %v5142_v59, %v2528_v63  ;;  %v2529_v29 = vld [vmem:[#allocation2 + $0x15a] sm:$0xff] }
 0x1b5   : > { %v2697_v56 = vadd.f32 %v2665_v42, %v2596_v58  ;;  %v1991_v53 = vadd.f32 %v1959_v34, %v1890_v54  ;;  %v2060_v52 = vmul.f32 %v5152_v22, %v2527_v28  ;;  %v2666_v3 = vmul.f32 %v5148_v51, %v5320_v14  ;;  %v2428_v28 = vld [vmem:[#allocation2 + $0x159] sm:$0xff] }
 0x1b6   : > { %v2395_v17 = vadd.f32 %v2363_v16, %v2293_v50  ;;  %v1688_v15 = vadd.f32 %v1656_v32, %v1587_v4  ;;  %v1757_v47 = vmul.f32 %v5107_v9, %v5267_v44  ;;  %v2161_v24 = vmul.f32 %v5101_v37, %v5289_v30  ;;  %v5829_v1 = vld [vmem:[#allocation76_spill] sm:$0xff] }
 0x1b7   : > { %v2798_v13 = vadd.f32 %v2766_v2, %v2697_v56  ;;  %v2092_v60 = vadd.f32 %v2060_v52, %v1991_v53  ;;  %v1859_v42 = vmul.f32 %v5121_v35, %v2326_v12  ;;  %v1386_v18 = vadd.f32 %v5828_v62, %v5827_v23  ;;  %v5360_v53 = vld [vmem:[#allocation2 + $0x15c] sm:$0xff]  ;;  %v2530_v62 = vld [vmem:[#allocation2 + $0x16a] sm:$0xff] }
 0x1b8   : > { %v2496_v33 = vadd.f32 %v2464_v21, %v2395_v17  ;;  %v1789_v6 = vadd.f32 %v1757_v47, %v1688_v15  ;;  %v1556_v46 = vmul.f32 %v3141_v11, %v5074_v49  ;;  %v2767_v61 = vmul.f32 %v5156_v25, %v5330_v26  ;;  %v2429_v47 = vld [vmem:[#allocation2 + $0x169] sm:$0xff] }
 0x1b9   : > { %v2836_v44 = vadd.f32 %v5226_v0, %v2798_v13  ;;  %v2193_v55 = vadd.f32 %v2161_v24, %v2092_v60  ;;  %v2262_v12 = vmul.f32 %v5111_v8, %v5302_v27  ;;  %v1960_v2 = vmul.f32 %v5138_v19, %v2427_v43  ;;  %v5830_v13 = vld [vmem:[#allocation75_spill] sm:$0xff]  ;;  %v5831_v60 = vld [vmem:[#allocation77_spill] sm:$0xff] }
 0x1ba   : > { %v2597_v48 = vadd.f32 %v2565_v20, %v2496_v33  ;;  %v1891_v31 = vadd.f32 %v1859_v42, %v1789_v6  ;;  %v1487_v36 = vadd.f32 %v5829_v1, %v1386_v18  ;;  %v2364_v45 = vmul.f32 %v5126_v10, %v2327_v40  ;;  %v3142_v42 = vld [vmem:[#allocation2 + $0x152] sm:$0xff] }
 0x1bb   : > { %2868 = vst [vmem:[%s4784_s8 + $0x98] sm:$0xff] %v2836_v44  ;;  %v2294_v38 = vadd.f32 %v2262_v12, %v2193_v55  ;;  %v2465_v58 = vmul.f32 %v5133_v57, %v2428_v28  ;;  %v2061_v16 = vmul.f32 %v5152_v22, %v2528_v63  ;;  %v1657_v21 = vmul.f32 %v5093_v39, %v5289_v30  ;;  %v2328_v63 = vld [vmem:[#allocation2 + $0x168] sm:$0xff]  ;;  %v5832_v55 = vld [vmem:[#allocation78_spill] sm:$0xff] }
 0x1bc   : > { %v2698_v54 = vadd.f32 %v2666_v3, %v2597_v48  ;;  %v1992_v34 = vadd.f32 %v1960_v2, %v1891_v31  ;;  %v1588_v50 = vadd.f32 %v1556_v46, %v1487_v36  ;;  %v2566_v32 = vmul.f32 %v5142_v59, %v2529_v29  ;;  %v5379_v2 = vld [vmem:[#allocation2 + $0x16c] sm:$0xff] }
 0x1bd   : > { %v2396_v4 = vadd.f32 %v2364_v45, %v2294_v38  ;;  %v2667_v43 = vmul.f32 %v5148_v51, %v5345_v7  ;;  %v2162_v56 = vmul.f32 %v5101_v37, %v5320_v14  ;;  %v1758_v3 = vmul.f32 %v5107_v9, %v5302_v27 }
 0x1be   : > { %v2799_v20 = vadd.f32 %v2767_v61, %v2698_v54  ;;  %v2093_v52 = vadd.f32 %v2061_v16, %v1992_v34  ;;  %v1689_v17 = vadd.f32 %v1657_v21, %v1588_v50  ;;  %v2263_v30 = vmul.f32 %v5111_v8, %v5330_v26  ;;  %v5374_v61 = vld [vmem:[#allocation2 + $0x16b] sm:$0xff] }
 0x1bf   : > { %v2497_v15 = vadd.f32 %v2465_v58, %v2396_v4  ;;  %v1387_v24 = vadd.f32 %v5831_v60, %v5830_v13  ;;  %v1557_v33 = vmul.f32 %v3142_v42, %v5074_v49  ;;  %v1860_v11 = vmul.f32 %v5121_v35, %v2327_v40  ;;  %v3143_v60 = vld [vmem:[#allocation2 + $0x15a] sm:$0xff] }
 0x1c0   : > { %v2837_v6 = vadd.f32 %v5226_v0, %v2799_v20  ;;  %v2194_v23 = vadd.f32 %v2162_v56, %v2093_v52  ;;  %v1790_v18 = vadd.f32 %v1758_v3, %v1689_v17  ;;  %v2768_v46 = vmul.f32 %v5156_v25, %v5360_v53  ;;  %v2329_v20 = vld [vmem:[#allocation2 + $0x170] sm:$0xff]  ;;  %v5833_v17 = vld [vmem:[#allocation79_spill] sm:$0xff]  ;;  %v5834_v3 = vld [vmem:[#allocation80_spill] sm:$0xff] }
 0x1c1   : > { %v2598_v27 = vadd.f32 %v2566_v32, %v2497_v15  ;;  %v2365_v44 = vmul.f32 %v5126_v10, %v2328_v63  ;;  %v1488_v12 = vadd.f32 %v5832_v55, %v1387_v24  ;;  %v2466_v31 = vmul.f32 %v5133_v57, %v2429_v47  ;;  %v2430_v52 = vld [vmem:[#allocation2 + $0x171] sm:$0xff] }
 0x1c2   : > { %2869 = vst [vmem:[%s4784_s8 + $0xa0] sm:$0xff] %v2837_v6  ;;  %v2295_v48 = vadd.f32 %v2263_v30, %v2194_v23  ;;  %v1892_v1 = vadd.f32 %v1860_v11, %v1790_v18  ;;  %v1961_v36 = vmul.f32 %v5138_v19, %v2428_v28  ;;  %v2567_v38 = vmul.f32 %v5142_v59, %v2530_v62  ;;  %v2531_v6 = vld [vmem:[#allocation2 + $0x172] sm:$0xff]  ;;  %v5835_v18 = vld [vmem:[#allocation81_spill] sm:$0xff] }
 0x1c3   : > { %v2699_v40 = vadd.f32 %v2667_v43, %v2598_v27  ;;  %v1589_v45 = vadd.f32 %v1557_v33, %v1488_v12  ;;  %v1658_v58 = vmul.f32 %v5093_v39, %v5320_v14  ;;  %v2668_v54 = vmul.f32 %v5148_v51, %v5374_v61  ;;  %v5401_v23 = vld [vmem:[#allocation2 + $0x173] sm:$0xff] }
 0x1c4   : > { %v2397_v16 = vadd.f32 %v2365_v44, %v2295_v48  ;;  %v1993_v34 = vadd.f32 %v1961_v36, %v1892_v1  ;;  %v2062_v50 = vmul.f32 %v5152_v22, %v2529_v29  ;;  %v2769_v4 = vmul.f32 %v5156_v25, %v5379_v2 }
 0x1c5   : > { %v2800_v21 = vadd.f32 %v2768_v46, %v2699_v40  ;;  %v1690_v32 = vadd.f32 %v1658_v58, %v1589_v45  ;;  %v1759_v28 = vmul.f32 %v5107_v9, %v5330_v26  ;;  %v2163_v14 = vmul.f32 %v5101_v37, %v5345_v7 }
 0x1c6   : > { %v2498_v43 = vadd.f32 %v2466_v31, %v2397_v16  ;;  %v2094_v56 = vadd.f32 %v2062_v50, %v1993_v34  ;;  %v1388_v15 = vadd.f32 %v5834_v3, %v5833_v17  ;;  %v1861_v13 = vmul.f32 %v5121_v35, %v2328_v63  ;;  %v5414_v16 = vld [vmem:[#allocation2 + $0x174] sm:$0xff]  ;;  %v2330_v50 = vld [vmem:[#allocation2 + $0x180] sm:$0xff]  ;;  %v3144_v17 = vld [vmem:[#allocation2 + $0x16a] sm:$0xff] }
 0x1c7   : > { %v2838_v29 = vadd.f32 %v5226_v0, %v2800_v21  ;;  %v1791_v30 = vadd.f32 %v1759_v28, %v1690_v32  ;;  %v1558_v24 = vmul.f32 %v3143_v60, %v5074_v49  ;;  %v2264_v33 = vmul.f32 %v5111_v8, %v5360_v53  ;;  %v5836_v32 = vld [vmem:[#allocation82_spill] sm:$0xff]  ;;  %v5837_v28 = vld [vmem:[#allocation84_spill] sm:$0xff] }
 0x1c8   : > { %v2599_v26 = vadd.f32 %v2567_v38, %v2498_v43  ;;  %v2195_v42 = vadd.f32 %v2163_v14, %v2094_v56  ;;  %v1489_v11 = vadd.f32 %v5835_v18, %v1388_v15  ;;  %v2366_v27 = vmul.f32 %v5126_v10, %v2329_v20  ;;  %v2431_v56 = vld [vmem:[#allocation2 + $0x181] sm:$0xff] }
 0x1c9   : > { %2870 = vst [vmem:[%s4784_s8 + $0xa8] sm:$0xff] %v2838_v29  ;;  %v2467_v46 = vmul.f32 %v5133_v57, %v2430_v52  ;;  %v1893_v44 = vadd.f32 %v1861_v13, %v1791_v30  ;;  %v1962_v63 = vmul.f32 %v5138_v19, %v2429_v47  ;;  %v1659_v31 = vmul.f32 %v5093_v39, %v5345_v7  ;;  %v2532_v30 = vld [vmem:[#allocation2 + $0x182] sm:$0xff] }
 0x1ca   : > { %v2700_v55 = vadd.f32 %v2668_v54, %v2599_v26  ;;  %v2296_v12 = vadd.f32 %v2264_v33, %v2195_v42  ;;  %v1590_v48 = vadd.f32 %v1558_v24, %v1489_v11  ;;  %v2568_v1 = vmul.f32 %v5142_v59, %v2531_v6  ;;  %v5432_v26 = vld [vmem:[#allocation2 + $0x183] sm:$0xff] }
 0x1cb   : > { %v2669_v36 = vmul.f32 %v5148_v51, %v5401_v23  ;;  %v1994_v40 = vadd.f32 %v1962_v63, %v1893_v44  ;;  %v2063_v38 = vmul.f32 %v5152_v22, %v2530_v62  ;;  %v1760_v47 = vmul.f32 %v5107_v9, %v5360_v53 }
 0x1cc   : > { %v2801_v45 = vadd.f32 %v2769_v4, %v2700_v55  ;;  %v2398_v58 = vadd.f32 %v2366_v27, %v2296_v12  ;;  %v1691_v34 = vadd.f32 %v1659_v31, %v1590_v48  ;;  %v2164_v7 = vmul.f32 %v5101_v37, %v5374_v61 }
 0x1cd   : > { %v2095_v54 = vadd.f32 %v2063_v38, %v1994_v40  ;;  %v1862_v21 = vmul.f32 %v5121_v35, %v2329_v20  ;;  %v1389_v43 = vadd.f32 %v5837_v28, %v5836_v32  ;;  %v1559_v3 = vmul.f32 %v3144_v17, %v5074_v49  ;;  %v5838_v20 = vld [vmem:[#allocation85_spill] sm:$0xff]  ;;  %v3145_v32 = vld [vmem:[#allocation2 + $0x172] sm:$0xff] }
 0x1ce   : > { %v2839_v62 = vadd.f32 %v5226_v0, %v2801_v45  ;;  %v2499_v4 = vadd.f32 %v2467_v46, %v2398_v58  ;;  %v1792_v14 = vadd.f32 %v1760_v47, %v1691_v34  ;;  %v2770_v53 = vmul.f32 %v5156_v25, %v5414_v16  ;;  %v2331_v34 = vld [vmem:[#allocation2 + $0x188] sm:$0xff] }
 0x1cf   : > { %v2196_v15 = vadd.f32 %v2164_v7, %v2095_v54  ;;  %v2265_v29 = vmul.f32 %v5111_v8, %v5379_v2  ;;  %v1490_v13 = vadd.f32 %v5838_v20, %v1389_v43  ;;  %v2367_v24 = vmul.f32 %v5126_v10, %v2330_v50  ;;  %v5839_v54 = vld [vmem:[#allocation83_spill] sm:$0xff]  ;;  %v5840_v7 = vld [vmem:[#allocation86_spill] sm:$0xff] }
 0x1d0   : > { %2871 = vst [vmem:[%s4784_s8 + $0xb0] sm:$0xff] %v2839_v62  ;;  %v2600_v60 = vadd.f32 %v2568_v1, %v2499_v4  ;;  %v1894_v42 = vadd.f32 %v1862_v21, %v1792_v14  ;;  %v1963_v33 = vmul.f32 %v5138_v19, %v2430_v52  ;;  %v2468_v11 = vmul.f32 %v5133_v57, %v2431_v56  ;;  %v5442_v1 = vld [vmem:[#allocation2 + $0x184] sm:$0xff] }
 0x1d1   : > { %v2297_v18 = vadd.f32 %v2265_v29, %v2196_v15  ;;  %v1591_v27 = vadd.f32 %v1559_v3, %v1490_v13  ;;  %v1660_v46 = vmul.f32 %v5093_v39, %v5374_v61  ;;  %v2569_v63 = vmul.f32 %v5142_v59, %v2532_v30  ;;  %v2533_v14 = vld [vmem:[#allocation2 + $0x18a] sm:$0xff]  ;;  %v5841_v15 = vld [vmem:[#allocation87_spill] sm:$0xff] }
 0x1d2   : > { %v2701_v44 = vadd.f32 %v2669_v36, %v2600_v60  ;;  %v1995_v55 = vadd.f32 %v1963_v33, %v1894_v42  ;;  %v2064_v12 = vmul.f32 %v5152_v22, %v2531_v6  ;;  %v2670_v31 = vmul.f32 %v5148_v51, %v5432_v26  ;;  %v2432_v6 = vld [vmem:[#allocation2 + $0x189] sm:$0xff] }
 0x1d3   : > { %v2399_v48 = vadd.f32 %v2367_v24, %v2297_v18  ;;  %v1692_v52 = vadd.f32 %v1660_v46, %v1591_v27  ;;  %v1761_v40 = vmul.f32 %v5107_v9, %v5379_v2  ;;  %v2165_v61 = vmul.f32 %v5101_v37, %v5401_v23  ;;  %v5457_v17 = vld [vmem:[#allocation2 + $0x18b] sm:$0xff] }
 0x1d4   : > { %v2802_v38 = vadd.f32 %v2770_v53, %v2701_v44  ;;  %v2096_v45 = vadd.f32 %v2064_v12, %v1995_v55  ;;  %v1863_v36 = vmul.f32 %v5121_v35, %v2330_v50  ;;  %v1390_v21 = vadd.f32 %v5840_v7, %v5839_v54  ;;  %v5472_v55 = vld [vmem:[#allocation2 + $0x18c] sm:$0xff]  ;;  %v2534_v7 = vld [vmem:[#allocation2 + $0x19a] sm:$0xff] }
 0x1d5   : > { %v2500_v58 = vadd.f32 %v2468_v11, %v2399_v48  ;;  %v1793_v47 = vadd.f32 %v1761_v40, %v1692_v52  ;;  %v1560_v28 = vmul.f32 %v3145_v32, %v5074_v49  ;;  %v2771_v43 = vmul.f32 %v5156_v25, %v5442_v1  ;;  %v2433_v40 = vld [vmem:[#allocation2 + $0x199] sm:$0xff] }
 0x1d6   : > { %v2840_v2 = vadd.f32 %v5226_v0, %v2802_v38  ;;  %v2197_v62 = vadd.f32 %v2165_v61, %v2096_v45  ;;  %v2266_v50 = vmul.f32 %v5111_v8, %v5414_v16  ;;  %v1964_v53 = vmul.f32 %v5138_v19, %v2431_v56  ;;  %v5842_v38 = vld [vmem:[#allocation20_spill] sm:$0xff] }
 0x1d7   : > { %v2601_v4 = vadd.f32 %v2569_v63, %v2500_v58  ;;  %v1895_v3 = vadd.f32 %v1863_v36, %v1793_v47  ;;  %v1491_v29 = vadd.f32 %v5841_v15, %v1390_v21  ;;  %v2368_v13 = vmul.f32 %v5126_v10, %v2331_v34  ;;  %v5843_v45 = vld [vmem:[#allocation88_spill] sm:$0xff] }
 0x1d8   : > { %2872 = vst [vmem:[%s4784_s8 + $0xb8] sm:$0xff] %v2840_v2  ;;  %v2298_v20 = vadd.f32 %v2266_v50, %v2197_v62  ;;  %v2469_v60 = vmul.f32 %v5133_v57, %v2432_v6  ;;  %v2065_v24 = vmul.f32 %v5152_v22, %v2532_v30  ;;  %v1661_v11 = vmul.f32 %v5093_v39, %v5401_v23  ;;  %v2332_v30 = vld [vmem:[#allocation2 + $0x198] sm:$0xff]  ;;  %v3146_v36 = vld [vmem:[#allocation2 + $0x182] sm:$0xff] }
 0x1d9   : > { %v2702_v42 = vadd.f32 %v2670_v31, %v2601_v4  ;;  %v1996_v33 = vadd.f32 %v1964_v53, %v1895_v3  ;;  %v1592_v18 = vadd.f32 %v1560_v28, %v1491_v29  ;;  %v2570_v46 = vmul.f32 %v5142_v59, %v2533_v14  ;;  %v5844_v62 = vld [vmem:[#allocation89_spill] sm:$0xff]  ;;  %v5491_v53 = vld [vmem:[#allocation2 + $0x19c] sm:$0xff] }
 0x1da   : > { %v2400_v27 = vadd.f32 %v2368_v13, %v2298_v20  ;;  %v2671_v56 = vmul.f32 %v5148_v51, %v5457_v17  ;;  %v2166_v44 = vmul.f32 %v5101_v37, %v5432_v26  ;;  %v1762_v31 = vmul.f32 %v5107_v9, %v5414_v16 }
 0x1db   : > { %v2803_v63 = vadd.f32 %v2771_v43, %v2702_v42  ;;  %v2097_v12 = vadd.f32 %v2065_v24, %v1996_v33  ;;  %v1693_v48 = vadd.f32 %v1661_v11, %v1592_v18  ;;  %v2267_v23 = vmul.f32 %v5111_v8, %v5442_v1  ;;  %v5486_v43 = vld [vmem:[#allocation2 + $0x19b] sm:$0xff] }
 0x1dc   : > { %v2501_v52 = vadd.f32 %v2469_v60, %v2400_v27  ;;  %v1391_v61 = vadd.f32 %v5843_v45, %v5842_v38  ;;  %v1561_v58 = vmul.f32 %v3146_v36, %v5074_v49  ;;  %v1864_v32 = vmul.f32 %v5121_v35, %v2331_v34  ;;  %v3147_v45 = vld [vmem:[#allocation2 + $0x18a] sm:$0xff] }
 0x1dd   : > { %v2841_v47 = vadd.f32 %v5226_v0, %v2803_v63  ;;  %v2198_v54 = vadd.f32 %v2166_v44, %v2097_v12  ;;  %v1794_v21 = vadd.f32 %v1762_v31, %v1693_v48  ;;  %v2772_v28 = vmul.f32 %v5156_v25, %v5472_v55  ;;  %v2333_v63 = vld [vmem:[#allocation2 + $0x1a0] sm:$0xff]  ;;  %v5845_v48 = vld [vmem:[#allocation93_spill] sm:$0xff]  ;;  %v5846_v31 = vld [vmem:[#allocation90_spill] sm:$0xff] }
 0x1de   : > { %v2602_v16 = vadd.f32 %v2570_v46, %v2501_v52  ;;  %v2369_v2 = vmul.f32 %v5126_v10, %v2332_v30  ;;  %v1492_v50 = vadd.f32 %v5844_v62, %v1391_v61  ;;  %v2470_v3 = vmul.f32 %v5133_v57, %v2433_v40  ;;  %v2434_v12 = vld [vmem:[#allocation2 + $0x1a1] sm:$0xff] }
 0x1df   : > { %2873 = vst [vmem:[%s4784_s8 + $0xc0] sm:$0xff] %v2841_v47  ;;  %v2299_v4 = vadd.f32 %v2267_v23, %v2198_v54  ;;  %v1896_v15 = vadd.f32 %v1864_v32, %v1794_v21  ;;  %v1965_v29 = vmul.f32 %v5138_v19, %v2432_v6  ;;  %v2571_v20 = vmul.f32 %v5142_v59, %v2534_v7  ;;  %v2535_v47 = vld [vmem:[#allocation2 + $0x1a2] sm:$0xff]  ;;  %v5847_v21 = vld [vmem:[#allocation91_spill] sm:$0xff] }
 0x1e0   : > { %v2703_v34 = vadd.f32 %v2671_v56, %v2602_v16  ;;  %v1593_v13 = vadd.f32 %v1561_v58, %v1492_v50  ;;  %v1662_v60 = vmul.f32 %v5093_v39, %v5432_v26  ;;  %v2672_v42 = vmul.f32 %v5148_v51, %v5486_v43  ;;  %v5513_v54 = vld [vmem:[#allocation2 + $0x1a3] sm:$0xff] }
 0x1e1   : > { %v2401_v24 = vadd.f32 %v2369_v2, %v2299_v4  ;;  %v1997_v33 = vadd.f32 %v1965_v29, %v1896_v15  ;;  %v2066_v18 = vmul.f32 %v5152_v22, %v2533_v14  ;;  %v2773_v27 = vmul.f32 %v5156_v25, %v5491_v53 }
 0x1e2   : > { %v2804_v11 = vadd.f32 %v2772_v28, %v2703_v34  ;;  %v1694_v46 = vadd.f32 %v1662_v60, %v1593_v13  ;;  %v1763_v6 = vmul.f32 %v5107_v9, %v5442_v1  ;;  %v2167_v26 = vmul.f32 %v5101_v37, %v5457_v17 }
 0x1e3   : > { %v2502_v56 = vadd.f32 %v2470_v3, %v2401_v24  ;;  %v2098_v44 = vadd.f32 %v2066_v18, %v1997_v33  ;;  %v1392_v52 = vadd.f32 %v5846_v31, %v5845_v48  ;;  %v1865_v38 = vmul.f32 %v5121_v35, %v2332_v30  ;;  %v5528_v24 = vld [vmem:[#allocation2 + $0x1a4] sm:$0xff]  ;;  %v3148_v18 = vld [vmem:[#allocation2 + $0x19a] sm:$0xff]  ;;  %v5849_v48 = vld [vmem:[#allocation94_spill] sm:$0xff] }
 0x1e4   : > { %v2842_v14 = vadd.f32 %v5226_v0, %v2804_v11  ;;  %v1795_v23 = vadd.f32 %v1763_v6, %v1694_v46  ;;  %v1562_v61 = vmul.f32 %v3147_v45, %v5074_v49  ;;  %v2268_v58 = vmul.f32 %v5111_v8, %v5472_v55  ;;  %v3149_v11 = vld [vmem:[#allocation6 + $0xc] ss:$0 sm:$0xff]  ;;  %v2435_v6 = vld [vmem:[#allocation2 + $0x1b1] sm:$0xff] }
 0x1e5   : > { %v2603_v1 = vadd.f32 %v2571_v20, %v2502_v56  ;;  %v2199_v36 = vadd.f32 %v2167_v26, %v2098_v44  ;;  %v1493_v32 = vadd.f32 %v5847_v21, %v1392_v52  ;;  %v2370_v16 = vmul.f32 %v5126_v10, %v2333_v63  ;;  %v3150_v26 = vld [vmem:[#allocation2] sm:$0xff]  ;;  %v5549_v21 = vld [vmem:[#allocation6 + $0x12] ss:$0 sm:$0xff] }
 0x1e6   : > { %2874 = vst [vmem:[%s4784_s8 + $0xc8] sm:$0xff] %v2842_v14  ;;  %v2471_v28 = vmul.f32 %v5133_v57, %v2434_v12  ;;  %v1897_v2 = vadd.f32 %v1865_v38, %v1795_v23  ;;  %v1966_v30 = vmul.f32 %v5138_v19, %v2433_v40  ;;  %v1663_v4 = vmul.f32 %v5093_v39, %v5457_v17  ;;  %v5848_v17 = vld [vmem:[#allocation92_spill] sm:$0xff] }
 0x1e7   : > { %v2704_v62 = vadd.f32 %v2672_v42, %v2603_v1  ;;  %v2300_v49 = vadd.f32 %v2268_v58, %v2199_v36  ;;  %v1594_v50 = vadd.f32 %v1562_v61, %v1493_v32  ;;  %v2572_v3 = vmul.f32 %v5142_v59, %v2535_v47  ;;  %v3151_v61 = vld [vmem:[#allocation6 + $0xd] ss:$0 sm:$0xff] }
 0x1e8   : > { %v2673_v15 = vmul.f32 %v5148_v51, %v5513_v54  ;;  %v1998_v29 = vadd.f32 %v1966_v30, %v1897_v2  ;;  %v2067_v34 = vmul.f32 %v5152_v22, %v2534_v7  ;;  %v1764_v40 = vmul.f32 %v5107_v9, %v5472_v55 }
 0x1e9   : > { %v2805_v20 = vadd.f32 %v2773_v27, %v2704_v62  ;;  %v2402_v13 = vadd.f32 %v2370_v16, %v2300_v49  ;;  %v1695_v60 = vadd.f32 %v1663_v4, %v1594_v50  ;;  %v2168_v39 = vmul.f32 %v5101_v37, %v5486_v43  ;;  %v5850_v49 = vld [vmem:[#allocation95_spill] sm:$0xff] }
 0x1ea   : > { %v2099_v42 = vadd.f32 %v2067_v34, %v1998_v29  ;;  %v1393_v33 = vadd.f32 %v5848_v17, %v4823_v5  ;;  %v1563_v46 = vmul.f32 %v3149_v11, %v3148_v18  ;;  %v1866_v9 = vmul.f32 %v5121_v35, %v2333_v63 }
 0x1eb   : > { %v2843_v7 = vadd.f32 %v5226_v0, %v2805_v20  ;;  %v2503_v27 = vadd.f32 %v2471_v28, %v2402_v13  ;;  %v1796_v56 = vadd.f32 %v1764_v40, %v1695_v60  ;;  %v2269_v44 = vmul.f32 %v5111_v8, %v5491_v53  ;;  %v3153_v28 = vld [vmem:[#allocation6 + $0xe] ss:$0 sm:$0xff]  ;;  %v5851_v60 = vld [vmem:[#allocation96_spill] sm:$0xff] }
 0x1ec   : > { %v2200_v55 = vadd.f32 %v2168_v39, %v2099_v42  ;;  %v5539_v37 = vmul.f32 %v3150_v26, %v5126_v10  ;;  %v1494_v5 = vadd.f32 %v5849_v48, %v1393_v33  ;;  %v2774_v52 = vmul.f32 %v5156_v25, %v5528_v24  ;;  %v2536_v10 = vld [vmem:[#allocation2 + $0x1b2] sm:$0xff]  ;;  %v2638_v48 = vld [vmem:[#allocation2 + $0x1bb] sm:$0xff] }
 0x1ed   : > { %2875 = vst [vmem:[%s4784_s8 + $0xd0] sm:$0xff] %v2843_v7  ;;  %v2604_v31 = vadd.f32 %v2572_v3, %v2503_v27  ;;  %v1898_v14 = vadd.f32 %v1866_v9, %v1796_v56  ;;  %v1967_v23 = vmul.f32 %v5138_v19, %v2434_v12  ;;  %v2472_v63 = vmul.f32 %v5133_v57, %v2435_v6  ;;  %v2436_v39 = vld [vmem:[#allocation2 + $0x1b9] sm:$0xff]  ;;  %v3156_v27 = vld [vmem:[#allocation6 + $0x11] ss:$0 sm:$0xff]  ;;  %v3157_v9 = vld [vmem:[#allocation6 + $0x15] ss:$0 sm:$0xff] }
 0x1ee   : > { %v2301_v38 = vadd.f32 %v2269_v44, %v2200_v55  ;;  %v1595_v45 = vadd.f32 %v1563_v46, %v1494_v5  ;;  %v1664_v8 = vmul.f32 %v3151_v61, %v5486_v43  ;;  %v2068_v58 = vmul.f32 %v5152_v22, %v2535_v47  ;;  %v2637_v43 = vld [vmem:[#allocation2 + $0x1b3] sm:$0xff]  ;;  %v3154_v22 = vld [vmem:[#allocation2 + $0x1a2] sm:$0xff] }
 0x1ef   : > { %v2705_v1 = vadd.f32 %v2673_v15, %v2604_v31  ;;  %v1999_v36 = vadd.f32 %v1967_v23, %v1898_v14  ;;  %v2169_v32 = vmul.f32 %v5549_v21, %v5513_v54  ;;  %v1765_v57 = vmul.f32 %v3153_v28, %v5491_v53  ;;  %v2738_v53 = vld [vmem:[#allocation2 + $0x1b4] sm:$0xff]  ;;  %v2437_v14 = vld [vmem:[#allocation2 + $0x1c9] sm:$0xff] }
 0x1f0   : > { %v2403_v16 = vadd.f32 %v5539_v37, %v2301_v38  ;;  %v1696_v12 = vadd.f32 %v1664_v8, %v1595_v45  ;;  %v1867_v2 = vmul.f32 %v3150_v26, %v5121_v35  ;;  %v1394_v50 = vadd.f32 %v5850_v49, %v4834_v41  ;;  %v3155_v35 = vld [vmem:[#allocation6 + $0x13] ss:$0 sm:$0xff]  ;;  %v2537_v46 = vld [vmem:[#allocation2 + $0x1ba] sm:$0xff]  ;;  %v3159_v38 = vld [vmem:[#allocation6 + $0x10] ss:$0 sm:$0xff] }
 0x1f1   : > { %v2806_v30 = vadd.f32 %v2774_v52, %v2705_v1  ;;  %v2100_v62 = vadd.f32 %v2068_v58, %v1999_v36  ;;  %v1564_v47 = vmul.f32 %v3154_v22, %v3149_v11  ;;  %v2573_v3 = vmul.f32 %v5142_v59, %v2536_v10  ;;  %v3158_v52 = vld [vmem:[#allocation6 + $0x16] ss:$0 sm:$0xff]  ;;  %v2639_v22 = vld [vmem:[#allocation2 + $0x1cb] sm:$0xff] }
 0x1f2   : > { %v2504_v4 = vadd.f32 %v2472_v63, %v2403_v16  ;;  %v1797_v15 = vadd.f32 %v1765_v57, %v1696_v12  ;;  %v1968_v29 = vmul.f32 %v5138_v19, %v2435_v6  ;;  %v2270_v13 = vmul.f32 %v3155_v35, %v5528_v24 }
 0x1f3   : > { %v2844_v34 = vadd.f32 %v5226_v0, %v2806_v30  ;;  %v2201_v20 = vadd.f32 %v2169_v32, %v2100_v62  ;;  %v1495_v40 = vadd.f32 %v5851_v60, %v1394_v50  ;;  %v2674_v41 = vmul.f32 %v5148_v51, %v2637_v43  ;;  %v2538_v30 = vld [vmem:[#allocation2 + $0x1ca] sm:$0xff] }
 0x1f4   : > { %v2605_v42 = vadd.f32 %v2573_v3, %v2504_v4  ;;  %v1899_v17 = vadd.f32 %v1867_v2, %v1797_v15  ;;  %v1665_v18 = vmul.f32 %v3151_v61, %v5513_v54  ;;  %v2775_v11 = vmul.f32 %v5156_v25, %v2738_v53  ;;  %v2739_v61 = vld [vmem:[#allocation2 + $0x1bc] sm:$0xff] }
 0x1f5   : > { %2876 = vst [vmem:[%s4784_s8 + $0xd8] sm:$0xff] %v2844_v34  ;;  %v2302_v33 = vadd.f32 %v2270_v13, %v2201_v20  ;;  %v1596_v59 = vadd.f32 %v1564_v47, %v1495_v40  ;;  %v2069_v6 = vmul.f32 %v3156_v27, %v2536_v10  ;;  %v2473_v55 = vmul.f32 %v3157_v9, %v2436_v39  ;;  %v2740_v34 = vld [vmem:[#allocation2 + $0x1cc] sm:$0xff] }
 0x1f6   : > { %v2706_v19 = vadd.f32 %v2674_v41, %v2605_v42  ;;  %v2000_v7 = vadd.f32 %v1968_v29, %v1899_v17  ;;  %v1766_v51 = vmul.f32 %v3153_v28, %v5528_v24  ;;  %v2170_v31 = vmul.f32 %v5549_v21, %v2637_v43  ;;  %v3160_v24 = vld [vmem:[#allocation6 + $0x17] ss:$0 sm:$0xff]  ;;  %v3161_v28 = vld [vmem:[#allocation6 + $0x18] ss:$0 sm:$0xff] }
 0x1f7   : > { %v2404_v56 = vadd.f32 %v5539_v37, %v2302_v33  ;;  %v1697_v44 = vadd.f32 %v1665_v18, %v1596_v59  ;;  %v2574_v25 = vmul.f32 %v3158_v52, %v2537_v46  ;;  %v1969_v63 = vmul.f32 %v3159_v38, %v2436_v39  ;;  %v2539_v17 = vld [vmem:[#allocation2 + $0x1d2] sm:$0xff] }
 0x1f8   : > { %v2807_v26 = vadd.f32 %v2775_v11, %v2706_v19  ;;  %v2101_v5 = vadd.f32 %v2069_v6, %v2000_v7  ;;  %v2271_v1 = vmul.f32 %v3155_v35, %v2738_v53  ;;  %v2675_v36 = vmul.f32 %v3160_v24, %v2638_v48  ;;  %v2640_v59 = vld [vmem:[#allocation2 + $0x1d3] sm:$0xff] }
 0x1f9   : > { %v2505_v54 = vadd.f32 %v2473_v55, %v2404_v56  ;;  %v1798_v23 = vadd.f32 %v1766_v51, %v1697_v44  ;;  %v2474_v16 = vmul.f32 %v3157_v9, %v2437_v14  ;;  %v2776_v57 = vmul.f32 %v3161_v28, %v2739_v61  ;;  %v2741_v11 = vld [vmem:[#allocation2 + $0x1d4] sm:$0xff] }
 0x1fa   : > { %v2845_v45 = vadd.f32 %v5226_v0, %v2807_v26  ;;  %v2202_v8 = vadd.f32 %v2170_v31, %v2101_v5  ;;  %v2070_v62 = vmul.f32 %v3156_v27, %v2537_v46  ;;  %v2171_v4 = vmul.f32 %v5549_v21, %v2638_v48 }
 0x1fb   : > { %v2606_v10 = vadd.f32 %v2574_v25, %v2505_v54  ;;  %v1900_v58 = vadd.f32 %v1867_v2, %v1798_v23  ;;  %v2575_v15 = vmul.f32 %v3158_v52, %v2538_v30  ;;  %v2438_v2 = vld [vmem:[#allocation2 + $0x1d1] sm:$0xff]  ;;  %v2272_v20 = vmul.f32 %v3155_v35, %v2739_v61 }
 0x1fc   : > { %2877 = vst [vmem:[%s4784_s8 + $0xe0] sm:$0xff] %v2845_v45  ;;  %v2303_v32 = vadd.f32 %v2271_v1, %v2202_v8  ;;  %v2676_v60 = vmul.f32 %v3160_v24, %v2639_v22  ;;  %v2475_v42 = vmul.f32 %v3157_v9, %v2438_v2  ;;  %v2777_v39 = vmul.f32 %v3161_v28, %v2740_v34 }
 0x1fd   : > { %v2707_v12 = vadd.f32 %v2675_v36, %v2606_v10  ;;  %v2001_v43 = vadd.f32 %v1969_v63, %v1900_v58  ;;  %v2576_v19 = vmul.f32 %v3158_v52, %v2539_v17  ;;  %v2677_v7 = vmul.f32 %v3160_v24, %v2640_v59 }
 0x1fe   : > { %v2405_v49 = vadd.f32 %v5539_v37, %v2303_v32  ;;  %v2778_v6 = vmul.f32 %v3161_v28, %v2741_v11 }
 0x1ff   : > { %v2808_v50 = vadd.f32 %v2776_v57, %v2707_v12  ;;  %v2102_v47 = vadd.f32 %v2070_v62, %v2001_v43 }
 0x200   : > { %v2506_v3 = vadd.f32 %v2474_v16, %v2405_v49 }
 0x201   : > { %v2846_v29 = vadd.f32 %v5226_v0, %v2808_v50  ;;  %v2203_v53 = vadd.f32 %v2171_v4, %v2102_v47 }
 0x202   : > { %v2607_v13 = vadd.f32 %v2575_v15, %v2506_v3 }
 0x203   : > { %2878 = vst [vmem:[%s4784_s8 + $0xe8] sm:$0xff] %v2846_v29  ;;  %v2304_v40 = vadd.f32 %v2272_v20, %v2203_v53 }
 0x204   : > { %v2708_v41 = vadd.f32 %v2676_v60, %v2607_v13 }
 0x205   : > { %v2406_v21 = vadd.f32 %v5539_v37, %v2304_v40 }
 0x206   : > { %v2809_v33 = vadd.f32 %v2777_v39, %v2708_v41 }
 0x207   : > { %v2507_v18 = vadd.f32 %v2475_v42, %v2406_v21 }
 0x208   : > { %v2847_v35 = vadd.f32 %v5226_v0, %v2809_v33 }
 0x209   : > { %v2608_v46 = vadd.f32 %v2576_v19, %v2507_v18 }
 0x20a   : > { %2879 = vst [vmem:[%s4784_s8 + $0xf0] sm:$0xff] %v2847_v35 }
 0x20b   : > { %v2709_v27 = vadd.f32 %v2677_v7, %v2608_v46 }
 0x20d   : > { %v2810_v56 = vadd.f32 %v2778_v6, %v2709_v27 }
 0x20f   : > { %v2848_v37 = vadd.f32 %v5226_v0, %v2810_v56 }
 0x211   : > { %2880 = vst [vmem:[%s4784_s8 + $0xf8] sm:$0xff] %v2848_v37 }
 0x212   : > { %3233 = shalt.err (!%p3230_p7)
}
 0x213   : > { %s3234_s7 = scalar_lea.hbm %s5584_s28, 4096  ;;  %s3238_s18 = scalar_lea.hbm %s5635_s3, 8192 }
 0x214   : > { %p3235_p9 = scmp.ne.s32.totalorder %s5584_s28, %s3234_s7  ;;  %p3239_p5 = scmp.lt.u32.totalorder %s5584_s28, %s5635_s3 }
 0x215   : > { %p3240_p11 = scmp.lt.u32.totalorder %s3238_s18, %s3234_s7  ;;  %p3242_p4 = scmp.lt.u32.totalorder %s3234_s7, %s5584_s28 }
 0x216   : > { %p3236_p1 = pnand %p3235_p9, %p3414_p12 }
 0x217   : > { %p3241_p2 = por %p3240_p11, %p3239_p5 }
 0x218   : > { %p3237_p0 = pneg %p3236_p1 }
 0x219   : > { %p3243_p6 = por %p3242_p4, %p3241_p2 }
 0x21b   : > { %p3244_p8 = pnand %p3243_p6, %p3237_p0 }
 0x21d   : > { %3247 = shalt.err (!%p3244_p8)
}
 0x21e   : > { %s3298_s9 = smov 128   ;;  %s3299_s4 = smov 8  }
 0x21f   : > { %3028 = dma.vmem_to_hbm [thread:$0]  (%p3414_p12), %s5586_s5, 4096, %s5584_s28, %s2882_s23, %s3298_s9, %s3298_s9, %s3299_s4  }
 0x220 PF: > { %s2910_s25 = sand.u32 1, %s3278_s12   ;;  %p5852_p10 = scmp.ne.s32.totalorder %s5654_s19, 0 }
 0x221   : > { %p5853_p13 = scmp.ge.s32.totalorder %s3290_s15, 2  ;;  %s2911_s11 = scalar_lea.sflag [#allocation5], %s2910_s25 }
 0x223   : > { %p3039_p3 = pnand %p5853_p13, %p5852_p10 }
 0x225   : > { %3273 = dma.done.wait (!%p3039_p3), %s2911_s11, 4096  }
 0x226   : > { %3275 = vsyncadd (!%p3039_p3), %s2911_s11, 4294963200  ;;  %p17_p7 = scmp.ge.s32.totalorder %s3376_s24, 4   ;;  %s5854_s12 = smov %s3282_s13 }
 0x227   : > { %s5855_s13 = smov %s3286_s14  ;;  %s5856_s14 = smov %s3410_s17 }
 0x228   : > { %s5857_s15 = smov %s3376_s24  ;;  %19 = sbr.rel (!%p17_p7) target bundleno = 6 (0x6), region = 86 }
 0x22f   :  { %2916 = vsyncpa [#allocation4], 1 }
 0x230   :  { %2918 = vsyncpa [#allocation4 + $0x1], 1 }
 0x231   :  { %2919 = vsyncpa [#allocation7], 1 }
 0x232   :  { %2920 = vsyncpa [#allocation5], 1 }
 0x233   :  { %2922 = vsyncpa [#allocation5 + $0x1], 1 }

</bundles_post_ra>
